<compile_context>
chip_gen: v5e
topology: v5e:2x2
jax: 0.10.0
libtpu: 0.0.40
codegen_flags: <defaults>
</compile_context>

<pallas_src>
import numpy as np
import jax
import jax.numpy as jnp
from jax import lax
from jax.experimental import pallas as pl
from jax.experimental.pallas import tpu as pltpu

# ----- problem sizes (small, consistent with the module: channels divisible by 16) -----
B = 2
C_IN = 16
C_OUT = 32
STRIDE = 2
K_MAIN = 2 * STRIDE                   # = 4
T = 128
BT = B * T                            # folded lane width = 256
L_OUT = (T - K_MAIN) // STRIDE + 1    # = 63
L_PAD = 64                            # lane-dense padded per-sample output length
G_OUT = C_OUT // 16                   # main GroupNorm groups = 2
EPS = 1e-5
assert C_IN // 16 == 1                # residual GroupNorms have a single group


def _elu(v):
    return jnp.where(v > 0, v, jnp.exp(v) - 1.0)


# ------------------------------- the kernel -----------------------------------
def downsampling_kernel(x_ref, wdil_ref, w1x1_ref, wmain_ref, vres_ref, vmain_ref, out_ref):
    x = x_ref[...]                                             # (C_IN, BT), batch folded in lanes

    # hoisted lane-index helpers (built once, reused by every conv / GroupNorm)
    tmod = lax.broadcasted_iota(jnp.int32, (1, BT), 1) % T     # within-sample time index
    lane_s0 = lax.broadcasted_iota(jnp.int32, (1, BT), 1) < T  # sample-0 lane mask

    def gn_res(v, li):
        # GroupNorm(num_groups=1) per sample; samples live in lane halves [0:T), [T:2T).
        cnt = float(C_IN * T)
        cs = jnp.sum(v, axis=0, keepdims=True)                 # (1, BT)
        sq = jnp.sum(v * v, axis=0, keepdims=True)             # (1, BT)
        m0 = jnp.sum(cs[:, :T]) / cnt
        m1 = jnp.sum(cs[:, T:]) / cnt
        q0 = jnp.sum(sq[:, :T]) / cnt
        q1 = jnp.sum(sq[:, T:]) / cnt
        # single-pass E[x^2]-E[x]^2; adequate at these scales with eps=1e-5
        mean = jnp.where(lane_s0, m0, m1)
        var = jnp.where(lane_s0, q0 - m0 * m0, q1 - m1 * m1)
        inv = lax.rsqrt(var + EPS)
        return (v - mean) * inv * vres_ref[3 * li + 1] + vres_ref[3 * li + 2]

    def conv3_same(v, blk, d):
        # dilated k=3 'same' conv as ONE matmul: taps stacked along the contraction dim.
        x_m = jnp.where(tmod >= d, pltpu.roll(v, d, 1), 0.0)           # v[:, t-d], per-sample pad
        x_p = jnp.where(tmod < T - d, pltpu.roll(v, BT - d, 1), 0.0)   # v[:, t+d], per-sample pad
        xcat = jnp.concatenate([x_m, v, x_p], axis=0)                  # (3*C_IN, BT)
        return jnp.dot(wdil_ref[blk], xcat, preferred_element_type=jnp.float32)

    def res_pair(v, blk, d):
        # residual{n}1 (dilated conv + GN + ELU) then residual{n}2 (1x1 conv + GN + ELU)
        li = 2 * blk
        a = conv3_same(v, blk, d) + vres_ref[3 * li]
        a = _elu(gn_res(a, li))
        b = jnp.dot(w1x1_ref[blk], a, preferred_element_type=jnp.float32) + vres_ref[3 * (li + 1)]
        return _elu(gn_res(b, li + 1))

    o1 = x
    o3 = res_pair(o1, 0, 1)                  # residual11 -> residual12
    o5 = res_pair(o3 + o1, 1, 3)             # residual21 -> residual22
    t135 = o1 + o3 + o5                      # reused for both the o6 input and the main input
    o7 = res_pair(t135, 2, 9)                # residual31 -> residual32
    s = t135 + o7                            # (C_IN, BT)

    # main: Conv1d(C_IN->C_OUT, k=4, stride=2). All 4 taps fused into one weight matmul on
    # lane-rolled copies of s, then a stride-2 selection matmul built in-kernel from iota.
    s_stack = jnp.concatenate(
        [s,
         pltpu.roll(s, BT - 1, 1),
         pltpu.roll(s, BT - 2, 1),
         pltpu.roll(s, BT - 3, 1)], axis=0)                    # (K_MAIN*C_IN, BT); row 16k+c = s[c, t+k]
    p_full = jnp.dot(wmain_ref[...], s_stack,
                     preferred_element_type=jnp.float32)       # (C_OUT, BT) dense stride-1 conv
    ii = lax.broadcasted_iota(jnp.int32, (BT, B * L_PAD), 0)
    jj = lax.broadcasted_iota(jnp.int32, (BT, B * L_PAD), 1)
    sel = (ii == 2 * jj).astype(jnp.float32)                   # out col j <- p_full col 2j
    acc = jnp.dot(p_full, sel, preferred_element_type=jnp.float32) + vmain_ref[0]  # (C_OUT, 128)

    # main GroupNorm: 2 groups x 2 samples; only the first L_OUT of each 64-lane half is valid.
    jlane = lax.broadcasted_iota(jnp.int32, (1, B * L_PAD), 1)
    valid = ((jlane % L_PAD) < L_OUT).astype(jnp.float32)
    out_s0 = jlane < L_PAD
    gamma = vmain_ref[1]
    beta = vmain_ref[2]
    gs = C_OUT // G_OUT
    cntm = float(gs * L_OUT)
    parts = []
    for g in range(G_OUT):
        blk = acc[g * gs:(g + 1) * gs, :]
        bm = blk * valid
        cs = jnp.sum(bm, axis=0, keepdims=True)
        sq = jnp.sum(bm * bm, axis=0, keepdims=True)
        m0 = jnp.sum(cs[:, :L_PAD]) / cntm
        m1 = jnp.sum(cs[:, L_PAD:]) / cntm
        q0 = jnp.sum(sq[:, :L_PAD]) / cntm
        q1 = jnp.sum(sq[:, L_PAD:]) / cntm
        mean = jnp.where(out_s0, m0, m1)
        var = jnp.where(out_s0, q0 - m0 * m0, q1 - m1 * m1)
        inv = lax.rsqrt(var + EPS)
        parts.append((blk - mean) * inv * gamma[g * gs:(g + 1) * gs] + beta[g * gs:(g + 1) * gs])
    out_ref[...] = _elu(jnp.concatenate(parts, axis=0))        # lane-dense (C_OUT, 128) store


# ------------------------------ pallas wrapper ---------------------------------
def downsampling_pallas(x, packed):
    # fold batch into lanes: (B, C_IN, T) -> (C_IN, B*T)
    xf = jnp.transpose(x, (1, 0, 2)).reshape(C_IN, BT)
    out = pl.pallas_call(
        downsampling_kernel,
        out_shape=jax.ShapeDtypeStruct((C_OUT, B * L_PAD), jnp.float32),
        grid=(1,),
        in_specs=[
            pl.BlockSpec((C_IN, BT), lambda i: (0, 0)),                 # folded input
            pl.BlockSpec((3, C_IN, 3 * C_IN), lambda i: (0, 0, 0)),     # dilated conv weights (tap-concat)
            pl.BlockSpec((3, C_IN, C_IN), lambda i: (0, 0, 0)),         # 1x1 conv weights
            pl.BlockSpec((C_OUT, K_MAIN * C_IN), lambda i: (0, 0)),     # main conv weight (tap-concat)
            pl.BlockSpec((18, C_IN, 1), lambda i: (0, 0, 0)),           # residual bias/gamma/beta (packed)
            pl.BlockSpec((3, C_OUT, 1), lambda i: (0, 0, 0)),           # main bias/gamma/beta (packed)
        ],
        out_specs=pl.BlockSpec((C_OUT, B * L_PAD), lambda i: (0, 0)),
        compiler_params=pltpu.CompilerParams(dimension_semantics=("arbitrary",)),
    )(xf, packed["wdil"], packed["w1x1"], packed["wmain"], packed["vres"], packed["vmain"])
    # un-fold: (C_OUT, B*L_PAD) -> (B, C_OUT, L_OUT), dropping the padded 64th column
    return out.reshape(C_OUT, B, L_PAD).transpose(1, 0, 2)[:, :, :L_OUT]


# --------------------- deterministic parameter init / packing ---------------------
def init_params(key):
    ks = jax.random.split(key, 32)
    i = iter(range(32))

    def u(k, shape, fan_in):
        bnd = 1.0 / np.sqrt(fan_in)
        return jax.random.uniform(k, shape, jnp.float32, -bnd, bnd)

    p = {}
    for name in ("11", "21", "31"):                 # dilated k=3 convs
        p[f"w{name}"] = u(ks[next(i)], (C_IN, C_IN, 3), C_IN * 3)
        p[f"b{name}"] = u(ks[next(i)], (C_IN,), C_IN * 3)
    for name in ("12", "22", "32"):                 # k=1 convs
        p[f"w{name}"] = u(ks[next(i)], (C_IN, C_IN, 1), C_IN)
        p[f"b{name}"] = u(ks[next(i)], (C_IN,), C_IN)
    for name in ("11", "12", "21", "22", "31", "32"):  # GroupNorm affine params
        p[f"g{name}w"] = 1.0 + 0.1 * jax.random.normal(ks[next(i)], (C_IN,), jnp.float32)
        p[f"g{name}b"] = 0.1 * jax.random.normal(ks[next(i)], (C_IN,), jnp.float32)
    p["wm"] = u(ks[next(i)], (C_OUT, C_IN, K_MAIN), C_IN * K_MAIN)
    p["bm"] = u(ks[next(i)], (C_OUT,), C_IN * K_MAIN)
    p["gmw"] = 1.0 + 0.1 * jax.random.normal(ks[next(i)], (C_OUT,), jnp.float32)
    p["gmb"] = 0.1 * jax.random.normal(ks[next(i)], (C_OUT,), jnp.float32)
    return p


def pack_params(p):
    def dil_cat(w):  # (C, C, 3) -> (C, 3C); tap k occupies columns [k*C, (k+1)*C)
        return jnp.concatenate([w[:, :, 0], w[:, :, 1], w[:, :, 2]], axis=1)

    wdil = jnp.stack([dil_cat(p["w11"]), dil_cat(p["w21"]), dil_cat(p["w31"])])      # (3, 16, 48)
    w1x1 = jnp.stack([p["w12"][:, :, 0], p["w22"][:, :, 0], p["w32"][:, :, 0]])      # (3, 16, 16)
    wmain = jnp.concatenate([p["wm"][:, :, k] for k in range(K_MAIN)], axis=1)       # (32, 64)
    order = ("11", "12", "21", "22", "31", "32")
    rows = []
    for n in order:
        rows += [p[f"b{n}"], p[f"g{n}w"], p[f"g{n}b"]]
    vres = jnp.stack(rows)[:, :, None]                                               # (18, 16, 1)
    vmain = jnp.stack([p["bm"], p["gmw"], p["gmb"]])[:, :, None]                     # (3, 32, 1)
    return dict(wdil=wdil, w1x1=w1x1, wmain=wmain, vres=vres, vmain=vmain)


# ------------------------------ pure-JAX reference ------------------------------
def _gn_ref(x, gamma, beta, groups):
    b, c, t = x.shape
    xg = x.reshape(b, groups, (c // groups) * t)
    m = xg.mean(-1, keepdims=True)
    v = xg.var(-1, keepdims=True)
    xn = ((xg - m) * lax.rsqrt(v + EPS)).reshape(b, c, t)
    return xn * gamma[None, :, None] + beta[None, :, None]


def ref_forward(x, p):
    hp = lax.Precision.HIGHEST
    dn = ("NCH", "OIH", "NCH")

    def blk_dil(v, name, d):
        y = lax.conv_general_dilated(v, p[f"w{name}"], (1,), [(d, d)], rhs_dilation=(d,),
                                     dimension_numbers=dn, precision=hp)
        y = y + p[f"b{name}"][None, :, None]
        return _elu(_gn_ref(y, p[f"g{name}w"], p[f"g{name}b"], C_IN // 16))

    def blk_1x1(v, name):
        y = jnp.einsum("oi,bit->bot", p[f"w{name}"][:, :, 0], v, precision=hp)
        y = y + p[f"b{name}"][None, :, None]
        return _elu(_gn_ref(y, p[f"g{name}w"], p[f"g{name}b"], C_IN // 16))

    o1 = x
    o2 = blk_dil(o1, "11", 1)
    o3 = blk_1x1(o2, "12")
    o4 = blk_dil(o3 + o1, "21", 3)
    o5 = blk_1x1(o4, "22")
    o6 = blk_dil(o1 + o3 + o5, "31", 9)
    o7 = blk_1x1(o6, "32")
    s = o1 + o3 + o5 + o7
    y = lax.conv_general_dilated(s, p["wm"], (STRIDE,), "VALID",
                                 dimension_numbers=dn, precision=hp)
    y = y + p["bm"][None, :, None]
    return _elu(_gn_ref(y, p["gmw"], p["gmb"], G_OUT))


# ----------------------------------- main ---------------------------------------
if __name__ == "__main__":
    key = jax.random.PRNGKey(0)
    kx, kp = jax.random.split(key)
    x = jax.random.normal(kx, (B, C_IN, T), jnp.float32)
    raw = init_params(kp)
    packed = pack_params(raw)

    out = downsampling_pallas(x, packed)
    out = jax.block_until_ready(out)

    ref = ref_forward(x, raw)
    np.testing.assert_allclose(np.asarray(out), np.asarray(ref), rtol=1e-2, atol=1e-2)
    print("KERNEL_OK")
</pallas_src>

<mosaic_0001>
module attributes {stable_mosaic.version = 11 : i64} {
  func.func @downsampling_kernel(%arg0: i32, %arg1: memref<16x256xf32, #tpu.memory_space<vmem>>, %arg2: memref<3x16x48xf32, #tpu.memory_space<vmem>>, %arg3: memref<3x16x16xf32, #tpu.memory_space<vmem>>, %arg4: memref<32x64xf32, #tpu.memory_space<vmem>>, %arg5: memref<18x16x1xf32, #tpu.memory_space<vmem>>, %arg6: memref<3x32x1xf32, #tpu.memory_space<vmem>>, %arg7: memref<32x128xf32, #tpu.memory_space<vmem>>) attributes {dimension_semantics = [#tpu.dimension_semantics<arbitrary>], iteration_bounds = array<i64: 1>, scalar_prefetch = 0 : i64, scratch_operands = 0 : i64, tpu.core_type = #tpu.core_type<tc>, window_params = [{pipeline_mode = #tpu.pipeline_mode<synchronous>, transform_indices = @transform_0, window_bounds = array<i64: 16, 256>}, {pipeline_mode = #tpu.pipeline_mode<synchronous>, transform_indices = @transform_1, window_bounds = array<i64: 3, 16, 48>}, {pipeline_mode = #tpu.pipeline_mode<synchronous>, transform_indices = @transform_2, window_bounds = array<i64: 3, 16, 16>}, {pipeline_mode = #tpu.pipeline_mode<synchronous>, transform_indices = @transform_3, window_bounds = array<i64: 32, 64>}, {pipeline_mode = #tpu.pipeline_mode<synchronous>, transform_indices = @transform_4, window_bounds = array<i64: 18, 16, 1>}, {pipeline_mode = #tpu.pipeline_mode<synchronous>, transform_indices = @transform_5, window_bounds = array<i64: 3, 32, 1>}, {pipeline_mode = #tpu.pipeline_mode<synchronous>, transform_indices = @transform_6, window_bounds = array<i64: 32, 128>}]} {
    %c0 = arith.constant 0 : index
    %c0_0 = arith.constant 0 : index
    %0 = vector.load %arg1[%c0, %c0_0] : memref<16x256xf32, #tpu.memory_space<vmem>>, vector<16x256xf32>
    %1 = tpu.iota {dimensions = array<i32: 1>} : vector<1x256xi32>
    %c128_i32 = arith.constant 128 : i32
    %c0_i32 = arith.constant 0 : i32
    %2 = arith.cmpi eq, %c128_i32, %c0_i32 : i32
    %c1_i32 = arith.constant 1 : i32
    %3 = arith.select %2, %c1_i32, %c128_i32 : i32
    %4 = vector.broadcast %3 : i32 to vector<1x256xi32>
    %5 = arith.remsi %1, %4 : vector<1x256xi32>
    %c0_i32_1 = arith.constant 0 : i32
    %6 = vector.broadcast %c0_i32_1 : i32 to vector<1x256xi32>
    %7 = arith.cmpi ne, %5, %6 : vector<1x256xi32>
    %c0_i32_2 = arith.constant 0 : i32
    %8 = vector.broadcast %c0_i32_2 : i32 to vector<1x256xi32>
    %9 = arith.cmpi slt, %5, %8 : vector<1x256xi32>
    %c0_i32_3 = arith.constant 0 : i32
    %10 = arith.cmpi slt, %3, %c0_i32_3 : i32
    %11 = vector.broadcast %10 : i1 to vector<1x256xi1>
    %12 = vector.broadcast %11 : vector<1x256xi1> to vector<1x256xi1>
    %13 = arith.xori %9, %12 : vector<1x256xi1>
    %14 = arith.andi %13, %7 : vector<1x256xi1>
    %15 = vector.broadcast %3 : i32 to vector<1x256xi32>
    %16 = arith.addi %5, %15 : vector<1x256xi32>
    %17 = arith.select %14, %16, %5 : vector<1x256xi1>, vector<1x256xi32>
    %18 = tpu.iota {dimensions = array<i32: 1>} : vector<1x256xi32>
    %c128_i32_4 = arith.constant 128 : i32
    %19 = vector.broadcast %c128_i32_4 : i32 to vector<1x256xi32>
    %20 = arith.cmpi slt, %18, %19 : vector<1x256xi32>
    %c1_i32_5 = arith.constant 1 : i32
    %21 = vector.broadcast %c1_i32_5 : i32 to vector<1x256xi32>
    %22 = arith.cmpi sge, %17, %21 : vector<1x256xi32>
    %c1_i32_6 = arith.constant 1 : i32
    %23 = tpu.dynamic_rotate %0 by %c1_i32_6 dim 1 : vector<16x256xf32>, i32 -> vector<16x256xf32>
    %cst = arith.constant 0.000000e+00 : f32
    %24 = vector.shape_cast %22 : vector<1x256xi1> to vector<1x256xi1>
    %25 = vector.broadcast %24 : vector<1x256xi1> to vector<16x256xi1>
    %26 = vector.broadcast %cst : f32 to vector<16x256xf32>
    %27 = arith.select %25, %23, %26 : vector<16x256xi1>, vector<16x256xf32>
    %c127_i32 = arith.constant 127 : i32
    %28 = vector.broadcast %c127_i32 : i32 to vector<1x256xi32>
    %29 = arith.cmpi slt, %17, %28 : vector<1x256xi32>
    %c255_i32 = arith.constant 255 : i32
    %30 = tpu.dynamic_rotate %0 by %c255_i32 dim 1 : vector<16x256xf32>, i32 -> vector<16x256xf32>
    %cst_7 = arith.constant 0.000000e+00 : f32
    %31 = vector.shape_cast %29 : vector<1x256xi1> to vector<1x256xi1>
    %32 = vector.broadcast %31 : vector<1x256xi1> to vector<16x256xi1>
    %33 = vector.broadcast %cst_7 : f32 to vector<16x256xf32>
    %34 = arith.select %32, %30, %33 : vector<16x256xi1>, vector<16x256xf32>
    %35 = tpu.concatenate %27, %0, %34 in 0 : vector<16x256xf32>, vector<16x256xf32>, vector<16x256xf32> -> vector<48x256xf32>
    %c0_8 = arith.constant 0 : index
    %c0_9 = arith.constant 0 : index
    %c0_10 = arith.constant 0 : index
    %36 = vector.load %arg2[%c0_8, %c0_9, %c0_10] : memref<3x16x48xf32, #tpu.memory_space<vmem>>, vector<1x16x48xf32>
    %37 = vector.shape_cast %36 : vector<1x16x48xf32> to vector<16x48xf32>
    %cst_11 = arith.constant dense<0.000000e+00> : vector<16x256xf32>
    %38 = tpu.matmul %37, %35, %cst_11 {dimension_numbers = #tpu.dot_dimension_numbers<[1], [0], [0], [1], [0, 0, 1, 1], [], []>} : vector<16x48xf32>, vector<48x256xf32>, vector<16x256xf32> -> vector<16x256xf32>
    %c0_12 = arith.constant 0 : index
    %c0_13 = arith.constant 0 : index
    %c0_14 = arith.constant 0 : index
    %39 = vector.load %arg5[%c0_12, %c0_13, %c0_14] : memref<18x16x1xf32, #tpu.memory_space<vmem>>, vector<1x16x1xf32>
    %40 = vector.shape_cast %39 : vector<1x16x1xf32> to vector<16x1xf32>
    %41 = vector.broadcast %40 : vector<16x1xf32> to vector<16x256xf32>
    %42 = arith.addf %38, %41 : vector<16x256xf32>
    %cst_15 = arith.constant dense<0.000000e+00> : vector<256xf32>
    %43 = vector.multi_reduction <add>, %42, %cst_15 [0] : vector<16x256xf32> to vector<256xf32>
    %44 = vector.shape_cast %43 : vector<256xf32> to vector<1x256xf32>
    %45 = arith.mulf %42, %42 : vector<16x256xf32>
    %cst_16 = arith.constant dense<0.000000e+00> : vector<256xf32>
    %46 = vector.multi_reduction <add>, %45, %cst_16 [0] : vector<16x256xf32> to vector<256xf32>
    %47 = vector.shape_cast %46 : vector<256xf32> to vector<1x256xf32>
    %48 = vector.extract_strided_slice %44 {offsets = [0, 0], sizes = [1, 128], strides = [1, 1]} : vector<1x256xf32> to vector<1x128xf32>
    %49 = vector.shape_cast %48 : vector<1x128xf32> to vector<1x1x128xf32>
    %cst_17 = arith.constant dense<0.000000e+00> : vector<1xf32>
    %50 = vector.multi_reduction <add>, %49, %cst_17 [1, 2] : vector<1x1x128xf32> to vector<1xf32>
    %51 = vector.shape_cast %50 : vector<1xf32> to vector<1x1x1xf32>
    %52 = vector.extract %51[0, 0, 0] : f32 from vector<1x1x1xf32>
    %cst_18 = arith.constant 2.048000e+03 : f32
    %53 = arith.divf %52, %cst_18 : f32
    %54 = vector.extract_strided_slice %44 {offsets = [0, 128], sizes = [1, 128], strides = [1, 1]} : vector<1x256xf32> to vector<1x128xf32>
    %55 = vector.shape_cast %54 : vector<1x128xf32> to vector<1x1x128xf32>
    %cst_19 = arith.constant dense<0.000000e+00> : vector<1xf32>
    %56 = vector.multi_reduction <add>, %55, %cst_19 [1, 2] : vector<1x1x128xf32> to vector<1xf32>
    %57 = vector.shape_cast %56 : vector<1xf32> to vector<1x1x1xf32>
    %58 = vector.extract %57[0, 0, 0] : f32 from vector<1x1x1xf32>
    %cst_20 = arith.constant 2.048000e+03 : f32
    %59 = arith.divf %58, %cst_20 : f32
    %60 = vector.extract_strided_slice %47 {offsets = [0, 0], sizes = [1, 128], strides = [1, 1]} : vector<1x256xf32> to vector<1x128xf32>
    %61 = vector.shape_cast %60 : vector<1x128xf32> to vector<1x1x128xf32>
    %cst_21 = arith.constant dense<0.000000e+00> : vector<1xf32>
    %62 = vector.multi_reduction <add>, %61, %cst_21 [1, 2] : vector<1x1x128xf32> to vector<1xf32>
    %63 = vector.shape_cast %62 : vector<1xf32> to vector<1x1x1xf32>
    %64 = vector.extract %63[0, 0, 0] : f32 from vector<1x1x1xf32>
    %cst_22 = arith.constant 2.048000e+03 : f32
    %65 = arith.divf %64, %cst_22 : f32
    %66 = vector.extract_strided_slice %47 {offsets = [0, 128], sizes = [1, 128], strides = [1, 1]} : vector<1x256xf32> to vector<1x128xf32>
    %67 = vector.shape_cast %66 : vector<1x128xf32> to vector<1x1x128xf32>
    %cst_23 = arith.constant dense<0.000000e+00> : vector<1xf32>
    %68 = vector.multi_reduction <add>, %67, %cst_23 [1, 2] : vector<1x1x128xf32> to vector<1xf32>
    %69 = vector.shape_cast %68 : vector<1xf32> to vector<1x1x1xf32>
    %70 = vector.extract %69[0, 0, 0] : f32 from vector<1x1x1xf32>
    %cst_24 = arith.constant 2.048000e+03 : f32
    %71 = arith.divf %70, %cst_24 : f32
    %72 = vector.broadcast %53 : f32 to vector<1x256xf32>
    %73 = vector.broadcast %59 : f32 to vector<1x256xf32>
    %74 = arith.select %20, %72, %73 : vector<1x256xi1>, vector<1x256xf32>
    %75 = arith.mulf %53, %53 : f32
    %76 = arith.subf %65, %75 : f32
    %77 = arith.mulf %59, %59 : f32
    %78 = arith.subf %71, %77 : f32
    %79 = vector.broadcast %76 : f32 to vector<1x256xf32>
    %80 = vector.broadcast %78 : f32 to vector<1x256xf32>
    %81 = arith.select %20, %79, %80 : vector<1x256xi1>, vector<1x256xf32>
    %cst_25 = arith.constant 9.99999974E-6 : f32
    %82 = vector.broadcast %cst_25 : f32 to vector<1x256xf32>
    %83 = arith.addf %81, %82 : vector<1x256xf32>
    %84 = math.rsqrt %83 : vector<1x256xf32>
    %85 = vector.broadcast %74 : vector<1x256xf32> to vector<16x256xf32>
    %86 = arith.subf %42, %85 : vector<16x256xf32>
    %87 = vector.broadcast %84 : vector<1x256xf32> to vector<16x256xf32>
    %88 = arith.mulf %86, %87 : vector<16x256xf32>
    %c1 = arith.constant 1 : index
    %c0_26 = arith.constant 0 : index
    %c0_27 = arith.constant 0 : index
    %89 = vector.load %arg5[%c1, %c0_26, %c0_27] : memref<18x16x1xf32, #tpu.memory_space<vmem>>, vector<1x16x1xf32>
    %90 = vector.shape_cast %89 : vector<1x16x1xf32> to vector<16x1xf32>
    %91 = vector.broadcast %90 : vector<16x1xf32> to vector<16x256xf32>
    %92 = arith.mulf %88, %91 : vector<16x256xf32>
    %c2 = arith.constant 2 : index
    %c0_28 = arith.constant 0 : index
    %c0_29 = arith.constant 0 : index
    %93 = vector.load %arg5[%c2, %c0_28, %c0_29] : memref<18x16x1xf32, #tpu.memory_space<vmem>>, vector<1x16x1xf32>
    %94 = vector.shape_cast %93 : vector<1x16x1xf32> to vector<16x1xf32>
    %95 = vector.broadcast %94 : vector<16x1xf32> to vector<16x256xf32>
    %96 = arith.addf %92, %95 : vector<16x256xf32>
    %cst_30 = arith.constant 0.000000e+00 : f32
    %97 = vector.broadcast %cst_30 : f32 to vector<16x256xf32>
    %98 = arith.cmpf ogt, %96, %97 : vector<16x256xf32>
    %99 = math.exp %96 : vector<16x256xf32>
    %cst_31 = arith.constant 1.000000e+00 : f32
    %100 = vector.broadcast %cst_31 : f32 to vector<16x256xf32>
    %101 = arith.subf %99, %100 : vector<16x256xf32>
    %102 = arith.select %98, %96, %101 : vector<16x256xi1>, vector<16x256xf32>
    %c0_32 = arith.constant 0 : index
    %c0_33 = arith.constant 0 : index
    %c0_34 = arith.constant 0 : index
    %103 = vector.load %arg3[%c0_32, %c0_33, %c0_34] : memref<3x16x16xf32, #tpu.memory_space<vmem>>, vector<1x16x16xf32>
    %104 = vector.shape_cast %103 : vector<1x16x16xf32> to vector<16x16xf32>
    %cst_35 = arith.constant dense<0.000000e+00> : vector<16x256xf32>
    %105 = tpu.matmul %104, %102, %cst_35 {dimension_numbers = #tpu.dot_dimension_numbers<[1], [0], [0], [1], [0, 0, 1, 1], [], []>} : vector<16x16xf32>, vector<16x256xf32>, vector<16x256xf32> -> vector<16x256xf32>
    %c3 = arith.constant 3 : index
    %c0_36 = arith.constant 0 : index
    %c0_37 = arith.constant 0 : index
    %106 = vector.load %arg5[%c3, %c0_36, %c0_37] : memref<18x16x1xf32, #tpu.memory_space<vmem>>, vector<1x16x1xf32>
    %107 = vector.shape_cast %106 : vector<1x16x1xf32> to vector<16x1xf32>
    %108 = vector.broadcast %107 : vector<16x1xf32> to vector<16x256xf32>
    %109 = arith.addf %105, %108 : vector<16x256xf32>
    %cst_38 = arith.constant dense<0.000000e+00> : vector<256xf32>
    %110 = vector.multi_reduction <add>, %109, %cst_38 [0] : vector<16x256xf32> to vector<256xf32>
    %111 = vector.shape_cast %110 : vector<256xf32> to vector<1x256xf32>
    %112 = arith.mulf %109, %109 : vector<16x256xf32>
    %cst_39 = arith.constant dense<0.000000e+00> : vector<256xf32>
    %113 = vector.multi_reduction <add>, %112, %cst_39 [0] : vector<16x256xf32> to vector<256xf32>
    %114 = vector.shape_cast %113 : vector<256xf32> to vector<1x256xf32>
    %115 = vector.extract_strided_slice %111 {offsets = [0, 0], sizes = [1, 128], strides = [1, 1]} : vector<1x256xf32> to vector<1x128xf32>
    %116 = vector.shape_cast %115 : vector<1x128xf32> to vector<1x1x128xf32>
    %cst_40 = arith.constant dense<0.000000e+00> : vector<1xf32>
    %117 = vector.multi_reduction <add>, %116, %cst_40 [1, 2] : vector<1x1x128xf32> to vector<1xf32>
    %118 = vector.shape_cast %117 : vector<1xf32> to vector<1x1x1xf32>
    %119 = vector.extract %118[0, 0, 0] : f32 from vector<1x1x1xf32>
    %cst_41 = arith.constant 2.048000e+03 : f32
    %120 = arith.divf %119, %cst_41 : f32
    %121 = vector.extract_strided_slice %111 {offsets = [0, 128], sizes = [1, 128], strides = [1, 1]} : vector<1x256xf32> to vector<1x128xf32>
    %122 = vector.shape_cast %121 : vector<1x128xf32> to vector<1x1x128xf32>
    %cst_42 = arith.constant dense<0.000000e+00> : vector<1xf32>
    %123 = vector.multi_reduction <add>, %122, %cst_42 [1, 2] : vector<1x1x128xf32> to vector<1xf32>
    %124 = vector.shape_cast %123 : vector<1xf32> to vector<1x1x1xf32>
    %125 = vector.extract %124[0, 0, 0] : f32 from vector<1x1x1xf32>
    %cst_43 = arith.constant 2.048000e+03 : f32
    %126 = arith.divf %125, %cst_43 : f32
    %127 = vector.extract_strided_slice %114 {offsets = [0, 0], sizes = [1, 128], strides = [1, 1]} : vector<1x256xf32> to vector<1x128xf32>
    %128 = vector.shape_cast %127 : vector<1x128xf32> to vector<1x1x128xf32>
    %cst_44 = arith.constant dense<0.000000e+00> : vector<1xf32>
    %129 = vector.multi_reduction <add>, %128, %cst_44 [1, 2] : vector<1x1x128xf32> to vector<1xf32>
    %130 = vector.shape_cast %129 : vector<1xf32> to vector<1x1x1xf32>
    %131 = vector.extract %130[0, 0, 0] : f32 from vector<1x1x1xf32>
    %cst_45 = arith.constant 2.048000e+03 : f32
    %132 = arith.divf %131, %cst_45 : f32
    %133 = vector.extract_strided_slice %114 {offsets = [0, 128], sizes = [1, 128], strides = [1, 1]} : vector<1x256xf32> to vector<1x128xf32>
    %134 = vector.shape_cast %133 : vector<1x128xf32> to vector<1x1x128xf32>
    %cst_46 = arith.constant dense<0.000000e+00> : vector<1xf32>
    %135 = vector.multi_reduction <add>, %134, %cst_46 [1, 2] : vector<1x1x128xf32> to vector<1xf32>
    %136 = vector.shape_cast %135 : vector<1xf32> to vector<1x1x1xf32>
    %137 = vector.extract %136[0, 0, 0] : f32 from vector<1x1x1xf32>
    %cst_47 = arith.constant 2.048000e+03 : f32
    %138 = arith.divf %137, %cst_47 : f32
    %139 = vector.broadcast %120 : f32 to vector<1x256xf32>
    %140 = vector.broadcast %126 : f32 to vector<1x256xf32>
    %141 = arith.select %20, %139, %140 : vector<1x256xi1>, vector<1x256xf32>
    %142 = arith.mulf %120, %120 : f32
    %143 = arith.subf %132, %142 : f32
    %144 = arith.mulf %126, %126 : f32
    %145 = arith.subf %138, %144 : f32
    %146 = vector.broadcast %143 : f32 to vector<1x256xf32>
    %147 = vector.broadcast %145 : f32 to vector<1x256xf32>
    %148 = arith.select %20, %146, %147 : vector<1x256xi1>, vector<1x256xf32>
    %cst_48 = arith.constant 9.99999974E-6 : f32
    %149 = vector.broadcast %cst_48 : f32 to vector<1x256xf32>
    %150 = arith.addf %148, %149 : vector<1x256xf32>
    %151 = math.rsqrt %150 : vector<1x256xf32>
    %152 = vector.broadcast %141 : vector<1x256xf32> to vector<16x256xf32>
    %153 = arith.subf %109, %152 : vector<16x256xf32>
    %154 = vector.broadcast %151 : vector<1x256xf32> to vector<16x256xf32>
    %155 = arith.mulf %153, %154 : vector<16x256xf32>
    %c4 = arith.constant 4 : index
    %c0_49 = arith.constant 0 : index
    %c0_50 = arith.constant 0 : index
    %156 = vector.load %arg5[%c4, %c0_49, %c0_50] : memref<18x16x1xf32, #tpu.memory_space<vmem>>, vector<1x16x1xf32>
    %157 = vector.shape_cast %156 : vector<1x16x1xf32> to vector<16x1xf32>
    %158 = vector.broadcast %157 : vector<16x1xf32> to vector<16x256xf32>
    %159 = arith.mulf %155, %158 : vector<16x256xf32>
    %c5 = arith.constant 5 : index
    %c0_51 = arith.constant 0 : index
    %c0_52 = arith.constant 0 : index
    %160 = vector.load %arg5[%c5, %c0_51, %c0_52] : memref<18x16x1xf32, #tpu.memory_space<vmem>>, vector<1x16x1xf32>
    %161 = vector.shape_cast %160 : vector<1x16x1xf32> to vector<16x1xf32>
    %162 = vector.broadcast %161 : vector<16x1xf32> to vector<16x256xf32>
    %163 = arith.addf %159, %162 : vector<16x256xf32>
    %cst_53 = arith.constant 0.000000e+00 : f32
    %164 = vector.broadcast %cst_53 : f32 to vector<16x256xf32>
    %165 = arith.cmpf ogt, %163, %164 : vector<16x256xf32>
    %166 = math.exp %163 : vector<16x256xf32>
    %cst_54 = arith.constant 1.000000e+00 : f32
    %167 = vector.broadcast %cst_54 : f32 to vector<16x256xf32>
    %168 = arith.subf %166, %167 : vector<16x256xf32>
    %169 = arith.select %165, %163, %168 : vector<16x256xi1>, vector<16x256xf32>
    %170 = arith.addf %169, %0 : vector<16x256xf32>
    %c3_i32 = arith.constant 3 : i32
    %171 = vector.broadcast %c3_i32 : i32 to vector<1x256xi32>
    %172 = arith.cmpi sge, %17, %171 : vector<1x256xi32>
    %c3_i32_55 = arith.constant 3 : i32
    %173 = tpu.dynamic_rotate %170 by %c3_i32_55 dim 1 : vector<16x256xf32>, i32 -> vector<16x256xf32>
    %cst_56 = arith.constant 0.000000e+00 : f32
    %174 = vector.shape_cast %172 : vector<1x256xi1> to vector<1x256xi1>
    %175 = vector.broadcast %174 : vector<1x256xi1> to vector<16x256xi1>
    %176 = vector.broadcast %cst_56 : f32 to vector<16x256xf32>
    %177 = arith.select %175, %173, %176 : vector<16x256xi1>, vector<16x256xf32>
    %c125_i32 = arith.constant 125 : i32
    %178 = vector.broadcast %c125_i32 : i32 to vector<1x256xi32>
    %179 = arith.cmpi slt, %17, %178 : vector<1x256xi32>
    %c253_i32 = arith.constant 253 : i32
    %180 = tpu.dynamic_rotate %170 by %c253_i32 dim 1 : vector<16x256xf32>, i32 -> vector<16x256xf32>
    %cst_57 = arith.constant 0.000000e+00 : f32
    %181 = vector.shape_cast %179 : vector<1x256xi1> to vector<1x256xi1>
    %182 = vector.broadcast %181 : vector<1x256xi1> to vector<16x256xi1>
    %183 = vector.broadcast %cst_57 : f32 to vector<16x256xf32>
    %184 = arith.select %182, %180, %183 : vector<16x256xi1>, vector<16x256xf32>
    %185 = tpu.concatenate %177, %170, %184 in 0 : vector<16x256xf32>, vector<16x256xf32>, vector<16x256xf32> -> vector<48x256xf32>
    %c1_58 = arith.constant 1 : index
    %c0_59 = arith.constant 0 : index
    %c0_60 = arith.constant 0 : index
    %186 = vector.load %arg2[%c1_58, %c0_59, %c0_60] : memref<3x16x48xf32, #tpu.memory_space<vmem>>, vector<1x16x48xf32>
    %187 = vector.shape_cast %186 : vector<1x16x48xf32> to vector<16x48xf32>
    %cst_61 = arith.constant dense<0.000000e+00> : vector<16x256xf32>
    %188 = tpu.matmul %187, %185, %cst_61 {dimension_numbers = #tpu.dot_dimension_numbers<[1], [0], [0], [1], [0, 0, 1, 1], [], []>} : vector<16x48xf32>, vector<48x256xf32>, vector<16x256xf32> -> vector<16x256xf32>
    %c6 = arith.constant 6 : index
    %c0_62 = arith.constant 0 : index
    %c0_63 = arith.constant 0 : index
    %189 = vector.load %arg5[%c6, %c0_62, %c0_63] : memref<18x16x1xf32, #tpu.memory_space<vmem>>, vector<1x16x1xf32>
    %190 = vector.shape_cast %189 : vector<1x16x1xf32> to vector<16x1xf32>
    %191 = vector.broadcast %190 : vector<16x1xf32> to vector<16x256xf32>
    %192 = arith.addf %188, %191 : vector<16x256xf32>
    %cst_64 = arith.constant dense<0.000000e+00> : vector<256xf32>
    %193 = vector.multi_reduction <add>, %192, %cst_64 [0] : vector<16x256xf32> to vector<256xf32>
    %194 = vector.shape_cast %193 : vector<256xf32> to vector<1x256xf32>
    %195 = arith.mulf %192, %192 : vector<16x256xf32>
    %cst_65 = arith.constant dense<0.000000e+00> : vector<256xf32>
    %196 = vector.multi_reduction <add>, %195, %cst_65 [0] : vector<16x256xf32> to vector<256xf32>
    %197 = vector.shape_cast %196 : vector<256xf32> to vector<1x256xf32>
    %198 = vector.extract_strided_slice %194 {offsets = [0, 0], sizes = [1, 128], strides = [1, 1]} : vector<1x256xf32> to vector<1x128xf32>
    %199 = vector.shape_cast %198 : vector<1x128xf32> to vector<1x1x128xf32>
    %cst_66 = arith.constant dense<0.000000e+00> : vector<1xf32>
    %200 = vector.multi_reduction <add>, %199, %cst_66 [1, 2] : vector<1x1x128xf32> to vector<1xf32>
    %201 = vector.shape_cast %200 : vector<1xf32> to vector<1x1x1xf32>
    %202 = vector.extract %201[0, 0, 0] : f32 from vector<1x1x1xf32>
    %cst_67 = arith.constant 2.048000e+03 : f32
    %203 = arith.divf %202, %cst_67 : f32
    %204 = vector.extract_strided_slice %194 {offsets = [0, 128], sizes = [1, 128], strides = [1, 1]} : vector<1x256xf32> to vector<1x128xf32>
    %205 = vector.shape_cast %204 : vector<1x128xf32> to vector<1x1x128xf32>
    %cst_68 = arith.constant dense<0.000000e+00> : vector<1xf32>
    %206 = vector.multi_reduction <add>, %205, %cst_68 [1, 2] : vector<1x1x128xf32> to vector<1xf32>
    %207 = vector.shape_cast %206 : vector<1xf32> to vector<1x1x1xf32>
    %208 = vector.extract %207[0, 0, 0] : f32 from vector<1x1x1xf32>
    %cst_69 = arith.constant 2.048000e+03 : f32
    %209 = arith.divf %208, %cst_69 : f32
    %210 = vector.extract_strided_slice %197 {offsets = [0, 0], sizes = [1, 128], strides = [1, 1]} : vector<1x256xf32> to vector<1x128xf32>
    %211 = vector.shape_cast %210 : vector<1x128xf32> to vector<1x1x128xf32>
    %cst_70 = arith.constant dense<0.000000e+00> : vector<1xf32>
    %212 = vector.multi_reduction <add>, %211, %cst_70 [1, 2] : vector<1x1x128xf32> to vector<1xf32>
    %213 = vector.shape_cast %212 : vector<1xf32> to vector<1x1x1xf32>
    %214 = vector.extract %213[0, 0, 0] : f32 from vector<1x1x1xf32>
    %cst_71 = arith.constant 2.048000e+03 : f32
    %215 = arith.divf %214, %cst_71 : f32
    %216 = vector.extract_strided_slice %197 {offsets = [0, 128], sizes = [1, 128], strides = [1, 1]} : vector<1x256xf32> to vector<1x128xf32>
    %217 = vector.shape_cast %216 : vector<1x128xf32> to vector<1x1x128xf32>
    %cst_72 = arith.constant dense<0.000000e+00> : vector<1xf32>
    %218 = vector.multi_reduction <add>, %217, %cst_72 [1, 2] : vector<1x1x128xf32> to vector<1xf32>
    %219 = vector.shape_cast %218 : vector<1xf32> to vector<1x1x1xf32>
    %220 = vector.extract %219[0, 0, 0] : f32 from vector<1x1x1xf32>
    %cst_73 = arith.constant 2.048000e+03 : f32
    %221 = arith.divf %220, %cst_73 : f32
    %222 = vector.broadcast %203 : f32 to vector<1x256xf32>
    %223 = vector.broadcast %209 : f32 to vector<1x256xf32>
    %224 = arith.select %20, %222, %223 : vector<1x256xi1>, vector<1x256xf32>
    %225 = arith.mulf %203, %203 : f32
    %226 = arith.subf %215, %225 : f32
    %227 = arith.mulf %209, %209 : f32
    %228 = arith.subf %221, %227 : f32
    %229 = vector.broadcast %226 : f32 to vector<1x256xf32>
    %230 = vector.broadcast %228 : f32 to vector<1x256xf32>
    %231 = arith.select %20, %229, %230 : vector<1x256xi1>, vector<1x256xf32>
    %cst_74 = arith.constant 9.99999974E-6 : f32
    %232 = vector.broadcast %cst_74 : f32 to vector<1x256xf32>
    %233 = arith.addf %231, %232 : vector<1x256xf32>
    %234 = math.rsqrt %233 : vector<1x256xf32>
    %235 = vector.broadcast %224 : vector<1x256xf32> to vector<16x256xf32>
    %236 = arith.subf %192, %235 : vector<16x256xf32>
    %237 = vector.broadcast %234 : vector<1x256xf32> to vector<16x256xf32>
    %238 = arith.mulf %236, %237 : vector<16x256xf32>
    %c7 = arith.constant 7 : index
    %c0_75 = arith.constant 0 : index
    %c0_76 = arith.constant 0 : index
    %239 = vector.load %arg5[%c7, %c0_75, %c0_76] : memref<18x16x1xf32, #tpu.memory_space<vmem>>, vector<1x16x1xf32>
    %240 = vector.shape_cast %239 : vector<1x16x1xf32> to vector<16x1xf32>
    %241 = vector.broadcast %240 : vector<16x1xf32> to vector<16x256xf32>
    %242 = arith.mulf %238, %241 : vector<16x256xf32>
    %c8 = arith.constant 8 : index
    %c0_77 = arith.constant 0 : index
    %c0_78 = arith.constant 0 : index
    %243 = vector.load %arg5[%c8, %c0_77, %c0_78] : memref<18x16x1xf32, #tpu.memory_space<vmem>>, vector<1x16x1xf32>
    %244 = vector.shape_cast %243 : vector<1x16x1xf32> to vector<16x1xf32>
    %245 = vector.broadcast %244 : vector<16x1xf32> to vector<16x256xf32>
    %246 = arith.addf %242, %245 : vector<16x256xf32>
    %cst_79 = arith.constant 0.000000e+00 : f32
    %247 = vector.broadcast %cst_79 : f32 to vector<16x256xf32>
    %248 = arith.cmpf ogt, %246, %247 : vector<16x256xf32>
    %249 = math.exp %246 : vector<16x256xf32>
    %cst_80 = arith.constant 1.000000e+00 : f32
    %250 = vector.broadcast %cst_80 : f32 to vector<16x256xf32>
    %251 = arith.subf %249, %250 : vector<16x256xf32>
    %252 = arith.select %248, %246, %251 : vector<16x256xi1>, vector<16x256xf32>
    %c1_81 = arith.constant 1 : index
    %c0_82 = arith.constant 0 : index
    %c0_83 = arith.constant 0 : index
    %253 = vector.load %arg3[%c1_81, %c0_82, %c0_83] : memref<3x16x16xf32, #tpu.memory_space<vmem>>, vector<1x16x16xf32>
    %254 = vector.shape_cast %253 : vector<1x16x16xf32> to vector<16x16xf32>
    %cst_84 = arith.constant dense<0.000000e+00> : vector<16x256xf32>
    %255 = tpu.matmul %254, %252, %cst_84 {dimension_numbers = #tpu.dot_dimension_numbers<[1], [0], [0], [1], [0, 0, 1, 1], [], []>} : vector<16x16xf32>, vector<16x256xf32>, vector<16x256xf32> -> vector<16x256xf32>
    %c9 = arith.constant 9 : index
    %c0_85 = arith.constant 0 : index
    %c0_86 = arith.constant 0 : index
    %256 = vector.load %arg5[%c9, %c0_85, %c0_86] : memref<18x16x1xf32, #tpu.memory_space<vmem>>, vector<1x16x1xf32>
    %257 = vector.shape_cast %256 : vector<1x16x1xf32> to vector<16x1xf32>
    %258 = vector.broadcast %257 : vector<16x1xf32> to vector<16x256xf32>
    %259 = arith.addf %255, %258 : vector<16x256xf32>
    %cst_87 = arith.constant dense<0.000000e+00> : vector<256xf32>
    %260 = vector.multi_reduction <add>, %259, %cst_87 [0] : vector<16x256xf32> to vector<256xf32>
    %261 = vector.shape_cast %260 : vector<256xf32> to vector<1x256xf32>
    %262 = arith.mulf %259, %259 : vector<16x256xf32>
    %cst_88 = arith.constant dense<0.000000e+00> : vector<256xf32>
    %263 = vector.multi_reduction <add>, %262, %cst_88 [0] : vector<16x256xf32> to vector<256xf32>
    %264 = vector.shape_cast %263 : vector<256xf32> to vector<1x256xf32>
    %265 = vector.extract_strided_slice %261 {offsets = [0, 0], sizes = [1, 128], strides = [1, 1]} : vector<1x256xf32> to vector<1x128xf32>
    %266 = vector.shape_cast %265 : vector<1x128xf32> to vector<1x1x128xf32>
    %cst_89 = arith.constant dense<0.000000e+00> : vector<1xf32>
    %267 = vector.multi_reduction <add>, %266, %cst_89 [1, 2] : vector<1x1x128xf32> to vector<1xf32>
    %268 = vector.shape_cast %267 : vector<1xf32> to vector<1x1x1xf32>
    %269 = vector.extract %268[0, 0, 0] : f32 from vector<1x1x1xf32>
    %cst_90 = arith.constant 2.048000e+03 : f32
    %270 = arith.divf %269, %cst_90 : f32
    %271 = vector.extract_strided_slice %261 {offsets = [0, 128], sizes = [1, 128], strides = [1, 1]} : vector<1x256xf32> to vector<1x128xf32>
    %272 = vector.shape_cast %271 : vector<1x128xf32> to vector<1x1x128xf32>
    %cst_91 = arith.constant dense<0.000000e+00> : vector<1xf32>
    %273 = vector.multi_reduction <add>, %272, %cst_91 [1, 2] : vector<1x1x128xf32> to vector<1xf32>
    %274 = vector.shape_cast %273 : vector<1xf32> to vector<1x1x1xf32>
    %275 = vector.extract %274[0, 0, 0] : f32 from vector<1x1x1xf32>
    %cst_92 = arith.constant 2.048000e+03 : f32
    %276 = arith.divf %275, %cst_92 : f32
    %277 = vector.extract_strided_slice %264 {offsets = [0, 0], sizes = [1, 128], strides = [1, 1]} : vector<1x256xf32> to vector<1x128xf32>
    %278 = vector.shape_cast %277 : vector<1x128xf32> to vector<1x1x128xf32>
    %cst_93 = arith.constant dense<0.000000e+00> : vector<1xf32>
    %279 = vector.multi_reduction <add>, %278, %cst_93 [1, 2] : vector<1x1x128xf32> to vector<1xf32>
    %280 = vector.shape_cast %279 : vector<1xf32> to vector<1x1x1xf32>
    %281 = vector.extract %280[0, 0, 0] : f32 from vector<1x1x1xf32>
    %cst_94 = arith.constant 2.048000e+03 : f32
    %282 = arith.divf %281, %cst_94 : f32
    %283 = vector.extract_strided_slice %264 {offsets = [0, 128], sizes = [1, 128], strides = [1, 1]} : vector<1x256xf32> to vector<1x128xf32>
    %284 = vector.shape_cast %283 : vector<1x128xf32> to vector<1x1x128xf32>
    %cst_95 = arith.constant dense<0.000000e+00> : vector<1xf32>
    %285 = vector.multi_reduction <add>, %284, %cst_95 [1, 2] : vector<1x1x128xf32> to vector<1xf32>
    %286 = vector.shape_cast %285 : vector<1xf32> to vector<1x1x1xf32>
    %287 = vector.extract %286[0, 0, 0] : f32 from vector<1x1x1xf32>
    %cst_96 = arith.constant 2.048000e+03 : f32
    %288 = arith.divf %287, %cst_96 : f32
    %289 = vector.broadcast %270 : f32 to vector<1x256xf32>
    %290 = vector.broadcast %276 : f32 to vector<1x256xf32>
    %291 = arith.select %20, %289, %290 : vector<1x256xi1>, vector<1x256xf32>
    %292 = arith.mulf %270, %270 : f32
    %293 = arith.subf %282, %292 : f32
    %294 = arith.mulf %276, %276 : f32
    %295 = arith.subf %288, %294 : f32
    %296 = vector.broadcast %293 : f32 to vector<1x256xf32>
    %297 = vector.broadcast %295 : f32 to vector<1x256xf32>
    %298 = arith.select %20, %296, %297 : vector<1x256xi1>, vector<1x256xf32>
    %cst_97 = arith.constant 9.99999974E-6 : f32
    %299 = vector.broadcast %cst_97 : f32 to vector<1x256xf32>
    %300 = arith.addf %298, %299 : vector<1x256xf32>
    %301 = math.rsqrt %300 : vector<1x256xf32>
    %302 = vector.broadcast %291 : vector<1x256xf32> to vector<16x256xf32>
    %303 = arith.subf %259, %302 : vector<16x256xf32>
    %304 = vector.broadcast %301 : vector<1x256xf32> to vector<16x256xf32>
    %305 = arith.mulf %303, %304 : vector<16x256xf32>
    %c10 = arith.constant 10 : index
    %c0_98 = arith.constant 0 : index
    %c0_99 = arith.constant 0 : index
    %306 = vector.load %arg5[%c10, %c0_98, %c0_99] : memref<18x16x1xf32, #tpu.memory_space<vmem>>, vector<1x16x1xf32>
    %307 = vector.shape_cast %306 : vector<1x16x1xf32> to vector<16x1xf32>
    %308 = vector.broadcast %307 : vector<16x1xf32> to vector<16x256xf32>
    %309 = arith.mulf %305, %308 : vector<16x256xf32>
    %c11 = arith.constant 11 : index
    %c0_100 = arith.constant 0 : index
    %c0_101 = arith.constant 0 : index
    %310 = vector.load %arg5[%c11, %c0_100, %c0_101] : memref<18x16x1xf32, #tpu.memory_space<vmem>>, vector<1x16x1xf32>
    %311 = vector.shape_cast %310 : vector<1x16x1xf32> to vector<16x1xf32>
    %312 = vector.broadcast %311 : vector<16x1xf32> to vector<16x256xf32>
    %313 = arith.addf %309, %312 : vector<16x256xf32>
    %cst_102 = arith.constant 0.000000e+00 : f32
    %314 = vector.broadcast %cst_102 : f32 to vector<16x256xf32>
    %315 = arith.cmpf ogt, %313, %314 : vector<16x256xf32>
    %316 = math.exp %313 : vector<16x256xf32>
    %cst_103 = arith.constant 1.000000e+00 : f32
    %317 = vector.broadcast %cst_103 : f32 to vector<16x256xf32>
    %318 = arith.subf %316, %317 : vector<16x256xf32>
    %319 = arith.select %315, %313, %318 : vector<16x256xi1>, vector<16x256xf32>
    %320 = arith.addf %0, %169 : vector<16x256xf32>
    %321 = arith.addf %320, %319 : vector<16x256xf32>
    %c9_i32 = arith.constant 9 : i32
    %322 = vector.broadcast %c9_i32 : i32 to vector<1x256xi32>
    %323 = arith.cmpi sge, %17, %322 : vector<1x256xi32>
    %c9_i32_104 = arith.constant 9 : i32
    %324 = tpu.dynamic_rotate %321 by %c9_i32_104 dim 1 : vector<16x256xf32>, i32 -> vector<16x256xf32>
    %cst_105 = arith.constant 0.000000e+00 : f32
    %325 = vector.shape_cast %323 : vector<1x256xi1> to vector<1x256xi1>
    %326 = vector.broadcast %325 : vector<1x256xi1> to vector<16x256xi1>
    %327 = vector.broadcast %cst_105 : f32 to vector<16x256xf32>
    %328 = arith.select %326, %324, %327 : vector<16x256xi1>, vector<16x256xf32>
    %c119_i32 = arith.constant 119 : i32
    %329 = vector.broadcast %c119_i32 : i32 to vector<1x256xi32>
    %330 = arith.cmpi slt, %17, %329 : vector<1x256xi32>
    %c247_i32 = arith.constant 247 : i32
    %331 = tpu.dynamic_rotate %321 by %c247_i32 dim 1 : vector<16x256xf32>, i32 -> vector<16x256xf32>
    %cst_106 = arith.constant 0.000000e+00 : f32
    %332 = vector.shape_cast %330 : vector<1x256xi1> to vector<1x256xi1>
    %333 = vector.broadcast %332 : vector<1x256xi1> to vector<16x256xi1>
    %334 = vector.broadcast %cst_106 : f32 to vector<16x256xf32>
    %335 = arith.select %333, %331, %334 : vector<16x256xi1>, vector<16x256xf32>
    %336 = tpu.concatenate %328, %321, %335 in 0 : vector<16x256xf32>, vector<16x256xf32>, vector<16x256xf32> -> vector<48x256xf32>
    %c2_107 = arith.constant 2 : index
    %c0_108 = arith.constant 0 : index
    %c0_109 = arith.constant 0 : index
    %337 = vector.load %arg2[%c2_107, %c0_108, %c0_109] : memref<3x16x48xf32, #tpu.memory_space<vmem>>, vector<1x16x48xf32>
    %338 = vector.shape_cast %337 : vector<1x16x48xf32> to vector<16x48xf32>
    %cst_110 = arith.constant dense<0.000000e+00> : vector<16x256xf32>
    %339 = tpu.matmul %338, %336, %cst_110 {dimension_numbers = #tpu.dot_dimension_numbers<[1], [0], [0], [1], [0, 0, 1, 1], [], []>} : vector<16x48xf32>, vector<48x256xf32>, vector<16x256xf32> -> vector<16x256xf32>
    %c12 = arith.constant 12 : index
    %c0_111 = arith.constant 0 : index
    %c0_112 = arith.constant 0 : index
    %340 = vector.load %arg5[%c12, %c0_111, %c0_112] : memref<18x16x1xf32, #tpu.memory_space<vmem>>, vector<1x16x1xf32>
    %341 = vector.shape_cast %340 : vector<1x16x1xf32> to vector<16x1xf32>
    %342 = vector.broadcast %341 : vector<16x1xf32> to vector<16x256xf32>
    %343 = arith.addf %339, %342 : vector<16x256xf32>
    %cst_113 = arith.constant dense<0.000000e+00> : vector<256xf32>
    %344 = vector.multi_reduction <add>, %343, %cst_113 [0] : vector<16x256xf32> to vector<256xf32>
    %345 = vector.shape_cast %344 : vector<256xf32> to vector<1x256xf32>
    %346 = arith.mulf %343, %343 : vector<16x256xf32>
    %cst_114 = arith.constant dense<0.000000e+00> : vector<256xf32>
    %347 = vector.multi_reduction <add>, %346, %cst_114 [0] : vector<16x256xf32> to vector<256xf32>
    %348 = vector.shape_cast %347 : vector<256xf32> to vector<1x256xf32>
    %349 = vector.extract_strided_slice %345 {offsets = [0, 0], sizes = [1, 128], strides = [1, 1]} : vector<1x256xf32> to vector<1x128xf32>
    %350 = vector.shape_cast %349 : vector<1x128xf32> to vector<1x1x128xf32>
    %cst_115 = arith.constant dense<0.000000e+00> : vector<1xf32>
    %351 = vector.multi_reduction <add>, %350, %cst_115 [1, 2] : vector<1x1x128xf32> to vector<1xf32>
    %352 = vector.shape_cast %351 : vector<1xf32> to vector<1x1x1xf32>
    %353 = vector.extract %352[0, 0, 0] : f32 from vector<1x1x1xf32>
    %cst_116 = arith.constant 2.048000e+03 : f32
    %354 = arith.divf %353, %cst_116 : f32
    %355 = vector.extract_strided_slice %345 {offsets = [0, 128], sizes = [1, 128], strides = [1, 1]} : vector<1x256xf32> to vector<1x128xf32>
    %356 = vector.shape_cast %355 : vector<1x128xf32> to vector<1x1x128xf32>
    %cst_117 = arith.constant dense<0.000000e+00> : vector<1xf32>
    %357 = vector.multi_reduction <add>, %356, %cst_117 [1, 2] : vector<1x1x128xf32> to vector<1xf32>
    %358 = vector.shape_cast %357 : vector<1xf32> to vector<1x1x1xf32>
    %359 = vector.extract %358[0, 0, 0] : f32 from vector<1x1x1xf32>
    %cst_118 = arith.constant 2.048000e+03 : f32
    %360 = arith.divf %359, %cst_118 : f32
    %361 = vector.extract_strided_slice %348 {offsets = [0, 0], sizes = [1, 128], strides = [1, 1]} : vector<1x256xf32> to vector<1x128xf32>
    %362 = vector.shape_cast %361 : vector<1x128xf32> to vector<1x1x128xf32>
    %cst_119 = arith.constant dense<0.000000e+00> : vector<1xf32>
    %363 = vector.multi_reduction <add>, %362, %cst_119 [1, 2] : vector<1x1x128xf32> to vector<1xf32>
    %364 = vector.shape_cast %363 : vector<1xf32> to vector<1x1x1xf32>
    %365 = vector.extract %364[0, 0, 0] : f32 from vector<1x1x1xf32>
    %cst_120 = arith.constant 2.048000e+03 : f32
    %366 = arith.divf %365, %cst_120 : f32
    %367 = vector.extract_strided_slice %348 {offsets = [0, 128], sizes = [1, 128], strides = [1, 1]} : vector<1x256xf32> to vector<1x128xf32>
    %368 = vector.shape_cast %367 : vector<1x128xf32> to vector<1x1x128xf32>
    %cst_121 = arith.constant dense<0.000000e+00> : vector<1xf32>
    %369 = vector.multi_reduction <add>, %368, %cst_121 [1, 2] : vector<1x1x128xf32> to vector<1xf32>
    %370 = vector.shape_cast %369 : vector<1xf32> to vector<1x1x1xf32>
    %371 = vector.extract %370[0, 0, 0] : f32 from vector<1x1x1xf32>
    %cst_122 = arith.constant 2.048000e+03 : f32
    %372 = arith.divf %371, %cst_122 : f32
    %373 = vector.broadcast %354 : f32 to vector<1x256xf32>
    %374 = vector.broadcast %360 : f32 to vector<1x256xf32>
    %375 = arith.select %20, %373, %374 : vector<1x256xi1>, vector<1x256xf32>
    %376 = arith.mulf %354, %354 : f32
    %377 = arith.subf %366, %376 : f32
    %378 = arith.mulf %360, %360 : f32
    %379 = arith.subf %372, %378 : f32
    %380 = vector.broadcast %377 : f32 to vector<1x256xf32>
    %381 = vector.broadcast %379 : f32 to vector<1x256xf32>
    %382 = arith.select %20, %380, %381 : vector<1x256xi1>, vector<1x256xf32>
    %cst_123 = arith.constant 9.99999974E-6 : f32
    %383 = vector.broadcast %cst_123 : f32 to vector<1x256xf32>
    %384 = arith.addf %382, %383 : vector<1x256xf32>
    %385 = math.rsqrt %384 : vector<1x256xf32>
    %386 = vector.broadcast %375 : vector<1x256xf32> to vector<16x256xf32>
    %387 = arith.subf %343, %386 : vector<16x256xf32>
    %388 = vector.broadcast %385 : vector<1x256xf32> to vector<16x256xf32>
    %389 = arith.mulf %387, %388 : vector<16x256xf32>
    %c13 = arith.constant 13 : index
    %c0_124 = arith.constant 0 : index
    %c0_125 = arith.constant 0 : index
    %390 = vector.load %arg5[%c13, %c0_124, %c0_125] : memref<18x16x1xf32, #tpu.memory_space<vmem>>, vector<1x16x1xf32>
    %391 = vector.shape_cast %390 : vector<1x16x1xf32> to vector<16x1xf32>
    %392 = vector.broadcast %391 : vector<16x1xf32> to vector<16x256xf32>
    %393 = arith.mulf %389, %392 : vector<16x256xf32>
    %c14 = arith.constant 14 : index
    %c0_126 = arith.constant 0 : index
    %c0_127 = arith.constant 0 : index
    %394 = vector.load %arg5[%c14, %c0_126, %c0_127] : memref<18x16x1xf32, #tpu.memory_space<vmem>>, vector<1x16x1xf32>
    %395 = vector.shape_cast %394 : vector<1x16x1xf32> to vector<16x1xf32>
    %396 = vector.broadcast %395 : vector<16x1xf32> to vector<16x256xf32>
    %397 = arith.addf %393, %396 : vector<16x256xf32>
    %cst_128 = arith.constant 0.000000e+00 : f32
    %398 = vector.broadcast %cst_128 : f32 to vector<16x256xf32>
    %399 = arith.cmpf ogt, %397, %398 : vector<16x256xf32>
    %400 = math.exp %397 : vector<16x256xf32>
    %cst_129 = arith.constant 1.000000e+00 : f32
    %401 = vector.broadcast %cst_129 : f32 to vector<16x256xf32>
    %402 = arith.subf %400, %401 : vector<16x256xf32>
    %403 = arith.select %399, %397, %402 : vector<16x256xi1>, vector<16x256xf32>
    %c2_130 = arith.constant 2 : index
    %c0_131 = arith.constant 0 : index
    %c0_132 = arith.constant 0 : index
    %404 = vector.load %arg3[%c2_130, %c0_131, %c0_132] : memref<3x16x16xf32, #tpu.memory_space<vmem>>, vector<1x16x16xf32>
    %405 = vector.shape_cast %404 : vector<1x16x16xf32> to vector<16x16xf32>
    %cst_133 = arith.constant dense<0.000000e+00> : vector<16x256xf32>
    %406 = tpu.matmul %405, %403, %cst_133 {dimension_numbers = #tpu.dot_dimension_numbers<[1], [0], [0], [1], [0, 0, 1, 1], [], []>} : vector<16x16xf32>, vector<16x256xf32>, vector<16x256xf32> -> vector<16x256xf32>
    %c15 = arith.constant 15 : index
    %c0_134 = arith.constant 0 : index
    %c0_135 = arith.constant 0 : index
    %407 = vector.load %arg5[%c15, %c0_134, %c0_135] : memref<18x16x1xf32, #tpu.memory_space<vmem>>, vector<1x16x1xf32>
    %408 = vector.shape_cast %407 : vector<1x16x1xf32> to vector<16x1xf32>
    %409 = vector.broadcast %408 : vector<16x1xf32> to vector<16x256xf32>
    %410 = arith.addf %406, %409 : vector<16x256xf32>
    %cst_136 = arith.constant dense<0.000000e+00> : vector<256xf32>
    %411 = vector.multi_reduction <add>, %410, %cst_136 [0] : vector<16x256xf32> to vector<256xf32>
    %412 = vector.shape_cast %411 : vector<256xf32> to vector<1x256xf32>
    %413 = arith.mulf %410, %410 : vector<16x256xf32>
    %cst_137 = arith.constant dense<0.000000e+00> : vector<256xf32>
    %414 = vector.multi_reduction <add>, %413, %cst_137 [0] : vector<16x256xf32> to vector<256xf32>
    %415 = vector.shape_cast %414 : vector<256xf32> to vector<1x256xf32>
    %416 = vector.extract_strided_slice %412 {offsets = [0, 0], sizes = [1, 128], strides = [1, 1]} : vector<1x256xf32> to vector<1x128xf32>
    %417 = vector.shape_cast %416 : vector<1x128xf32> to vector<1x1x128xf32>
    %cst_138 = arith.constant dense<0.000000e+00> : vector<1xf32>
    %418 = vector.multi_reduction <add>, %417, %cst_138 [1, 2] : vector<1x1x128xf32> to vector<1xf32>
    %419 = vector.shape_cast %418 : vector<1xf32> to vector<1x1x1xf32>
    %420 = vector.extract %419[0, 0, 0] : f32 from vector<1x1x1xf32>
    %cst_139 = arith.constant 2.048000e+03 : f32
    %421 = arith.divf %420, %cst_139 : f32
    %422 = vector.extract_strided_slice %412 {offsets = [0, 128], sizes = [1, 128], strides = [1, 1]} : vector<1x256xf32> to vector<1x128xf32>
    %423 = vector.shape_cast %422 : vector<1x128xf32> to vector<1x1x128xf32>
    %cst_140 = arith.constant dense<0.000000e+00> : vector<1xf32>
    %424 = vector.multi_reduction <add>, %423, %cst_140 [1, 2] : vector<1x1x128xf32> to vector<1xf32>
    %425 = vector.shape_cast %424 : vector<1xf32> to vector<1x1x1xf32>
    %426 = vector.extract %425[0, 0, 0] : f32 from vector<1x1x1xf32>
    %cst_141 = arith.constant 2.048000e+03 : f32
    %427 = arith.divf %426, %cst_141 : f32
    %428 = vector.extract_strided_slice %415 {offsets = [0, 0], sizes = [1, 128], strides = [1, 1]} : vector<1x256xf32> to vector<1x128xf32>
    %429 = vector.shape_cast %428 : vector<1x128xf32> to vector<1x1x128xf32>
    %cst_142 = arith.constant dense<0.000000e+00> : vector<1xf32>
    %430 = vector.multi_reduction <add>, %429, %cst_142 [1, 2] : vector<1x1x128xf32> to vector<1xf32>
    %431 = vector.shape_cast %430 : vector<1xf32> to vector<1x1x1xf32>
    %432 = vector.extract %431[0, 0, 0] : f32 from vector<1x1x1xf32>
    %cst_143 = arith.constant 2.048000e+03 : f32
    %433 = arith.divf %432, %cst_143 : f32
    %434 = vector.extract_strided_slice %415 {offsets = [0, 128], sizes = [1, 128], strides = [1, 1]} : vector<1x256xf32> to vector<1x128xf32>
    %435 = vector.shape_cast %434 : vector<1x128xf32> to vector<1x1x128xf32>
    %cst_144 = arith.constant dense<0.000000e+00> : vector<1xf32>
    %436 = vector.multi_reduction <add>, %435, %cst_144 [1, 2] : vector<1x1x128xf32> to vector<1xf32>
    %437 = vector.shape_cast %436 : vector<1xf32> to vector<1x1x1xf32>
    %438 = vector.extract %437[0, 0, 0] : f32 from vector<1x1x1xf32>
    %cst_145 = arith.constant 2.048000e+03 : f32
    %439 = arith.divf %438, %cst_145 : f32
    %440 = vector.broadcast %421 : f32 to vector<1x256xf32>
    %441 = vector.broadcast %427 : f32 to vector<1x256xf32>
    %442 = arith.select %20, %440, %441 : vector<1x256xi1>, vector<1x256xf32>
    %443 = arith.mulf %421, %421 : f32
    %444 = arith.subf %433, %443 : f32
    %445 = arith.mulf %427, %427 : f32
    %446 = arith.subf %439, %445 : f32
    %447 = vector.broadcast %444 : f32 to vector<1x256xf32>
    %448 = vector.broadcast %446 : f32 to vector<1x256xf32>
    %449 = arith.select %20, %447, %448 : vector<1x256xi1>, vector<1x256xf32>
    %cst_146 = arith.constant 9.99999974E-6 : f32
    %450 = vector.broadcast %cst_146 : f32 to vector<1x256xf32>
    %451 = arith.addf %449, %450 : vector<1x256xf32>
    %452 = math.rsqrt %451 : vector<1x256xf32>
    %453 = vector.broadcast %442 : vector<1x256xf32> to vector<16x256xf32>
    %454 = arith.subf %410, %453 : vector<16x256xf32>
    %455 = vector.broadcast %452 : vector<1x256xf32> to vector<16x256xf32>
    %456 = arith.mulf %454, %455 : vector<16x256xf32>
    %c16 = arith.constant 16 : index
    %c0_147 = arith.constant 0 : index
    %c0_148 = arith.constant 0 : index
    %457 = vector.load %arg5[%c16, %c0_147, %c0_148] : memref<18x16x1xf32, #tpu.memory_space<vmem>>, vector<1x16x1xf32>
    %458 = vector.shape_cast %457 : vector<1x16x1xf32> to vector<16x1xf32>
    %459 = vector.broadcast %458 : vector<16x1xf32> to vector<16x256xf32>
    %460 = arith.mulf %456, %459 : vector<16x256xf32>
    %c17 = arith.constant 17 : index
    %c0_149 = arith.constant 0 : index
    %c0_150 = arith.constant 0 : index
    %461 = vector.load %arg5[%c17, %c0_149, %c0_150] : memref<18x16x1xf32, #tpu.memory_space<vmem>>, vector<1x16x1xf32>
    %462 = vector.shape_cast %461 : vector<1x16x1xf32> to vector<16x1xf32>
    %463 = vector.broadcast %462 : vector<16x1xf32> to vector<16x256xf32>
    %464 = arith.addf %460, %463 : vector<16x256xf32>
    %cst_151 = arith.constant 0.000000e+00 : f32
    %465 = vector.broadcast %cst_151 : f32 to vector<16x256xf32>
    %466 = arith.cmpf ogt, %464, %465 : vector<16x256xf32>
    %467 = math.exp %464 : vector<16x256xf32>
    %cst_152 = arith.constant 1.000000e+00 : f32
    %468 = vector.broadcast %cst_152 : f32 to vector<16x256xf32>
    %469 = arith.subf %467, %468 : vector<16x256xf32>
    %470 = arith.select %466, %464, %469 : vector<16x256xi1>, vector<16x256xf32>
    %471 = arith.addf %321, %470 : vector<16x256xf32>
    %c255_i32_153 = arith.constant 255 : i32
    %472 = tpu.dynamic_rotate %471 by %c255_i32_153 dim 1 : vector<16x256xf32>, i32 -> vector<16x256xf32>
    %c254_i32 = arith.constant 254 : i32
    %473 = tpu.dynamic_rotate %471 by %c254_i32 dim 1 : vector<16x256xf32>, i32 -> vector<16x256xf32>
    %c253_i32_154 = arith.constant 253 : i32
    %474 = tpu.dynamic_rotate %471 by %c253_i32_154 dim 1 : vector<16x256xf32>, i32 -> vector<16x256xf32>
    %475 = tpu.concatenate %471, %472, %473, %474 in 0 : vector<16x256xf32>, vector<16x256xf32>, vector<16x256xf32>, vector<16x256xf32> -> vector<64x256xf32>
    %c0_155 = arith.constant 0 : index
    %c0_156 = arith.constant 0 : index
    %476 = vector.load %arg4[%c0_155, %c0_156] : memref<32x64xf32, #tpu.memory_space<vmem>>, vector<32x64xf32>
    %cst_157 = arith.constant dense<0.000000e+00> : vector<32x256xf32>
    %477 = tpu.matmul %476, %475, %cst_157 {dimension_numbers = #tpu.dot_dimension_numbers<[1], [0], [0], [1], [0, 0, 1, 1], [], []>} : vector<32x64xf32>, vector<64x256xf32>, vector<32x256xf32> -> vector<32x256xf32>
    %478 = tpu.iota {dimensions = array<i32: 0>} : vector<256x128xi32>
    %479 = tpu.iota {dimensions = array<i32: 1>} : vector<256x128xi32>
    %c2_i32 = arith.constant 2 : i32
    %480 = vector.broadcast %c2_i32 : i32 to vector<256x128xi32>
    %481 = arith.muli %480, %479 : vector<256x128xi32>
    %482 = arith.cmpi eq, %478, %481 : vector<256x128xi32>
    %483 = arith.extui %482 : vector<256x128xi1> to vector<256x128xi32>
    %484 = arith.sitofp %483 : vector<256x128xi32> to vector<256x128xf32>
    %cst_158 = arith.constant dense<0.000000e+00> : vector<32x128xf32>
    %485 = tpu.matmul %477, %484, %cst_158 {dimension_numbers = #tpu.dot_dimension_numbers<[1], [0], [0], [1], [0, 0, 1, 1], [], []>} : vector<32x256xf32>, vector<256x128xf32>, vector<32x128xf32> -> vector<32x128xf32>
    %c0_159 = arith.constant 0 : index
    %c0_160 = arith.constant 0 : index
    %c0_161 = arith.constant 0 : index
    %486 = vector.load %arg6[%c0_159, %c0_160, %c0_161] : memref<3x32x1xf32, #tpu.memory_space<vmem>>, vector<1x32x1xf32>
    %487 = vector.shape_cast %486 : vector<1x32x1xf32> to vector<32x1xf32>
    %488 = vector.broadcast %487 : vector<32x1xf32> to vector<32x128xf32>
    %489 = arith.addf %485, %488 : vector<32x128xf32>
    %490 = tpu.iota {dimensions = array<i32: 1>} : vector<1x128xi32>
    %c64_i32 = arith.constant 64 : i32
    %c0_i32_162 = arith.constant 0 : i32
    %491 = arith.cmpi eq, %c64_i32, %c0_i32_162 : i32
    %c1_i32_163 = arith.constant 1 : i32
    %492 = arith.select %491, %c1_i32_163, %c64_i32 : i32
    %493 = vector.broadcast %492 : i32 to vector<1x128xi32>
    %494 = arith.remsi %490, %493 : vector<1x128xi32>
    %c0_i32_164 = arith.constant 0 : i32
    %495 = vector.broadcast %c0_i32_164 : i32 to vector<1x128xi32>
    %496 = arith.cmpi ne, %494, %495 : vector<1x128xi32>
    %c0_i32_165 = arith.constant 0 : i32
    %497 = vector.broadcast %c0_i32_165 : i32 to vector<1x128xi32>
    %498 = arith.cmpi slt, %494, %497 : vector<1x128xi32>
    %c0_i32_166 = arith.constant 0 : i32
    %499 = arith.cmpi slt, %492, %c0_i32_166 : i32
    %500 = vector.broadcast %499 : i1 to vector<1x128xi1>
    %501 = vector.broadcast %500 : vector<1x128xi1> to vector<1x128xi1>
    %502 = arith.xori %498, %501 : vector<1x128xi1>
    %503 = arith.andi %502, %496 : vector<1x128xi1>
    %504 = vector.broadcast %492 : i32 to vector<1x128xi32>
    %505 = arith.addi %494, %504 : vector<1x128xi32>
    %506 = arith.select %503, %505, %494 : vector<1x128xi1>, vector<1x128xi32>
    %c63_i32 = arith.constant 63 : i32
    %507 = vector.broadcast %c63_i32 : i32 to vector<1x128xi32>
    %508 = arith.cmpi slt, %506, %507 : vector<1x128xi32>
    %509 = arith.extui %508 : vector<1x128xi1> to vector<1x128xi32>
    %510 = arith.sitofp %509 : vector<1x128xi32> to vector<1x128xf32>
    %c64_i32_167 = arith.constant 64 : i32
    %511 = vector.broadcast %c64_i32_167 : i32 to vector<1x128xi32>
    %512 = arith.cmpi slt, %490, %511 : vector<1x128xi32>
    %c1_168 = arith.constant 1 : index
    %c0_169 = arith.constant 0 : index
    %c0_170 = arith.constant 0 : index
    %513 = vector.load %arg6[%c1_168, %c0_169, %c0_170] : memref<3x32x1xf32, #tpu.memory_space<vmem>>, vector<1x32x1xf32>
    %514 = vector.shape_cast %513 : vector<1x32x1xf32> to vector<32x1xf32>
    %c2_171 = arith.constant 2 : index
    %c0_172 = arith.constant 0 : index
    %c0_173 = arith.constant 0 : index
    %515 = vector.load %arg6[%c2_171, %c0_172, %c0_173] : memref<3x32x1xf32, #tpu.memory_space<vmem>>, vector<1x32x1xf32>
    %516 = vector.shape_cast %515 : vector<1x32x1xf32> to vector<32x1xf32>
    %517 = vector.extract_strided_slice %489 {offsets = [0, 0], sizes = [16, 128], strides = [1, 1]} : vector<32x128xf32> to vector<16x128xf32>
    %518 = vector.broadcast %510 : vector<1x128xf32> to vector<16x128xf32>
    %519 = arith.mulf %517, %518 : vector<16x128xf32>
    %cst_174 = arith.constant dense<0.000000e+00> : vector<128xf32>
    %520 = vector.multi_reduction <add>, %519, %cst_174 [0] : vector<16x128xf32> to vector<128xf32>
    %521 = vector.shape_cast %520 : vector<128xf32> to vector<1x128xf32>
    %522 = arith.mulf %519, %519 : vector<16x128xf32>
    %cst_175 = arith.constant dense<0.000000e+00> : vector<128xf32>
    %523 = vector.multi_reduction <add>, %522, %cst_175 [0] : vector<16x128xf32> to vector<128xf32>
    %524 = vector.shape_cast %523 : vector<128xf32> to vector<1x128xf32>
    %525 = vector.extract_strided_slice %521 {offsets = [0, 0], sizes = [1, 64], strides = [1, 1]} : vector<1x128xf32> to vector<1x64xf32>
    %526 = vector.shape_cast %525 : vector<1x64xf32> to vector<1x1x64xf32>
    %cst_176 = arith.constant dense<0.000000e+00> : vector<1xf32>
    %527 = vector.multi_reduction <add>, %526, %cst_176 [1, 2] : vector<1x1x64xf32> to vector<1xf32>
    %528 = vector.shape_cast %527 : vector<1xf32> to vector<1x1x1xf32>
    %529 = vector.extract %528[0, 0, 0] : f32 from vector<1x1x1xf32>
    %cst_177 = arith.constant 1.008000e+03 : f32
    %530 = arith.divf %529, %cst_177 : f32
    %531 = vector.extract_strided_slice %521 {offsets = [0, 64], sizes = [1, 64], strides = [1, 1]} : vector<1x128xf32> to vector<1x64xf32>
    %532 = vector.shape_cast %531 : vector<1x64xf32> to vector<1x1x64xf32>
    %cst_178 = arith.constant dense<0.000000e+00> : vector<1xf32>
    %533 = vector.multi_reduction <add>, %532, %cst_178 [1, 2] : vector<1x1x64xf32> to vector<1xf32>
    %534 = vector.shape_cast %533 : vector<1xf32> to vector<1x1x1xf32>
    %535 = vector.extract %534[0, 0, 0] : f32 from vector<1x1x1xf32>
    %cst_179 = arith.constant 1.008000e+03 : f32
    %536 = arith.divf %535, %cst_179 : f32
    %537 = vector.extract_strided_slice %524 {offsets = [0, 0], sizes = [1, 64], strides = [1, 1]} : vector<1x128xf32> to vector<1x64xf32>
    %538 = vector.shape_cast %537 : vector<1x64xf32> to vector<1x1x64xf32>
    %cst_180 = arith.constant dense<0.000000e+00> : vector<1xf32>
    %539 = vector.multi_reduction <add>, %538, %cst_180 [1, 2] : vector<1x1x64xf32> to vector<1xf32>
    %540 = vector.shape_cast %539 : vector<1xf32> to vector<1x1x1xf32>
    %541 = vector.extract %540[0, 0, 0] : f32 from vector<1x1x1xf32>
    %cst_181 = arith.constant 1.008000e+03 : f32
    %542 = arith.divf %541, %cst_181 : f32
    %543 = vector.extract_strided_slice %524 {offsets = [0, 64], sizes = [1, 64], strides = [1, 1]} : vector<1x128xf32> to vector<1x64xf32>
    %544 = vector.shape_cast %543 : vector<1x64xf32> to vector<1x1x64xf32>
    %cst_182 = arith.constant dense<0.000000e+00> : vector<1xf32>
    %545 = vector.multi_reduction <add>, %544, %cst_182 [1, 2] : vector<1x1x64xf32> to vector<1xf32>
    %546 = vector.shape_cast %545 : vector<1xf32> to vector<1x1x1xf32>
    %547 = vector.extract %546[0, 0, 0] : f32 from vector<1x1x1xf32>
    %cst_183 = arith.constant 1.008000e+03 : f32
    %548 = arith.divf %547, %cst_183 : f32
    %549 = vector.broadcast %530 : f32 to vector<1x128xf32>
    %550 = vector.broadcast %536 : f32 to vector<1x128xf32>
    %551 = arith.select %512, %549, %550 : vector<1x128xi1>, vector<1x128xf32>
    %552 = arith.mulf %530, %530 : f32
    %553 = arith.subf %542, %552 : f32
    %554 = arith.mulf %536, %536 : f32
    %555 = arith.subf %548, %554 : f32
    %556 = vector.broadcast %553 : f32 to vector<1x128xf32>
    %557 = vector.broadcast %555 : f32 to vector<1x128xf32>
    %558 = arith.select %512, %556, %557 : vector<1x128xi1>, vector<1x128xf32>
    %cst_184 = arith.constant 9.99999974E-6 : f32
    %559 = vector.broadcast %cst_184 : f32 to vector<1x128xf32>
    %560 = arith.addf %558, %559 : vector<1x128xf32>
    %561 = math.rsqrt %560 : vector<1x128xf32>
    %562 = vector.broadcast %551 : vector<1x128xf32> to vector<16x128xf32>
    %563 = arith.subf %517, %562 : vector<16x128xf32>
    %564 = vector.broadcast %561 : vector<1x128xf32> to vector<16x128xf32>
    %565 = arith.mulf %563, %564 : vector<16x128xf32>
    %566 = vector.extract_strided_slice %514 {offsets = [0, 0], sizes = [16, 1], strides = [1, 1]} : vector<32x1xf32> to vector<16x1xf32>
    %567 = vector.broadcast %566 : vector<16x1xf32> to vector<16x128xf32>
    %568 = arith.mulf %565, %567 : vector<16x128xf32>
    %569 = vector.extract_strided_slice %516 {offsets = [0, 0], sizes = [16, 1], strides = [1, 1]} : vector<32x1xf32> to vector<16x1xf32>
    %570 = vector.broadcast %569 : vector<16x1xf32> to vector<16x128xf32>
    %571 = arith.addf %568, %570 : vector<16x128xf32>
    %572 = vector.extract_strided_slice %489 {offsets = [16, 0], sizes = [16, 128], strides = [1, 1]} : vector<32x128xf32> to vector<16x128xf32>
    %573 = vector.broadcast %510 : vector<1x128xf32> to vector<16x128xf32>
    %574 = arith.mulf %572, %573 : vector<16x128xf32>
    %cst_185 = arith.constant dense<0.000000e+00> : vector<128xf32>
    %575 = vector.multi_reduction <add>, %574, %cst_185 [0] : vector<16x128xf32> to vector<128xf32>
    %576 = vector.shape_cast %575 : vector<128xf32> to vector<1x128xf32>
    %577 = arith.mulf %574, %574 : vector<16x128xf32>
    %cst_186 = arith.constant dense<0.000000e+00> : vector<128xf32>
    %578 = vector.multi_reduction <add>, %577, %cst_186 [0] : vector<16x128xf32> to vector<128xf32>
    %579 = vector.shape_cast %578 : vector<128xf32> to vector<1x128xf32>
    %580 = vector.extract_strided_slice %576 {offsets = [0, 0], sizes = [1, 64], strides = [1, 1]} : vector<1x128xf32> to vector<1x64xf32>
    %581 = vector.shape_cast %580 : vector<1x64xf32> to vector<1x1x64xf32>
    %cst_187 = arith.constant dense<0.000000e+00> : vector<1xf32>
    %582 = vector.multi_reduction <add>, %581, %cst_187 [1, 2] : vector<1x1x64xf32> to vector<1xf32>
    %583 = vector.shape_cast %582 : vector<1xf32> to vector<1x1x1xf32>
    %584 = vector.extract %583[0, 0, 0] : f32 from vector<1x1x1xf32>
    %cst_188 = arith.constant 1.008000e+03 : f32
    %585 = arith.divf %584, %cst_188 : f32
    %586 = vector.extract_strided_slice %576 {offsets = [0, 64], sizes = [1, 64], strides = [1, 1]} : vector<1x128xf32> to vector<1x64xf32>
    %587 = vector.shape_cast %586 : vector<1x64xf32> to vector<1x1x64xf32>
    %cst_189 = arith.constant dense<0.000000e+00> : vector<1xf32>
    %588 = vector.multi_reduction <add>, %587, %cst_189 [1, 2] : vector<1x1x64xf32> to vector<1xf32>
    %589 = vector.shape_cast %588 : vector<1xf32> to vector<1x1x1xf32>
    %590 = vector.extract %589[0, 0, 0] : f32 from vector<1x1x1xf32>
    %cst_190 = arith.constant 1.008000e+03 : f32
    %591 = arith.divf %590, %cst_190 : f32
    %592 = vector.extract_strided_slice %579 {offsets = [0, 0], sizes = [1, 64], strides = [1, 1]} : vector<1x128xf32> to vector<1x64xf32>
    %593 = vector.shape_cast %592 : vector<1x64xf32> to vector<1x1x64xf32>
    %cst_191 = arith.constant dense<0.000000e+00> : vector<1xf32>
    %594 = vector.multi_reduction <add>, %593, %cst_191 [1, 2] : vector<1x1x64xf32> to vector<1xf32>
    %595 = vector.shape_cast %594 : vector<1xf32> to vector<1x1x1xf32>
    %596 = vector.extract %595[0, 0, 0] : f32 from vector<1x1x1xf32>
    %cst_192 = arith.constant 1.008000e+03 : f32
    %597 = arith.divf %596, %cst_192 : f32
    %598 = vector.extract_strided_slice %579 {offsets = [0, 64], sizes = [1, 64], strides = [1, 1]} : vector<1x128xf32> to vector<1x64xf32>
    %599 = vector.shape_cast %598 : vector<1x64xf32> to vector<1x1x64xf32>
    %cst_193 = arith.constant dense<0.000000e+00> : vector<1xf32>
    %600 = vector.multi_reduction <add>, %599, %cst_193 [1, 2] : vector<1x1x64xf32> to vector<1xf32>
    %601 = vector.shape_cast %600 : vector<1xf32> to vector<1x1x1xf32>
    %602 = vector.extract %601[0, 0, 0] : f32 from vector<1x1x1xf32>
    %cst_194 = arith.constant 1.008000e+03 : f32
    %603 = arith.divf %602, %cst_194 : f32
    %604 = vector.broadcast %585 : f32 to vector<1x128xf32>
    %605 = vector.broadcast %591 : f32 to vector<1x128xf32>
    %606 = arith.select %512, %604, %605 : vector<1x128xi1>, vector<1x128xf32>
    %607 = arith.mulf %585, %585 : f32
    %608 = arith.subf %597, %607 : f32
    %609 = arith.mulf %591, %591 : f32
    %610 = arith.subf %603, %609 : f32
    %611 = vector.broadcast %608 : f32 to vector<1x128xf32>
    %612 = vector.broadcast %610 : f32 to vector<1x128xf32>
    %613 = arith.select %512, %611, %612 : vector<1x128xi1>, vector<1x128xf32>
    %cst_195 = arith.constant 9.99999974E-6 : f32
    %614 = vector.broadcast %cst_195 : f32 to vector<1x128xf32>
    %615 = arith.addf %613, %614 : vector<1x128xf32>
    %616 = math.rsqrt %615 : vector<1x128xf32>
    %617 = vector.broadcast %606 : vector<1x128xf32> to vector<16x128xf32>
    %618 = arith.subf %572, %617 : vector<16x128xf32>
    %619 = vector.broadcast %616 : vector<1x128xf32> to vector<16x128xf32>
    %620 = arith.mulf %618, %619 : vector<16x128xf32>
    %621 = vector.extract_strided_slice %514 {offsets = [16, 0], sizes = [16, 1], strides = [1, 1]} : vector<32x1xf32> to vector<16x1xf32>
    %622 = vector.broadcast %621 : vector<16x1xf32> to vector<16x128xf32>
    %623 = arith.mulf %620, %622 : vector<16x128xf32>
    %624 = vector.extract_strided_slice %516 {offsets = [16, 0], sizes = [16, 1], strides = [1, 1]} : vector<32x1xf32> to vector<16x1xf32>
    %625 = vector.broadcast %624 : vector<16x1xf32> to vector<16x128xf32>
    %626 = arith.addf %623, %625 : vector<16x128xf32>
    %627 = tpu.concatenate %571, %626 in 0 : vector<16x128xf32>, vector<16x128xf32> -> vector<32x128xf32>
    %cst_196 = arith.constant 0.000000e+00 : f32
    %628 = vector.broadcast %cst_196 : f32 to vector<32x128xf32>
    %629 = arith.cmpf ogt, %627, %628 : vector<32x128xf32>
    %630 = math.exp %627 : vector<32x128xf32>
    %cst_197 = arith.constant 1.000000e+00 : f32
    %631 = vector.broadcast %cst_197 : f32 to vector<32x128xf32>
    %632 = arith.subf %630, %631 : vector<32x128xf32>
    %633 = arith.select %629, %627, %632 : vector<32x128xi1>, vector<32x128xf32>
    %c0_198 = arith.constant 0 : index
    %c0_199 = arith.constant 0 : index
    %634 = vector.load %arg7[%c0_198, %c0_199] : memref<32x128xf32, #tpu.memory_space<vmem>>, vector<32x128xf32>
    tpu.vector_store %arg7[%c0_198, %c0_199], %633 {strides = array<i32>} : memref<32x128xf32, #tpu.memory_space<vmem>>, vector<32x128xf32>,
    return
  }
  func.func @transform_0(%arg0: i32) -> (i32, i32) {
    %c0_i32 = arith.constant 0 : i32
    %c0_i32_0 = arith.constant 0 : i32
    %c0_i32_1 = arith.constant 0 : i32
    return %c0_i32, %c0_i32_0 : i32, i32
  }
  func.func @transform_1(%arg0: i32) -> (i32, i32, i32) {
    %c0_i32 = arith.constant 0 : i32
    %c0_i32_0 = arith.constant 0 : i32
    %c0_i32_1 = arith.constant 0 : i32
    %c0_i32_2 = arith.constant 0 : i32
    return %c0_i32, %c0_i32_0, %c0_i32_1 : i32, i32, i32
  }
  func.func @transform_2(%arg0: i32) -> (i32, i32, i32) {
    %c0_i32 = arith.constant 0 : i32
    %c0_i32_0 = arith.constant 0 : i32
    %c0_i32_1 = arith.constant 0 : i32
    %c0_i32_2 = arith.constant 0 : i32
    return %c0_i32, %c0_i32_0, %c0_i32_1 : i32, i32, i32
  }
  func.func @transform_3(%arg0: i32) -> (i32, i32) {
    %c0_i32 = arith.constant 0 : i32
    %c0_i32_0 = arith.constant 0 : i32
    %c0_i32_1 = arith.constant 0 : i32
    return %c0_i32, %c0_i32_0 : i32, i32
  }
  func.func @transform_4(%arg0: i32) -> (i32, i32, i32) {
    %c0_i32 = arith.constant 0 : i32
    %c0_i32_0 = arith.constant 0 : i32
    %c0_i32_1 = arith.constant 0 : i32
    %c0_i32_2 = arith.constant 0 : i32
    return %c0_i32, %c0_i32_0, %c0_i32_1 : i32, i32, i32
  }
  func.func @transform_5(%arg0: i32) -> (i32, i32, i32) {
    %c0_i32 = arith.constant 0 : i32
    %c0_i32_0 = arith.constant 0 : i32
    %c0_i32_1 = arith.constant 0 : i32
    %c0_i32_2 = arith.constant 0 : i32
    return %c0_i32, %c0_i32_0, %c0_i32_1 : i32, i32, i32
  }
  func.func @transform_6(%arg0: i32) -> (i32, i32) {
    %c0_i32 = arith.constant 0 : i32
    %c0_i32_0 = arith.constant 0 : i32
    %c0_i32_1 = arith.constant 0 : i32
    return %c0_i32, %c0_i32_0 : i32, i32
  }
}

</mosaic_0001>

<bundles_post_ra>
// kernel: tpu_custom_call.1
= control target key start
LH: loop header
LB: loop body
LE: loop exit
PB: predicated region body
PF: predicated region fallthrough
CT: control target
= control target key end

     0   :  { %s2976_s25 = smov 127   ;;  %s3904_s0 = inlined_call_operand.vmem [shape: f32[16,256], index: 0, kind: input, shape index: {}]   ;;  %s3905_s1 = inlined_call_operand.vmem [shape: f32[3,16,48], index: 1, kind: input, shape index: {}]   ;;  %s3906_s2 = inlined_call_operand.vmem [shape: f32[3,16,16], index: 2, kind: input, shape index: {}]   ;;  %s3907_s3 = inlined_call_operand.vmem [shape: f32[32,64], index: 3, kind: input, shape index: {}]   ;;  %s3908_s4 = inlined_call_operand.vmem [shape: f32[18,16,1], index: 4, kind: input, shape index: {}]   ;;  %s3909_s5 = inlined_call_operand.vmem [shape: f32[3,32,1], index: 5, kind: input, shape index: {}]   ;;  %s3910_s6 = inlined_call_operand.hbm [shape: f32[32,128], index: 6, kind: output, shape index: {}]  }
   0x1   :  { %v3030_v0 = vld [vmem:[%s3904_s0 + $0x10] sm:$0xff]  ;;  %v3035_v1 = vld [vmem:[%s3904_s0] sm:$0xff] }
   0x2   :  { %84 = vrot.lane.b32.xlu0 %v3030_v0, %s2976_s25  ;;  %82 = vrot.lane.b32.xlu1 %v3035_v1, %s2976_s25 }
   0x3   :  { %11 = vsyncpa [#allocation3], 0  ;;  %s2977_s26 = smov 1   ;;  %v3045_v2 = vld [vmem:[%s3904_s0 + $0x18] sm:$0xff]  ;;  %v3050_v3 = vld [vmem:[%s3904_s0 + $0x8] sm:$0xff]  ;;  %v28_v6 = vlaneseq  ;;  %v2978_v7 = vmov 0  }
   0x4   :  { %61 = vrot.lane.b32.xlu2 %v3030_v0, %s2977_s26  ;;  %v106_v4 = vld [vmem:[%s3908_s4 + $0x8] sm:$0xff]  ;;  %v105_v5 = vld [vmem:[%s3908_s4] sm:$0xff]  ;;  %2830 = vset.pattern.permute.xlu0 %v2978_v7  ;;  %vm117_vm5 = vcmask 392192   ;;  %vm202_vm6 = vcmask 1040384   ;;  %s2980_s16 = smov 125   ;;  %s2981_s17 = smov 3  }
   0x5   :  { %2829 = vset.pattern.permute.xlu2 %v2978_v7  ;;  %2831 = vset.pattern.permute.xlu1 %v2978_v7  ;;  %v3066_v8 = vand.u32 127, %v28_v6  ;;  %v104_v27 = vld [vmem:[%s3905_s1 + $0x8] sm:$0xff]  ;;  %v103_v28 = vld [vmem:[%s3905_s1] sm:$0xff] }
   0x7   :  { %v30_v11 = vadd.s32 128, %v3066_v8  ;;  %vm80_vm0 = vcmp.lt.s32.totalorder %v3066_v8, 127  ;;  %vm67_vm2 = vcmp.lt.s32.totalorder %v3066_v8, 1  ;;  %vm57_vm3 = vcmp.ge.s32.totalorder %v3066_v8, 1 }
   0x9   :  { %v3069_v13 = vand.u32 127, %v30_v11 }
   0xa   :  { %88 = vrot.lane.b32.xlu0 %v3045_v2, %s2976_s25  ;;  %86 = vrot.lane.b32.xlu1 %v3050_v3, %s2976_s25 }
   0xb   :  { %vm81_vm1 = vcmp.lt.s32.totalorder %v3069_v13, 127  ;;  %vm58_vm4 = vcmp.ge.s32.totalorder %v3069_v13, 1 }
   0xc   :  { %65 = vrot.lane.b32.xlu2 %v3045_v2, %s2977_s26 }
  0x12   :  { %59 = vrot.lane.b32.xlu0 %v3035_v1, %s2977_s26  ;;  %63 = vrot.lane.b32.xlu1 %v3050_v3, %s2977_s26 }
  0x14   :  { %109 = vperm.xlu2 %2829, %v105_v5  }
  0x1a   :  { %114 = vperm.xlu0 %2830, %v106_v4  }
  0x5e   :  { %v62_v12 = vpop.permute.xlu2 %61 }
  0x66   :  { %v66_v20 = vpop.permute.xlu2 %65 }
  0x67   :  { %v71_v23 = vsel %vm67_vm2, %v66_v20, %v62_v12  ;;  %v69_v25 = vsel %vm67_vm2, %v62_v12, %v66_v20  ;;  %v2546_v20 = vld [vmem:[%s3908_s4 + $0x10] sm:$0xff] }
  0x6e   :  { %v110_v29 = vpop.permute.xlu2 %109 }
  0x74   :  { %v85_v9 = vpop.permute.xlu0 %84  ;;  %v83_v10 = vpop.permute.xlu1 %82 }
  0x7c   :  { %v89_v14 = vpop.permute.xlu0 %88  ;;  %v87_v15 = vpop.permute.xlu1 %86 }
  0x7d   :  { %v92_v16 = vsel %vm80_vm0, %v85_v9, %v89_v14  ;;  %v94_v17 = vsel %vm80_vm0, %v89_v14, %v85_v9  ;;  %v91_v18 = vsel %vm80_vm0, %v83_v10, %v87_v15  ;;  %v93_v19 = vsel %vm80_vm0, %v87_v15, %v83_v10 }
  0x7e   :  { %2534 = vmatpush.msk.msra.mxu0 %vm80_vm0, %v92_v16  ;;  %2733 = vmatpush.msk.msra.mxu2 %vm80_vm0, %v92_v16 }
  0x7f   :  { %2540 = vmatpush.msk.msra.mxu1 %vm81_vm1, %v94_v17  ;;  %2739 = vmatpush.msk.msra.mxu3 %vm81_vm1, %v94_v17 }
  0x80   :  { %2535 = vmatpush.msk.msra.mxu0 %vm80_vm0, %v91_v18  ;;  %2734 = vmatpush.msk.msra.mxu2 %vm80_vm0, %v91_v18  ;;  %v2549_v18 = vld [vmem:[%s3908_s4 + $0x28] sm:$0xff] }
  0x81   :  { %2541 = vmatpush.msk.msra.mxu1 %vm81_vm1, %v93_v19  ;;  %2740 = vmatpush.msk.msra.mxu3 %vm81_vm1, %v93_v19  ;;  %v2547_v19 = vld [vmem:[%s3908_s4 + $0x18] sm:$0xff]  ;;  %vm390_vm1 = vcmask 130048  }
  0x82   :  { %136 = vmatpush.msra.mxu0 %v3030_v0  ;;  %2735 = vmatpush.msra.mxu2 %v3030_v0 }
  0x83   :  { %159 = vmatpush.msra.mxu1 %v3045_v2  ;;  %2741 = vmatpush.msra.mxu3 %v3045_v2 }
  0x84   :  { %137 = vmatpush.msra.mxu0 %v3035_v1  ;;  %2736 = vmatpush.msra.mxu2 %v3035_v1  ;;  %v60_v21 = vpop.permute.xlu0 %59  ;;  %v64_v22 = vpop.permute.xlu1 %63 }
  0x85   :  { %160 = vmatpush.msra.mxu1 %v3050_v3  ;;  %2742 = vmatpush.msra.mxu3 %v3050_v3  ;;  %v70_v24 = vsel %vm67_vm2, %v64_v22, %v60_v21  ;;  %v68_v26 = vsel %vm67_vm2, %v60_v21, %v64_v22  ;;  %v2548_v21 = vld [vmem:[%s3908_s4 + $0x20] sm:$0xff]  ;;  %v2554_v22 = vld [vmem:[%s3908_s4 + $0x30] sm:$0xff] }
  0x86   :  { %2536 = vmatpush.msk.msra.mxu0 %vm57_vm3, %v71_v23  ;;  %2737 = vmatpush.msk.msra.mxu2 %vm57_vm3, %v71_v23  ;;  %v2555_v23 = vld [vmem:[%s3908_s4 + $0x38] sm:$0xff] }
  0x87   :  { %2542 = vmatpush.msk.msra.mxu1 %vm58_vm4, %v69_v25  ;;  %2743 = vmatpush.msk.msra.mxu3 %vm58_vm4, %v69_v25 }
  0x88   :  { %2537 = vmatpush.msk.msra.mxu0 %vm57_vm3, %v70_v24  ;;  %2738 = vmatpush.msk.msra.mxu2 %vm57_vm3, %v70_v24  ;;  %v2979_v24 = vmov 2048.0  }
  0x89   :  { %2543 = vmatpush.msk.msra.mxu1 %vm58_vm4, %v68_v26  ;;  %2744 = vmatpush.msk.msra.mxu3 %vm58_vm4, %v68_v26  ;;  %2862 = vrcp.f32 %v2979_v24 }
  0x8a   :  { %2539 = vmatmul.msk.f32.vlgmr.msra.gmra.mxu2 %vm117_vm5, %v104_v27  ;;  %2545 = vmatmul.msk.f32.vlgmr.msra.gmra.mxu3 %vm117_vm5, %v104_v27 }
  0x8b   :  { %2538 = vmatmul.msk.f32.vlgmr.msra.gmra.mxu0 %vm117_vm5, %v103_v28  ;;  %2544 = vmatmul.msk.f32.vlgmr.msra.gmra.mxu1 %vm117_vm5, %v103_v28 }
  0x8c   :  { %v115_v34 = vpop.permute.xlu0 %114 }
  0x8f   :  { %v2863_v25 = vpop.eup %2862 }
  0x90   :  { %v214_v26 = vmul.f32 2048.0, %v2863_v25  ;;  %vm218_vm7 = vweird.f32 %v2863_v25 }
  0x92   :  { %v215_v27 = vsub.f32 1.0, %v214_v26 }
 0x108   :  { %v141_v30 = vpop.f32.mrf.mxu0  ;;  %v164_v31 = vpop.f32.mrf.mxu1 }
 0x109   :  { %v3134_v32 = vadd.f32 %v141_v30, %v110_v29  ;;  %v3136_v33 = vadd.f32 %v164_v31, %v110_v29 }
 0x10b   :  { %v184_v37 = vmul.f32 %v3134_v32, %v3134_v32  ;;  %v185_v39 = vmul.f32 %v3136_v33, %v3136_v33 }
 0x10d   :  { %v144_v35 = vpop.f32.mrf.mxu2  ;;  %v167_v36 = vpop.f32.mrf.mxu3 }
 0x10e   :  { %v3140_v38 = vadd.f32 %v144_v35, %v115_v34  ;;  %v3144_v40 = vadd.f32 %v167_v36, %v115_v34  ;;  %v216_v35 = vmul.f32 %v2863_v25, %v215_v27 }
 0x110   :  { %v170_v41 = vadd.f32 %v3140_v38, %v3134_v32  ;;  %v186_v42 = vmul.f32 %v3140_v38, %v3140_v38  ;;  %v177_v43 = vadd.f32 %v3144_v40, %v3136_v33  ;;  %v187_v44 = vmul.f32 %v3144_v40, %v3144_v40 }
 0x112   :  { %v171_v45 = vrot.slane %v170_v41, 4  ;;  %v188_v46 = vadd.f32 %v186_v42, %v184_v37  ;;  %v178_v47 = vrot.slane %v177_v43, 4  ;;  %v195_v48 = vadd.f32 %v187_v44, %v185_v39 }
 0x113   :  { %v217_v44 = vadd.f32 %v2863_v25, %v216_v35 }
 0x114   :  { %v172_v49 = vadd.f32 %v171_v45, %v170_v41  ;;  %v179_v50 = vadd.f32 %v178_v47, %v177_v43  ;;  %v189_v51 = vrot.slane %v188_v46, 4  ;;  %v196_v52 = vrot.slane %v195_v48, 4 }
 0x116   :  { %v173_v53 = vrot.slane %v172_v49, 2  ;;  %v180_v54 = vrot.slane %v179_v50, 2  ;;  %v190_v55 = vadd.f32 %v189_v51, %v188_v46  ;;  %v197_v56 = vadd.f32 %v196_v52, %v195_v48 }
 0x118   :  { %v174_v57 = vadd.f32 %v173_v53, %v172_v49  ;;  %v181_v58 = vadd.f32 %v180_v54, %v179_v50  ;;  %v191_v59 = vrot.slane %v190_v55, 2  ;;  %v198_v60 = vrot.slane %v197_v56, 2 }
 0x119   :  { %v219_v53 = vsel %vm218_vm7, %v2863_v25, %v217_v44 }
 0x11a   :  { %v175_v61 = vrot.slane %v174_v57, 1  ;;  %v182_v62 = vrot.slane %v181_v58, 1  ;;  %v192_v63 = vadd.f32 %v191_v59, %v190_v55  ;;  %v199_v4 = vadd.f32 %v198_v60, %v197_v56 }
 0x11c   :  { %v176_v5 = vadd.f32 %v175_v61, %v174_v57  ;;  %v183_v7 = vadd.f32 %v182_v62, %v181_v58  ;;  %v193_v9 = vrot.slane %v192_v63, 1  ;;  %v200_v14 = vrot.slane %v199_v4, 1 }
 0x11e   :  { %v203_v10 = vsel %vm202_vm6, %v176_v5, 0.0  ;;  %v222_v11 = vsel %vm202_vm6, %v183_v7, 0.0  ;;  %v194_v12 = vadd.f32 %v193_v9, %v192_v63  ;;  %v201_v16 = vadd.f32 %v200_v14, %v199_v4 }
 0x11f   :  { %204 = vadd.xlane.f32.xlu1 %v203_v10  ;;  %223 = vadd.xlane.f32.xlu2 %v222_v11 }
 0x120   :  { %v241_v15 = vsel %vm202_vm6, %v194_v12, 0.0  ;;  %v260_v17 = vsel %vm202_vm6, %v201_v16, 0.0 }
 0x121   :  { %242 = vadd.xlane.f32.xlu0 %v241_v15 }
 0x127   :  { %261 = vadd.xlane.f32.xlu2 %v260_v17 }
 0x135   :  { %348 = vperm.xlu0 %2830, %v2549_v18  }
 0x138   :  { %331 = vperm.xlu1 %2831, %v2547_v19  }
 0x13f   :  { %326 = vperm.xlu2 %2829, %v2546_v20  }
 0x140   :  { %343 = vperm.xlu1 %2831, %v2548_v21  }
 0x147   :  { %382 = vperm.xlu2 %2829, %v2554_v22  }
 0x148   :  { %387 = vperm.xlu1 %2831, %v2555_v23  }
 0x192   :  { %v205_v28 = vpop.xlane.xlu1 %204  ;;  %v224_v29 = vpop.xlane.xlu2 %223 }
 0x193   :  { %v206_v30 = vrot.slane %v205_v28, 4  ;;  %v225_v31 = vrot.slane %v224_v29, 4 }
 0x194   :  { %v243_v34 = vpop.xlane.xlu0 %242 }
 0x195   :  { %v207_v36 = vadd.f32 %v206_v30, %v205_v28  ;;  %v226_v37 = vadd.f32 %v225_v31, %v224_v29  ;;  %v244_v39 = vrot.slane %v243_v34, 4 }
 0x197   :  { %v208_v41 = vrot.slane %v207_v36, 2  ;;  %v227_v42 = vrot.slane %v226_v37, 2  ;;  %v245_v43 = vadd.f32 %v244_v39, %v243_v34 }
 0x199   :  { %v246_v45 = vrot.slane %v245_v43, 2  ;;  %v209_v46 = vadd.f32 %v208_v41, %v207_v36  ;;  %v228_v47 = vadd.f32 %v227_v42, %v226_v37 }
 0x19a   :  { %v262_v48 = vpop.xlane.xlu2 %261 }
 0x19b   :  { %v263_v49 = vrot.slane %v262_v48, 4  ;;  %v210_v50 = vrot.slane %v209_v46, 1  ;;  %v229_v51 = vrot.slane %v228_v47, 1  ;;  %v247_v52 = vadd.f32 %v246_v45, %v245_v43 }
 0x19d   :  { %v264_v54 = vadd.f32 %v263_v49, %v262_v48  ;;  %v211_v55 = vadd.f32 %v210_v50, %v209_v46  ;;  %v230_v56 = vadd.f32 %v229_v51, %v228_v47  ;;  %v248_v57 = vrot.slane %v247_v52, 1 }
 0x19f   :  { %v265_v58 = vrot.slane %v264_v54, 2  ;;  %2745 = vpush %v211_v55  ;;  %v249_v59 = vadd.f32 %v248_v57, %v247_v52  ;;  %v375_v57 = vld [vmem:[%s3906_s2] sm:$0xff] }
 0x1a0   :  { %2747 = vpush %v219_v53 }
 0x1a1   :  { %2749 = vpush %v230_v56  ;;  %v266_v60 = vadd.f32 %v265_v58, %v264_v54 }
 0x1a2   :  { %2751 = vpush %v249_v59  ;;  %v327_v30 = vpop.permute.xlu2 %326 }
 0x1a3   :  { %v267_v61 = vrot.slane %v266_v60, 1 }
 0x1a5   :  { %v268_v62 = vadd.f32 %v267_v61, %v266_v60 }
 0x1a7   :  { %2753 = vpush %v268_v62  ;;  %v349_v39 = vpop.permute.xlu0 %348 }
 0x1aa   :  { %v332_v16 = vpop.permute.xlu1 %331 }
 0x1b2   :  { %v344_v41 = vpop.permute.xlu1 %343 }
 0x1d0   :  { %s2746_s27 = spop %2745 }
 0x1d1   :  { %s3176_s28 = spop %2747 }
 0x1d2   :  { %s2750_s29 = spop %2749  ;;  %s3179_s30 = smul.f32 %s3176_s28, %s2746_s27 }
 0x1d3   :  { %s3182_s7 = smul.f32 %s2750_s29, %s3176_s28  ;;  %s2752_s8 = spop %2751 }
 0x1d4   :  { %s259_s9 = smul.f32 %s2752_s8, %s3176_s28  ;;  %v279_v19 = vstv %s3179_s30 }
 0x1d5   :  { %s283_s10 = smul.f32 %s3179_s30, %s3179_s30  ;;  %v280_v21 = vstv %s3182_s7  ;;  %v315_v24 = vsub.f32 %v3140_v38, %v279_v19  ;;  %v313_v25 = vsub.f32 %v3134_v32, %v279_v19 }
 0x1d6   :  { %s285_s0 = smul.f32 %s3182_s7, %s3182_s7  ;;  %v314_v31 = vsub.f32 %v3136_v33, %v280_v21  ;;  %v316_v34 = vsub.f32 %v3144_v40, %v280_v21 }
 0x1d7   :  { %s284_s11 = ssub.f32 %s259_s9, %s283_s10 }
 0x1d8   :  { %s2754_s12 = spop %2753 }
 0x1d9   :  { %s278_s13 = smul.f32 %s2754_s12, %s3176_s28  ;;  %v287_v63 = vstv %s284_s11 }
 0x1da   :  { %v291_v4 = vadd.f32 1e-05, %v287_v63  ;;  %v376_v63 = vld [vmem:[%s3906_s2 + $0x8] sm:$0xff] }
 0x1db   :  { %s286_s14 = ssub.f32 %s278_s13, %s285_s0 }
 0x1dc   :  { %2864 = vrsqrt.f32 %v291_v4  ;;  %vm299_vm9 = vweird.f32 %v291_v4 }
 0x1dd   :  { %v288_v5 = vstv %s286_s14 }
 0x1de   :  { %v292_v7 = vadd.f32 1e-05, %v288_v5 }
 0x1e0   :  { %2866 = vrsqrt.f32 %v292_v7  ;;  %vm309_vm12 = vweird.f32 %v292_v7 }
 0x1e2   :  { %v2865_v9 = vpop.eup %2864 }
 0x1e3   :  { %v294_v10 = vmul.f32 %v2865_v9, %v291_v4  ;;  %vm300_vm8 = vweird.f32 %v2865_v9 }
 0x1e4   :  { %vm301_vm10 = vmor %vm299_vm9, %vm300_vm8 }
 0x1e5   :  { %v295_v12 = vmul.f32 %v2865_v9, %v294_v10  ;;  %v388_v10 = vpop.permute.xlu1 %387 }
 0x1e6   :  { %v2867_v11 = vpop.eup %2866 }
 0x1e7   :  { %v304_v14 = vmul.f32 %v2867_v11, %v292_v7  ;;  %v296_v15 = vmul.f32 0.5, %v295_v12  ;;  %vm310_vm11 = vweird.f32 %v2867_v11  ;;  %v383_v7 = vpop.permute.xlu2 %382 }
 0x1e8   :  { %vm311_vm13 = vmor %vm309_vm12, %vm310_vm11 }
 0x1e9   :  { %v305_v17 = vmul.f32 %v2867_v11, %v304_v14  ;;  %v297_v18 = vsub.f32 1.5, %v296_v15 }
 0x1eb   :  { %v306_v20 = vmul.f32 0.5, %v305_v17  ;;  %v298_v22 = vmul.f32 %v2865_v9, %v297_v18 }
 0x1ed   :  { %v307_v23 = vsub.f32 1.5, %v306_v20  ;;  %v302_v26 = vsel %vm301_vm10, %v2865_v9, %v298_v22 }
 0x1ee   :  { %v319_v28 = vmul.f32 %v315_v24, %v302_v26  ;;  %v317_v29 = vmul.f32 %v313_v25, %v302_v26 }
 0x1ef   :  { %v308_v27 = vmul.f32 %v2867_v11, %v307_v23 }
 0x1f0   :  { %v336_v36 = vmul.f32 %v332_v16, %v319_v28  ;;  %v334_v37 = vmul.f32 %v327_v30, %v317_v29 }
 0x1f1   :  { %v312_v35 = vsel %vm311_vm13, %v2867_v11, %v308_v27 }
 0x1f2   :  { %v320_v38 = vmul.f32 %v316_v34, %v312_v35  ;;  %v318_v42 = vmul.f32 %v314_v31, %v312_v35  ;;  %v353_v43 = vadd.f32 %v349_v39, %v336_v36  ;;  %v351_v32 = vadd.f32 %v344_v41, %v334_v37 }
 0x1f4   :  { %v337_v44 = vmul.f32 %v332_v16, %v320_v38  ;;  %v335_v45 = vmul.f32 %v327_v30, %v318_v42  ;;  %v359_v46 = vmul.f32 1.442695, %v351_v32  ;;  %v363_v47 = vmul.f32 1.442695, %v353_v43 }
 0x1f5   :  { %vm357_vm14 = vcmp.gt.f32.partialorder %v353_v43, 0.0  ;;  %vm355_vm15 = vcmp.gt.f32.partialorder %v351_v32, 0.0 }
 0x1f6   :  { %v354_v48 = vadd.f32 %v349_v39, %v337_v44  ;;  %v352_v49 = vadd.f32 %v344_v41, %v335_v45  ;;  %2868 = vpow2.f32 %v363_v47 }
 0x1f7   :  { %2870 = vpow2.f32 %v359_v46 }
 0x1f8   :  { %v361_v33 = vmul.f32 1.442695, %v352_v49  ;;  %v365_v40 = vmul.f32 1.442695, %v354_v48  ;;  %vm358_vm2 = vcmp.gt.f32.partialorder %v354_v48, 0.0  ;;  %vm356_vm3 = vcmp.gt.f32.partialorder %v352_v49, 0.0 }
 0x1fa   :  { %2872 = vpow2.f32 %v365_v40 }
 0x1fb   :  { %2874 = vpow2.f32 %v361_v33 }
 0x1fc   :  { %v2869_v50 = vpop.eup %2868 }
 0x1fd   :  { %v2871_v51 = vpop.eup %2870  ;;  %v2552_v52 = vadd.f32 -1.0, %v2869_v50 }
 0x1fe   :  { %v2550_v53 = vadd.f32 -1.0, %v2871_v51 }
 0x1ff   :  { %v373_v55 = vsel %vm357_vm14, %v353_v43, %v2552_v52 }
 0x200   :  { %v2873_v54 = vpop.eup %2872  ;;  %411 = vmatpush.msrb.mxu2 %v373_v55  ;;  %v371_v59 = vsel %vm355_vm15, %v351_v32, %v2550_v53  ;;  %v2560_v53 = vld [vmem:[%s3908_s4 + $0x40] sm:$0xff]  ;;  %v2563_v55 = vld [vmem:[%s3908_s4 + $0x58] sm:$0xff] }
 0x201   :  { %v2875_v56 = vpop.eup %2874  ;;  %v2553_v58 = vadd.f32 -1.0, %v2873_v54  ;;  %v2561_v54 = vld [vmem:[%s3908_s4 + $0x48] sm:$0xff] }
 0x202   :  { %v2551_v60 = vadd.f32 -1.0, %v2875_v56  ;;  %412 = vmatpush.msrb.mxu2 %v371_v59  ;;  %v2562_v56 = vld [vmem:[%s3908_s4 + $0x50] sm:$0xff] }
 0x203   :  { %v374_v61 = vsel %vm358_vm2, %v354_v48, %v2553_v58  ;;  %2556 = vmatmul.msk.f32.vlgmr.msrb.gmra.mxu2 %vm390_vm1, %v375_v57  ;;  %vm674_vm2 = vcmp.lt.s32.totalorder %v3066_v8, 125 }
 0x204   :  { %434 = vmatpush.msrb.mxu3 %v374_v61  ;;  %v372_v62 = vsel %vm356_vm3, %v352_v49, %v2551_v60  ;;  %vm675_vm3 = vcmp.lt.s32.totalorder %v3069_v13, 125 }
 0x206   :  { %435 = vmatpush.msrb.mxu3 %v372_v62 }
 0x207   :  { %2558 = vmatmul.msk.f32.vlgmr.msrb.gmra.mxu3 %vm390_vm1, %v375_v57 }
 0x20b   :  { %2557 = vmatmul.msk.f32.gmra.mxu2 %vm390_vm1, %v376_v63 }
 0x20f   :  { %2559 = vmatmul.msk.f32.gmra.mxu3 %vm390_vm1, %v376_v63 }
 0x286   :  { %v414_v4 = vpop.f32.mrf.mxu2 }
 0x287   :  { %v3206_v9 = vadd.f32 %v414_v4, %v383_v7 }
 0x289   :  { %v457_v15 = vmul.f32 %v3206_v9, %v3206_v9 }
 0x28a   :  { %v437_v5 = vpop.f32.mrf.mxu3 }
 0x28b   :  { %v3210_v14 = vadd.f32 %v437_v5, %v383_v7 }
 0x28d   :  { %v458_v22 = vmul.f32 %v3210_v14, %v3210_v14 }
 0x28e   :  { %v417_v11 = vpop.f32.mrf.mxu2 }
 0x28f   :  { %v3208_v12 = vadd.f32 %v417_v11, %v388_v10 }
 0x291   :  { %v443_v16 = vadd.f32 %v3208_v12, %v3206_v9  ;;  %v459_v17 = vmul.f32 %v3208_v12, %v3208_v12 }
 0x292   :  { %v440_v18 = vpop.f32.mrf.mxu3 }
 0x293   :  { %v3218_v19 = vadd.f32 %v440_v18, %v388_v10  ;;  %v444_v20 = vrot.slane %v443_v16, 4  ;;  %v461_v21 = vadd.f32 %v459_v17, %v457_v15 }
 0x295   :  { %v450_v23 = vadd.f32 %v3218_v19, %v3210_v14  ;;  %v460_v24 = vmul.f32 %v3218_v19, %v3218_v19  ;;  %v445_v25 = vadd.f32 %v444_v20, %v443_v16  ;;  %v462_v26 = vrot.slane %v461_v21, 4 }
 0x297   :  { %v451_v27 = vrot.slane %v450_v23, 4  ;;  %v468_v28 = vadd.f32 %v460_v24, %v458_v22  ;;  %v446_v29 = vrot.slane %v445_v25, 2  ;;  %v463_v30 = vadd.f32 %v462_v26, %v461_v21 }
 0x299   :  { %v452_v31 = vadd.f32 %v451_v27, %v450_v23  ;;  %v469_v34 = vrot.slane %v468_v28, 4  ;;  %v447_v35 = vadd.f32 %v446_v29, %v445_v25  ;;  %v464_v36 = vrot.slane %v463_v30, 2 }
 0x29b   :  { %v453_v37 = vrot.slane %v452_v31, 2  ;;  %v470_v39 = vadd.f32 %v469_v34, %v468_v28  ;;  %v448_v38 = vrot.slane %v447_v35, 1  ;;  %v465_v41 = vadd.f32 %v464_v36, %v463_v30 }
 0x29d   :  { %v454_v42 = vadd.f32 %v453_v37, %v452_v31  ;;  %v471_v43 = vrot.slane %v470_v39, 2  ;;  %v449_v32 = vadd.f32 %v448_v38, %v447_v35  ;;  %v466_v44 = vrot.slane %v465_v41, 1 }
 0x29f   :  { %v455_v45 = vrot.slane %v454_v42, 1  ;;  %v472_v46 = vadd.f32 %v471_v43, %v470_v39  ;;  %v475_v47 = vsel %vm202_vm6, %v449_v32, 0.0  ;;  %v467_v48 = vadd.f32 %v466_v44, %v465_v41 }
 0x2a0   :  { %476 = vadd.xlane.f32.xlu0 %v475_v47 }
 0x2a1   :  { %v456_v49 = vadd.f32 %v455_v45, %v454_v42  ;;  %v473_v33 = vrot.slane %v472_v46, 1  ;;  %v513_v40 = vsel %vm202_vm6, %v467_v48, 0.0 }
 0x2a2   :  { %514 = vadd.xlane.f32.xlu1 %v513_v40 }
 0x2a3   :  { %v494_v50 = vsel %vm202_vm6, %v456_v49, 0.0  ;;  %v474_v51 = vadd.f32 %v473_v33, %v472_v46 }
 0x2a4   :  { %495 = vadd.xlane.f32.xlu2 %v494_v50 }
 0x2a5   :  { %v532_v52 = vsel %vm202_vm6, %v474_v51, 0.0 }
 0x2a8   :  { %533 = vadd.xlane.f32.xlu0 %v532_v52 }
 0x2bb   :  { %598 = vperm.xlu1 %2831, %v2560_v53  }
 0x2bc   :  { %603 = vperm.xlu2 %2829, %v2561_v54   ;;  %620 = vperm.xlu0 %2830, %v2563_v55  }
 0x2c4   :  { %615 = vperm.xlu2 %2829, %v2562_v56  }
 0x313   :  { %v477_v57 = vpop.xlane.xlu0 %476 }
 0x314   :  { %v478_v58 = vrot.slane %v477_v57, 4 }
 0x315   :  { %v515_v59 = vpop.xlane.xlu1 %514 }
 0x316   :  { %v479_v60 = vadd.f32 %v478_v58, %v477_v57  ;;  %v516_v61 = vrot.slane %v515_v59, 4 }
 0x317   :  { %v496_v62 = vpop.xlane.xlu2 %495 }
 0x318   :  { %v497_v63 = vrot.slane %v496_v62, 4  ;;  %v480_v4 = vrot.slane %v479_v60, 2  ;;  %v517_v5 = vadd.f32 %v516_v61, %v515_v59 }
 0x31a   :  { %v498_v7 = vadd.f32 %v497_v63, %v496_v62  ;;  %v518_v10 = vrot.slane %v517_v5, 2  ;;  %v481_v11 = vadd.f32 %v480_v4, %v479_v60 }
 0x31b   :  { %v534_v16 = vpop.xlane.xlu0 %533 }
 0x31c   :  { %v499_v15 = vrot.slane %v498_v7, 2  ;;  %v535_v17 = vrot.slane %v534_v16, 4  ;;  %v482_v18 = vrot.slane %v481_v11, 1  ;;  %v519_v20 = vadd.f32 %v518_v10, %v517_v5 }
 0x31e   :  { %v500_v21 = vadd.f32 %v499_v15, %v498_v7  ;;  %v536_v22 = vadd.f32 %v535_v17, %v534_v16  ;;  %v483_v23 = vadd.f32 %v482_v18, %v481_v11  ;;  %v520_v24 = vrot.slane %v519_v20, 1 }
 0x31f   :  { %v604_v43 = vpop.permute.xlu2 %603 }
 0x320   :  { %v501_v25 = vrot.slane %v500_v21, 1  ;;  %v537_v26 = vrot.slane %v536_v22, 2  ;;  %2755 = vpush %v483_v23  ;;  %v521_v28 = vadd.f32 %v520_v24, %v519_v20 }
 0x322   :  { %v502_v27 = vadd.f32 %v501_v25, %v500_v21  ;;  %v538_v29 = vadd.f32 %v537_v26, %v536_v22 }
 0x324   :  { %2757 = vpush %v502_v27  ;;  %v539_v30 = vrot.slane %v538_v29, 1 }
 0x325   :  { %2759 = vpush %v521_v28 }
 0x326   :  { %v540_v31 = vadd.f32 %v539_v30, %v538_v29 }
 0x328   :  { %2761 = vpush %v540_v31 }
 0x32d   :  { %v599_v55 = vpop.permute.xlu1 %598 }
 0x32e   :  { %v621_v61 = vpop.permute.xlu0 %620 }
 0x351   :  { %s2756_s29 = spop %2755 }
 0x352   :  { %s3243_s30 = smul.f32 %s2756_s29, %s3176_s28 }
 0x354   :  { %s555_s7 = smul.f32 %s3243_s30, %s3243_s30  ;;  %v551_v45 = vstv %s3243_s30 }
 0x355   :  { %s2758_s8 = spop %2757  ;;  %v585_v33 = vsub.f32 %v3206_v9, %v551_v45  ;;  %v587_v40 = vsub.f32 %v3208_v12, %v551_v45  ;;  %v616_v9 = vpop.permute.xlu2 %615 }
 0x356   :  { %s3248_s9 = smul.f32 %s2758_s8, %s3176_s28  ;;  %s2760_s10 = spop %2759 }
 0x357   :  { %s531_s0 = smul.f32 %s2760_s10, %s3176_s28  ;;  %s2982_s8 = smov 119  }
 0x358   :  { %s557_s11 = smul.f32 %s3248_s9, %s3248_s9  ;;  %v552_v50 = vstv %s3248_s9  ;;  %s2983_s9 = smov 9  }
 0x359   :  { %s556_s12 = ssub.f32 %s531_s0, %s555_s7  ;;  %s2762_s13 = spop %2761  ;;  %v586_v57 = vsub.f32 %v3210_v14, %v552_v50  ;;  %v588_v58 = vsub.f32 %v3218_v19, %v552_v50  ;;  %v2569_v50 = vld [vmem:[%s3905_s1 + $0x18] sm:$0xff] }
 0x35a   :  { %s550_s14 = smul.f32 %s2762_s13, %s3176_s28 }
 0x35b   :  { %v559_v34 = vstv %s556_s12 }
 0x35c   :  { %v563_v35 = vadd.f32 1e-05, %v559_v34  ;;  %s558_s15 = ssub.f32 %s550_s14, %s557_s11 }
 0x35e   :  { %2876 = vrsqrt.f32 %v563_v35  ;;  %v560_v36 = vstv %s558_s15  ;;  %vm571_vm7 = vweird.f32 %v563_v35 }
 0x35f   :  { %v564_v37 = vadd.f32 1e-05, %v560_v36 }
 0x361   :  { %2878 = vrsqrt.f32 %v564_v37  ;;  %vm581_vm10 = vweird.f32 %v564_v37 }
 0x364   :  { %v2877_v39 = vpop.eup %2876 }
 0x365   :  { %v566_v38 = vmul.f32 %v2877_v39, %v563_v35  ;;  %vm572_vm4 = vweird.f32 %v2877_v39 }
 0x366   :  { %vm573_vm8 = vmor %vm571_vm7, %vm572_vm4  ;;  %vm661_vm4 = vcmp.lt.s32.totalorder %v3066_v8, 3  ;;  %vm651_vm7 = vcmp.ge.s32.totalorder %v3066_v8, 3 }
 0x367   :  { %v567_v41 = vmul.f32 %v2877_v39, %v566_v38  ;;  %v2879_v42 = vpop.eup %2878 }
 0x368   :  { %v576_v44 = vmul.f32 %v2879_v42, %v564_v37  ;;  %vm582_vm9 = vweird.f32 %v2879_v42 }
 0x369   :  { %v568_v32 = vmul.f32 0.5, %v567_v41  ;;  %vm583_vm11 = vmor %vm581_vm10, %vm582_vm9 }
 0x36a   :  { %v577_v47 = vmul.f32 %v2879_v42, %v576_v44 }
 0x36b   :  { %v569_v46 = vsub.f32 1.5, %v568_v32 }
 0x36c   :  { %v578_v49 = vmul.f32 0.5, %v577_v47 }
 0x36d   :  { %v570_v48 = vmul.f32 %v2877_v39, %v569_v46 }
 0x36e   :  { %v579_v52 = vsub.f32 1.5, %v578_v49  ;;  %v2568_v49 = vld [vmem:[%s3905_s1 + $0x10] sm:$0xff] }
 0x36f   :  { %v574_v51 = vsel %vm573_vm8, %v2877_v39, %v570_v48  ;;  %vm652_vm8 = vcmp.ge.s32.totalorder %v3069_v13, 3 }
 0x370   :  { %v589_v53 = vmul.f32 %v585_v33, %v574_v51  ;;  %v591_v54 = vmul.f32 %v587_v40, %v574_v51  ;;  %v580_v56 = vmul.f32 %v2879_v42, %v579_v52 }
 0x372   :  { %v606_v59 = vmul.f32 %v599_v55, %v589_v53  ;;  %v608_v60 = vmul.f32 %v604_v43, %v591_v54  ;;  %v584_v12 = vsel %vm583_vm11, %v2879_v42, %v580_v56 }
 0x373   :  { %v590_v62 = vmul.f32 %v586_v57, %v584_v12  ;;  %v592_v63 = vmul.f32 %v588_v58, %v584_v12 }
 0x374   :  { %v623_v4 = vadd.f32 %v616_v9, %v606_v59  ;;  %v625_v5 = vadd.f32 %v621_v61, %v608_v60 }
 0x375   :  { %v607_v7 = vmul.f32 %v599_v55, %v590_v62  ;;  %v609_v10 = vmul.f32 %v604_v43, %v592_v63 }
 0x376   :  { %v631_v11 = vmul.f32 1.442695, %v623_v4  ;;  %v635_v15 = vmul.f32 1.442695, %v625_v5  ;;  %vm627_vm12 = vcmp.gt.f32.partialorder %v623_v4, 0.0  ;;  %vm629_vm13 = vcmp.gt.f32.partialorder %v625_v5, 0.0 }
 0x377   :  { %v626_v16 = vadd.f32 %v621_v61, %v609_v10  ;;  %v624_v17 = vadd.f32 %v616_v9, %v607_v7 }
 0x378   :  { %2880 = vpow2.f32 %v631_v11 }
 0x379   :  { %2882 = vpow2.f32 %v635_v15  ;;  %v637_v14 = vmul.f32 1.442695, %v626_v16  ;;  %v633_v19 = vmul.f32 1.442695, %v624_v17  ;;  %vm630_vm14 = vcmp.gt.f32.partialorder %v626_v16, 0.0 }
 0x37a   :  { %vm628_vm15 = vcmp.gt.f32.partialorder %v624_v17, 0.0 }
 0x37b   :  { %2884 = vpow2.f32 %v637_v14 }
 0x37c   :  { %2886 = vpow2.f32 %v633_v19 }
 0x37e   :  { %v2881_v18 = vpop.eup %2880 }
 0x37f   :  { %v2883_v20 = vpop.eup %2882  ;;  %v2564_v21 = vadd.f32 -1.0, %v2881_v18 }
 0x380   :  { %v2566_v22 = vadd.f32 -1.0, %v2883_v20 }
 0x381   :  { %v643_v23 = vsel %vm627_vm12, %v623_v4, %v2564_v21  ;;  %v2885_v24 = vpop.eup %2884 }
 0x382   :  { %v3261_v25 = vadd.f32 %v643_v23, %v3035_v1  ;;  %v645_v26 = vsel %vm629_vm13, %v625_v5, %v2566_v22  ;;  %v2887_v27 = vpop.eup %2886  ;;  %v2567_v29 = vadd.f32 -1.0, %v2885_v24 }
 0x383   :  { %v3264_v28 = vadd.f32 %v645_v26, %v3030_v0  ;;  %v2565_v30 = vadd.f32 -1.0, %v2887_v27 }
 0x384   :  { %676 = vrot.lane.b32.xlu2 %v3261_v25, %s2980_s16  ;;  %v646_v31 = vsel %vm630_vm14, %v626_v16, %v2567_v29 }
 0x385   :  { %678 = vrot.lane.b32.xlu0 %v3264_v28, %s2980_s16  ;;  %v3271_v34 = vadd.f32 %v646_v31, %v3045_v2  ;;  %v644_v0 = vsel %vm628_vm15, %v624_v17, %v2565_v30  ;;  %v2570_v2 = vld [vmem:[%s3908_s4 + $0x60] sm:$0xff] }
 0x386   :  { %v3276_v1 = vadd.f32 %v644_v0, %v3050_v3  ;;  %v2571_v3 = vld [vmem:[%s3908_s4 + $0x68] sm:$0xff] }
 0x387   :  { %682 = vrot.lane.b32.xlu1 %v3271_v34, %s2980_s16 }
 0x38c   :  { %659 = vrot.lane.b32.xlu2 %v3271_v34, %s2981_s17 }
 0x38d   :  { %680 = vrot.lane.b32.xlu0 %v3276_v1, %s2980_s16 }
 0x38f   :  { %655 = vrot.lane.b32.xlu1 %v3264_v28, %s2981_s17 }
 0x394   :  { %705 = vperm.xlu2 %2829, %v2570_v2  }
 0x395   :  { %653 = vrot.lane.b32.xlu0 %v3261_v25, %s2981_s17 }
 0x397   :  { %657 = vrot.lane.b32.xlu1 %v3276_v1, %s2981_s17 }
 0x39d   :  { %710 = vperm.xlu0 %2830, %v2571_v3  }
 0x3de   :  { %v677_v37 = vpop.permute.xlu2 %676 }
 0x3e6   :  { %v660_v44 = vpop.permute.xlu2 %659 }
 0x3ee   :  { %v706_v53 = vpop.permute.xlu2 %705 }
 0x3f7   :  { %v679_v35 = vpop.permute.xlu0 %678 }
 0x3f9   :  { %v683_v36 = vpop.permute.xlu1 %682 }
 0x3fa   :  { %v686_v39 = vsel %vm674_vm2, %v679_v35, %v683_v36  ;;  %v688_v38 = vsel %vm674_vm2, %v683_v36, %v679_v35 }
 0x3fb   :  { %2572 = vmatpush.msk.msra.mxu2 %vm674_vm2, %v686_v39  ;;  %2578 = vmatpush.msk.msra.mxu3 %vm675_vm3, %v688_v38 }
 0x3ff   :  { %v681_v41 = vpop.permute.xlu0 %680 }
 0x400   :  { %v685_v42 = vsel %vm674_vm2, %v677_v37, %v681_v41  ;;  %v687_v43 = vsel %vm674_vm2, %v681_v41, %v677_v37 }
 0x401   :  { %2573 = vmatpush.msk.msra.mxu2 %vm674_vm2, %v685_v42  ;;  %2579 = vmatpush.msk.msra.mxu3 %vm675_vm3, %v687_v43  ;;  %v656_v32 = vpop.permute.xlu1 %655  ;;  %v2584_v43 = vld [vmem:[%s3908_s4 + $0x70] sm:$0xff] }
 0x402   :  { %v663_v45 = vsel %vm661_vm4, %v656_v32, %v660_v44  ;;  %v665_v46 = vsel %vm661_vm4, %v660_v44, %v656_v32  ;;  %v2585_v32 = vld [vmem:[%s3908_s4 + $0x78] sm:$0xff]  ;;  %v2586_v44 = vld [vmem:[%s3908_s4 + $0x80] sm:$0xff] }
 0x403   :  { %731 = vmatpush.msra.mxu2 %v3264_v28  ;;  %754 = vmatpush.msra.mxu3 %v3271_v34 }
 0x405   :  { %732 = vmatpush.msra.mxu2 %v3261_v25  ;;  %755 = vmatpush.msra.mxu3 %v3276_v1 }
 0x407   :  { %2574 = vmatpush.msk.msra.mxu2 %vm651_vm7, %v665_v46  ;;  %2580 = vmatpush.msk.msra.mxu3 %vm652_vm8, %v663_v45  ;;  %v654_v47 = vpop.permute.xlu0 %653  ;;  %v2594_v45 = vld [vmem:[%s3908_s4 + $0x90] sm:$0xff]  ;;  %v2587_v46 = vld [vmem:[%s3908_s4 + $0x88] sm:$0xff] }
 0x409   :  { %v658_v48 = vpop.permute.xlu1 %657 }
 0x40a   :  { %v662_v33 = vsel %vm661_vm4, %v654_v47, %v658_v48  ;;  %v664_v40 = vsel %vm661_vm4, %v658_v48, %v654_v47  ;;  %v2595_v47 = vld [vmem:[%s3908_s4 + $0x98] sm:$0xff] }
 0x40b   :  { %2575 = vmatpush.msk.msra.mxu2 %vm651_vm7, %v664_v40  ;;  %2581 = vmatpush.msk.msra.mxu3 %vm652_vm8, %v662_v33 }
 0x40c   :  { %2576 = vmatmul.msk.f32.vlgmr.msra.gmra.mxu2 %vm117_vm5, %v2568_v49  ;;  %2582 = vmatmul.msk.f32.vlgmr.msra.gmra.mxu3 %vm117_vm5, %v2568_v49 }
 0x40f   :  { %v711_v56 = vpop.permute.xlu0 %710 }
 0x414   :  { %2577 = vmatmul.msk.f32.gmra.mxu2 %vm117_vm5, %v2569_v50  ;;  %2583 = vmatmul.msk.f32.gmra.mxu3 %vm117_vm5, %v2569_v50 }
 0x48f   :  { %v736_v51 = vpop.f32.mrf.mxu2  ;;  %v759_v52 = vpop.f32.mrf.mxu3 }
 0x490   :  { %v3329_v54 = vadd.f32 %v736_v51, %v706_v53  ;;  %v3331_v55 = vadd.f32 %v759_v52, %v706_v53 }
 0x492   :  { %v779_v9 = vmul.f32 %v3329_v54, %v3329_v54  ;;  %v780_v61 = vmul.f32 %v3331_v55, %v3331_v55 }
 0x497   :  { %v739_v57 = vpop.f32.mrf.mxu2  ;;  %v762_v58 = vpop.f32.mrf.mxu3 }
 0x498   :  { %v3333_v59 = vadd.f32 %v739_v57, %v711_v56  ;;  %v3335_v60 = vadd.f32 %v762_v58, %v711_v56 }
 0x49a   :  { %v765_v12 = vadd.f32 %v3333_v59, %v3329_v54  ;;  %v781_v62 = vmul.f32 %v3333_v59, %v3333_v59  ;;  %v772_v63 = vadd.f32 %v3335_v60, %v3331_v55  ;;  %v782_v4 = vmul.f32 %v3335_v60, %v3335_v60 }
 0x49c   :  { %v766_v5 = vrot.slane %v765_v12, 4  ;;  %v783_v7 = vadd.f32 %v781_v62, %v779_v9  ;;  %v773_v10 = vrot.slane %v772_v63, 4  ;;  %v790_v11 = vadd.f32 %v782_v4, %v780_v61 }
 0x49e   :  { %v774_v15 = vadd.f32 %v773_v10, %v772_v63  ;;  %v767_v16 = vadd.f32 %v766_v5, %v765_v12  ;;  %v784_v17 = vrot.slane %v783_v7, 4  ;;  %v791_v14 = vrot.slane %v790_v11, 4 }
 0x4a0   :  { %v775_v19 = vrot.slane %v774_v15, 2  ;;  %v768_v18 = vrot.slane %v767_v16, 2  ;;  %v785_v20 = vadd.f32 %v784_v17, %v783_v7  ;;  %v792_v21 = vadd.f32 %v791_v14, %v790_v11 }
 0x4a2   :  { %v776_v22 = vadd.f32 %v775_v19, %v774_v15  ;;  %v769_v23 = vadd.f32 %v768_v18, %v767_v16  ;;  %v786_v24 = vrot.slane %v785_v20, 2  ;;  %v793_v26 = vrot.slane %v792_v21, 2 }
 0x4a4   :  { %v777_v27 = vrot.slane %v776_v22, 1  ;;  %v770_v29 = vrot.slane %v769_v23, 1  ;;  %v787_v30 = vadd.f32 %v786_v24, %v785_v20  ;;  %v794_v31 = vadd.f32 %v793_v26, %v792_v21 }
 0x4a6   :  { %v778_v0 = vadd.f32 %v777_v27, %v776_v22  ;;  %v771_v2 = vadd.f32 %v770_v29, %v769_v23  ;;  %v788_v3 = vrot.slane %v787_v30, 1  ;;  %v795_v39 = vrot.slane %v794_v31, 1 }
 0x4a8   :  { %v816_v35 = vsel %vm202_vm6, %v778_v0, 0.0  ;;  %v797_v36 = vsel %vm202_vm6, %v771_v2, 0.0  ;;  %v789_v37 = vadd.f32 %v788_v3, %v787_v30  ;;  %v796_v41 = vadd.f32 %v795_v39, %v794_v31 }
 0x4a9   :  { %817 = vadd.xlane.f32.xlu2 %v816_v35  ;;  %798 = vadd.xlane.f32.xlu1 %v797_v36 }
 0x4aa   :  { %v835_v38 = vsel %vm202_vm6, %v789_v37, 0.0  ;;  %v854_v42 = vsel %vm202_vm6, %v796_v41, 0.0 }
 0x4ab   :  { %836 = vadd.xlane.f32.xlu0 %v835_v38 }
 0x4b1   :  { %855 = vadd.xlane.f32.xlu1 %v854_v42 }
 0x4bf   :  { %920 = vperm.xlu0 %2830, %v2584_v43  }
 0x4c1   :  { %925 = vperm.xlu2 %2829, %v2585_v32  }
 0x4c7   :  { %937 = vperm.xlu0 %2830, %v2586_v44  }
 0x4c9   :  { %977 = vperm.xlu2 %2829, %v2594_v45  }
 0x4ca   :  { %942 = vperm.xlu1 %2831, %v2587_v46  }
 0x4d2   :  { %982 = vperm.xlu1 %2831, %v2595_v47  }
 0x51c   :  { %v818_v48 = vpop.xlane.xlu2 %817  ;;  %v799_v49 = vpop.xlane.xlu1 %798 }
 0x51d   :  { %v819_v33 = vrot.slane %v818_v48, 4  ;;  %v800_v40 = vrot.slane %v799_v49, 4 }
 0x51e   :  { %v837_v50 = vpop.xlane.xlu0 %836 }
 0x51f   :  { %v820_v51 = vadd.f32 %v819_v33, %v818_v48  ;;  %v801_v52 = vadd.f32 %v800_v40, %v799_v49  ;;  %v838_v53 = vrot.slane %v837_v50, 4 }
 0x521   :  { %v821_v56 = vrot.slane %v820_v51, 2  ;;  %v802_v57 = vrot.slane %v801_v52, 2  ;;  %v839_v58 = vadd.f32 %v838_v53, %v837_v50 }
 0x523   :  { %v840_v9 = vrot.slane %v839_v58, 2  ;;  %v803_v61 = vadd.f32 %v802_v57, %v801_v52  ;;  %v822_v12 = vadd.f32 %v821_v56, %v820_v51 }
 0x524   :  { %v856_v62 = vpop.xlane.xlu1 %855  ;;  %v926_v46 = vpop.permute.xlu2 %925 }
 0x525   :  { %v857_v63 = vrot.slane %v856_v62, 4  ;;  %v804_v4 = vrot.slane %v803_v61, 1  ;;  %v823_v5 = vrot.slane %v822_v12, 1  ;;  %v841_v7 = vadd.f32 %v840_v9, %v839_v58 }
 0x527   :  { %v858_v10 = vadd.f32 %v857_v63, %v856_v62  ;;  %v805_v11 = vadd.f32 %v804_v4, %v803_v61  ;;  %v824_v15 = vadd.f32 %v823_v5, %v822_v12  ;;  %v842_v16 = vrot.slane %v841_v7, 1 }
 0x529   :  { %v859_v17 = vrot.slane %v858_v10, 2  ;;  %2763 = vpush %v805_v11  ;;  %v843_v14 = vadd.f32 %v842_v16, %v841_v7  ;;  %v2592_v11 = vld [vmem:[%s3906_s2 + $0x10] sm:$0xff] }
 0x52a   :  { %2765 = vpush %v824_v15 }
 0x52b   :  { %2767 = vpush %v843_v14  ;;  %v860_v19 = vadd.f32 %v859_v17, %v858_v10 }
 0x52d   :  { %v861_v18 = vrot.slane %v860_v19, 1 }
 0x52f   :  { %v862_v20 = vadd.f32 %v861_v18, %v860_v19 }
 0x531   :  { %2769 = vpush %v862_v20  ;;  %v921_v31 = vpop.permute.xlu0 %920 }
 0x53c   :  { %v943_v50 = vpop.permute.xlu1 %942 }
 0x55a   :  { %s2764_s15 = spop %2763 }
 0x55b   :  { %s3372_s17 = smul.f32 %s2764_s15, %s3176_s28  ;;  %s2766_s18 = spop %2765 }
 0x55c   :  { %s2768_s19 = spop %2767  ;;  %s3377_s21 = smul.f32 %s2766_s18, %s3176_s28 }
 0x55d   :  { %s877_s20 = smul.f32 %s3372_s17, %s3372_s17  ;;  %v873_v3 = vstv %s3372_s17 }
 0x55e   :  { %s853_s22 = smul.f32 %s2768_s19, %s3176_s28  ;;  %v907_v38 = vsub.f32 %v3329_v54, %v873_v3  ;;  %v909_v41 = vsub.f32 %v3333_v59, %v873_v3  ;;  %v874_v42 = vstv %s3377_s21  ;;  %v938_v54 = vpop.permute.xlu0 %937 }
 0x55f   :  { %s879_s24 = smul.f32 %s3377_s21, %s3377_s21  ;;  %v908_v48 = vsub.f32 %v3331_v55, %v874_v42  ;;  %v910_v49 = vsub.f32 %v3335_v60, %v874_v42 }
 0x560   :  { %s878_s23 = ssub.f32 %s853_s22, %s877_s20 }
 0x562   :  { %s2770_s26 = spop %2769  ;;  %v881_v21 = vstv %s878_s23 }
 0x563   :  { %s872_s27 = smul.f32 %s2770_s26, %s3176_s28  ;;  %v885_v22 = vadd.f32 1e-05, %v881_v21  ;;  %v2593_v21 = vld [vmem:[%s3906_s2 + $0x18] sm:$0xff] }
 0x565   :  { %s880_s29 = ssub.f32 %s872_s27, %s879_s24  ;;  %2888 = vrsqrt.f32 %v885_v22  ;;  %vm893_vm10 = vweird.f32 %v885_v22 }
 0x567   :  { %v882_v23 = vstv %s880_s29 }
 0x568   :  { %v886_v24 = vadd.f32 1e-05, %v882_v23 }
 0x56a   :  { %2890 = vrsqrt.f32 %v886_v24  ;;  %vm903_vm13 = vweird.f32 %v886_v24 }
 0x56b   :  { %v2889_v26 = vpop.eup %2888 }
 0x56c   :  { %v888_v27 = vmul.f32 %v2889_v26, %v885_v22  ;;  %vm894_vm9 = vweird.f32 %v2889_v26 }
 0x56d   :  { %vm895_vm11 = vmor %vm893_vm10, %vm894_vm9 }
 0x56e   :  { %v889_v29 = vmul.f32 %v2889_v26, %v888_v27  ;;  %v983_v27 = vpop.permute.xlu1 %982 }
 0x570   :  { %v2891_v30 = vpop.eup %2890  ;;  %v890_v0 = vmul.f32 0.5, %v889_v29 }
 0x571   :  { %v898_v2 = vmul.f32 %v2891_v30, %v886_v24  ;;  %vm904_vm12 = vweird.f32 %v2891_v30  ;;  %v978_v24 = vpop.permute.xlu2 %977 }
 0x572   :  { %v891_v35 = vsub.f32 1.5, %v890_v0  ;;  %vm905_vm14 = vmor %vm903_vm13, %vm904_vm12 }
 0x573   :  { %v899_v36 = vmul.f32 %v2891_v30, %v898_v2 }
 0x574   :  { %v892_v37 = vmul.f32 %v2889_v26, %v891_v35 }
 0x575   :  { %v900_v39 = vmul.f32 0.5, %v899_v36 }
 0x576   :  { %v896_v32 = vsel %vm895_vm11, %v2889_v26, %v892_v37 }
 0x577   :  { %v901_v43 = vsub.f32 1.5, %v900_v39  ;;  %v913_v44 = vmul.f32 %v909_v41, %v896_v32  ;;  %v911_v45 = vmul.f32 %v907_v38, %v896_v32 }
 0x579   :  { %v902_v47 = vmul.f32 %v2891_v30, %v901_v43  ;;  %v930_v33 = vmul.f32 %v926_v46, %v913_v44  ;;  %v928_v40 = vmul.f32 %v921_v31, %v911_v45 }
 0x57b   :  { %v906_v59 = vsel %vm905_vm14, %v2891_v30, %v902_v47  ;;  %v947_v51 = vadd.f32 %v943_v50, %v930_v33  ;;  %v945_v52 = vadd.f32 %v938_v54, %v928_v40 }
 0x57c   :  { %v914_v53 = vmul.f32 %v910_v49, %v906_v59  ;;  %v912_v56 = vmul.f32 %v908_v48, %v906_v59 }
 0x57d   :  { %v957_v57 = vmul.f32 1.442695, %v947_v51  ;;  %v953_v58 = vmul.f32 1.442695, %v945_v52  ;;  %vm951_vm15 = vcmp.gt.f32.partialorder %v947_v51, 0.0  ;;  %vm949_vm3 = vcmp.gt.f32.partialorder %v945_v52, 0.0 }
 0x57e   :  { %v931_v9 = vmul.f32 %v926_v46, %v914_v53  ;;  %v929_v61 = vmul.f32 %v921_v31, %v912_v56 }
 0x57f   :  { %2892 = vpow2.f32 %v957_v57 }
 0x580   :  { %2894 = vpow2.f32 %v953_v58  ;;  %v948_v12 = vadd.f32 %v943_v50, %v931_v9  ;;  %v946_v55 = vadd.f32 %v938_v54, %v929_v61 }
 0x582   :  { %v959_v62 = vmul.f32 1.442695, %v948_v12  ;;  %v955_v60 = vmul.f32 1.442695, %v946_v55  ;;  %vm952_vm4 = vcmp.gt.f32.partialorder %v948_v12, 0.0  ;;  %vm950_vm7 = vcmp.gt.f32.partialorder %v946_v55, 0.0 }
 0x584   :  { %2896 = vpow2.f32 %v959_v62 }
 0x585   :  { %v2893_v63 = vpop.eup %2892  ;;  %2898 = vpow2.f32 %v955_v60 }
 0x586   :  { %v2895_v4 = vpop.eup %2894  ;;  %v2590_v5 = vadd.f32 -1.0, %v2893_v63 }
 0x587   :  { %v2588_v7 = vadd.f32 -1.0, %v2895_v4 }
 0x588   :  { %v967_v10 = vsel %vm951_vm15, %v947_v51, %v2590_v5 }
 0x589   :  { %1005 = vmatpush.msrb.mxu0 %v967_v10  ;;  %v965_v16 = vsel %vm949_vm3, %v945_v52, %v2588_v7  ;;  %v2600_v7 = vld [vmem:[%s3908_s4 + $0xa0] sm:$0xff]  ;;  %v2603_v10 = vld [vmem:[%s3908_s4 + $0xb8] sm:$0xff] }
 0x58a   :  { %v2897_v15 = vpop.eup %2896 }
 0x58b   :  { %v2899_v17 = vpop.eup %2898  ;;  %1006 = vmatpush.msrb.mxu0 %v965_v16  ;;  %v2591_v14 = vadd.f32 -1.0, %v2897_v15  ;;  %v2602_v15 = vld [vmem:[%s3908_s4 + $0xb0] sm:$0xff] }
 0x58c   :  { %2596 = vmatmul.msk.f32.vlgmr.msrb.gmra.mxu0 %vm390_vm1, %v2592_v11  ;;  %v2589_v19 = vadd.f32 -1.0, %v2899_v17 }
 0x58d   :  { %v968_v18 = vsel %vm952_vm4, %v948_v12, %v2591_v14 }
 0x58e   :  { %1028 = vmatpush.msrb.mxu1 %v968_v18  ;;  %v966_v20 = vsel %vm950_vm7, %v946_v55, %v2589_v19  ;;  %vm1268_vm7 = vcmp.lt.s32.totalorder %v3066_v8, 119 }
 0x590   :  { %1029 = vmatpush.msrb.mxu1 %v966_v20 }
 0x591   :  { %2598 = vmatmul.msk.f32.vlgmr.msrb.gmra.mxu1 %vm390_vm1, %v2592_v11  ;;  %v2601_v11 = vld [vmem:[%s3908_s4 + $0xa8] sm:$0xff] }
 0x594   :  { %2597 = vmatmul.msk.f32.gmra.mxu0 %vm390_vm1, %v2593_v21 }
 0x599   :  { %2599 = vmatmul.msk.f32.gmra.mxu1 %vm390_vm1, %v2593_v21 }
 0x609   :  { %v1008_v22 = vpop.f32.mrf.mxu0 }
 0x60a   :  { %v3399_v26 = vadd.f32 %v1008_v22, %v978_v24 }
 0x60c   :  { %v1051_v31 = vmul.f32 %v3399_v26, %v3399_v26 }
 0x60e   :  { %v1031_v23 = vpop.f32.mrf.mxu1 }
 0x60f   :  { %v3409_v3 = vadd.f32 %v1031_v23, %v978_v24 }
 0x611   :  { %v1011_v29 = vpop.f32.mrf.mxu0  ;;  %v1052_v42 = vmul.f32 %v3409_v3, %v3409_v3 }
 0x612   :  { %v3401_v30 = vadd.f32 %v1011_v29, %v983_v27 }
 0x614   :  { %v1037_v0 = vadd.f32 %v3401_v30, %v3399_v26  ;;  %v1053_v2 = vmul.f32 %v3401_v30, %v3401_v30 }
 0x616   :  { %v1038_v35 = vrot.slane %v1037_v0, 4  ;;  %v1055_v36 = vadd.f32 %v1053_v2, %v1051_v31  ;;  %v1034_v37 = vpop.f32.mrf.mxu1 }
 0x617   :  { %v3411_v39 = vadd.f32 %v1034_v37, %v983_v27 }
 0x618   :  { %v1039_v38 = vadd.f32 %v1038_v35, %v1037_v0  ;;  %v1056_v41 = vrot.slane %v1055_v36, 4 }
 0x619   :  { %v1044_v43 = vadd.f32 %v3411_v39, %v3409_v3  ;;  %v1054_v32 = vmul.f32 %v3411_v39, %v3411_v39 }
 0x61a   :  { %v1040_v44 = vrot.slane %v1039_v38, 2  ;;  %v1057_v45 = vadd.f32 %v1056_v41, %v1055_v36 }
 0x61b   :  { %v1045_v46 = vrot.slane %v1044_v43, 4  ;;  %v1062_v47 = vadd.f32 %v1054_v32, %v1052_v42 }
 0x61c   :  { %v1041_v48 = vadd.f32 %v1040_v44, %v1039_v38  ;;  %v1058_v49 = vrot.slane %v1057_v45, 2 }
 0x61d   :  { %v1046_v33 = vadd.f32 %v1045_v46, %v1044_v43  ;;  %v1063_v40 = vrot.slane %v1062_v47, 4 }
 0x61e   :  { %v1042_v54 = vrot.slane %v1041_v48, 1  ;;  %v1059_v50 = vadd.f32 %v1058_v49, %v1057_v45 }
 0x61f   :  { %v1047_v59 = vrot.slane %v1046_v33, 2  ;;  %v1064_v51 = vadd.f32 %v1063_v40, %v1062_v47 }
 0x620   :  { %v1043_v52 = vadd.f32 %v1042_v54, %v1041_v48  ;;  %v1060_v53 = vrot.slane %v1059_v50, 1 }
 0x621   :  { %v1048_v56 = vadd.f32 %v1047_v59, %v1046_v33  ;;  %v1065_v57 = vrot.slane %v1064_v51, 2 }
 0x622   :  { %v1069_v58 = vsel %vm202_vm6, %v1043_v52, 0.0  ;;  %v1061_v9 = vadd.f32 %v1060_v53, %v1059_v50 }
 0x623   :  { %1070 = vadd.xlane.f32.xlu0 %v1069_v58  ;;  %v1049_v61 = vrot.slane %v1048_v56, 1  ;;  %v1066_v12 = vadd.f32 %v1065_v57, %v1064_v51 }
 0x624   :  { %v1107_v55 = vsel %vm202_vm6, %v1061_v9, 0.0 }
 0x625   :  { %1108 = vadd.xlane.f32.xlu1 %v1107_v55  ;;  %v1050_v62 = vadd.f32 %v1049_v61, %v1048_v56  ;;  %v1067_v60 = vrot.slane %v1066_v12, 1 }
 0x627   :  { %v1088_v63 = vsel %vm202_vm6, %v1050_v62, 0.0  ;;  %v1068_v4 = vadd.f32 %v1067_v60, %v1066_v12 }
 0x628   :  { %1089 = vadd.xlane.f32.xlu2 %v1088_v63 }
 0x629   :  { %v1126_v5 = vsel %vm202_vm6, %v1068_v4, 0.0 }
 0x62b   :  { %1127 = vadd.xlane.f32.xlu0 %v1126_v5 }
 0x63e   :  { %1192 = vperm.xlu1 %2831, %v2600_v7  }
 0x63f   :  { %1214 = vperm.xlu0 %2830, %v2603_v10  }
 0x640   :  { %1197 = vperm.xlu2 %2829, %v2601_v11  }
 0x648   :  { %1209 = vperm.xlu2 %2829, %v2602_v15  }
 0x696   :  { %v1071_v16 = vpop.xlane.xlu0 %1070 }
 0x697   :  { %v1072_v17 = vrot.slane %v1071_v16, 4 }
 0x698   :  { %v1109_v14 = vpop.xlane.xlu1 %1108 }
 0x699   :  { %v1073_v19 = vadd.f32 %v1072_v17, %v1071_v16  ;;  %v1110_v18 = vrot.slane %v1109_v14, 4 }
 0x69b   :  { %v1074_v20 = vrot.slane %v1073_v19, 2  ;;  %v1111_v21 = vadd.f32 %v1110_v18, %v1109_v14  ;;  %v1090_v22 = vpop.xlane.xlu2 %1089 }
 0x69c   :  { %v1091_v23 = vrot.slane %v1090_v22, 4 }
 0x69d   :  { %v1112_v24 = vrot.slane %v1111_v21, 2  ;;  %v1075_v27 = vadd.f32 %v1074_v20, %v1073_v19 }
 0x69e   :  { %v1092_v29 = vadd.f32 %v1091_v23, %v1090_v22  ;;  %v1128_v31 = vpop.xlane.xlu0 %1127 }
 0x69f   :  { %v1129_v0 = vrot.slane %v1128_v31, 4  ;;  %v1076_v2 = vrot.slane %v1075_v27, 1  ;;  %v1113_v35 = vadd.f32 %v1112_v24, %v1111_v21 }
 0x6a0   :  { %v1093_v36 = vrot.slane %v1092_v29, 2 }
 0x6a1   :  { %v1130_v37 = vadd.f32 %v1129_v0, %v1128_v31  ;;  %v1077_v38 = vadd.f32 %v1076_v2, %v1075_v27  ;;  %v1114_v43 = vrot.slane %v1113_v35, 1 }
 0x6a2   :  { %v1094_v41 = vadd.f32 %v1093_v36, %v1092_v29 }
 0x6a3   :  { %v1131_v42 = vrot.slane %v1130_v37, 2  ;;  %2771 = vpush %v1077_v38  ;;  %v1115_v46 = vadd.f32 %v1114_v43, %v1113_v35  ;;  %v1198_v56 = vpop.permute.xlu2 %1197 }
 0x6a4   :  { %v1095_v32 = vrot.slane %v1094_v41, 1 }
 0x6a5   :  { %v1132_v44 = vadd.f32 %v1131_v42, %v1130_v37 }
 0x6a6   :  { %v1096_v45 = vadd.f32 %v1095_v32, %v1094_v41 }
 0x6a7   :  { %v1133_v47 = vrot.slane %v1132_v44, 1 }
 0x6a8   :  { %2773 = vpush %v1096_v45 }
 0x6a9   :  { %2775 = vpush %v1115_v46  ;;  %v1134_v48 = vadd.f32 %v1133_v47, %v1132_v44 }
 0x6ab   :  { %2777 = vpush %v1134_v48 }
 0x6b0   :  { %v1193_v17 = vpop.permute.xlu1 %1192 }
 0x6b1   :  { %v1215_v22 = vpop.permute.xlu0 %1214 }
 0x6d4   :  { %s2772_s18 = spop %2771 }
 0x6d5   :  { %s3436_s19 = smul.f32 %s2772_s18, %s3176_s28 }
 0x6d7   :  { %s1149_s20 = smul.f32 %s3436_s19, %s3436_s19  ;;  %v1145_v9 = vstv %s3436_s19 }
 0x6d8   :  { %v1179_v63 = vsub.f32 %v3399_v26, %v1145_v9  ;;  %v1181_v4 = vsub.f32 %v3401_v30, %v1145_v9  ;;  %v1210_v26 = vpop.permute.xlu2 %1209 }
 0x6d9   :  { %s2774_s21 = spop %2773 }
 0x6da   :  { %s3441_s22 = smul.f32 %s2774_s21, %s3176_s28  ;;  %s2776_s23 = spop %2775 }
 0x6db   :  { %s1125_s24 = smul.f32 %s2776_s23, %s3176_s28 }
 0x6dc   :  { %s1151_s26 = smul.f32 %s3441_s22, %s3441_s22  ;;  %s2778_s27 = spop %2777  ;;  %v1146_v55 = vstv %s3441_s22 }
 0x6dd   :  { %s1150_s29 = ssub.f32 %s1125_s24, %s1149_s20  ;;  %s1144_s30 = smul.f32 %s2778_s27, %s3176_s28  ;;  %v1180_v10 = vsub.f32 %v3409_v3, %v1146_v55  ;;  %v1182_v11 = vsub.f32 %v3411_v39, %v1146_v55  ;;  %v2608_v55 = vld [vmem:[%s3905_s1 + $0x20] sm:$0xff] }
 0x6de   :  { %s2522_s20 = sshll.u32 %s3910_s6, 4  ;;  %s2523_s20 = int_to_ptr.hbm [resolvable:$true] %s2522_s20 }
 0x6df   :  { %v1153_v49 = vstv %s1150_s29  ;;  %s1152_s7 = ssub.f32 %s1144_s30, %s1151_s26 }
 0x6e0   :  { %v1157_v33 = vadd.f32 1e-05, %v1153_v49 }
 0x6e1   :  { %v1154_v40 = vstv %s1152_s7 }
 0x6e2   :  { %2900 = vrsqrt.f32 %v1157_v33  ;;  %v1158_v54 = vadd.f32 1e-05, %v1154_v40  ;;  %vm1165_vm9 = vweird.f32 %v1157_v33 }
 0x6e4   :  { %2902 = vrsqrt.f32 %v1158_v54  ;;  %vm1175_vm12 = vweird.f32 %v1158_v54 }
 0x6e8   :  { %v2901_v50 = vpop.eup %2900 }
 0x6e9   :  { %v1160_v59 = vmul.f32 %v2901_v50, %v1157_v33  ;;  %vm1166_vm8 = vweird.f32 %v2901_v50 }
 0x6ea   :  { %v2903_v51 = vpop.eup %2902  ;;  %vm1167_vm11 = vmor %vm1165_vm9, %vm1166_vm8  ;;  %vm1269_vm8 = vcmp.lt.s32.totalorder %v3069_v13, 119  ;;  %vm1255_vm9 = vcmp.lt.s32.totalorder %v3066_v8, 9 }
 0x6eb   :  { %v1161_v52 = vmul.f32 %v2901_v50, %v1160_v59  ;;  %v1170_v53 = vmul.f32 %v2903_v51, %v1158_v54  ;;  %vm1176_vm10 = vweird.f32 %v2903_v51 }
 0x6ec   :  { %vm1177_vm13 = vmor %vm1175_vm12, %vm1176_vm10  ;;  %vm1245_vm10 = vcmp.ge.s32.totalorder %v3066_v8, 9 }
 0x6ed   :  { %v1162_v57 = vmul.f32 0.5, %v1161_v52  ;;  %v1171_v58 = vmul.f32 %v2903_v51, %v1170_v53 }
 0x6ef   :  { %v1163_v61 = vsub.f32 1.5, %v1162_v57  ;;  %v1172_v12 = vmul.f32 0.5, %v1171_v58 }
 0x6f1   :  { %v1164_v62 = vmul.f32 %v2901_v50, %v1163_v61  ;;  %v1173_v60 = vsub.f32 1.5, %v1172_v12 }
 0x6f3   :  { %v1168_v5 = vsel %vm1167_vm11, %v2901_v50, %v1164_v62  ;;  %v1174_v7 = vmul.f32 %v2903_v51, %v1173_v60  ;;  %vm1246_vm11 = vcmp.ge.s32.totalorder %v3069_v13, 9  ;;  %v2609_v60 = vld [vmem:[%s3905_s1 + $0x28] sm:$0xff] }
 0x6f4   :  { %v1183_v15 = vmul.f32 %v1179_v63, %v1168_v5  ;;  %v1185_v16 = vmul.f32 %v1181_v4, %v1168_v5 }
 0x6f5   :  { %v1178_v14 = vsel %vm1177_vm13, %v2903_v51, %v1174_v7 }
 0x6f6   :  { %v1200_v19 = vmul.f32 %v1193_v17, %v1183_v15  ;;  %v1202_v18 = vmul.f32 %v1198_v56, %v1185_v16  ;;  %v1184_v20 = vmul.f32 %v1180_v10, %v1178_v14  ;;  %v1186_v21 = vmul.f32 %v1182_v11, %v1178_v14 }
 0x6f8   :  { %v1201_v30 = vmul.f32 %v1193_v17, %v1184_v20  ;;  %v1203_v23 = vmul.f32 %v1198_v56, %v1186_v21  ;;  %v1217_v24 = vadd.f32 %v1210_v26, %v1200_v19  ;;  %v1219_v27 = vadd.f32 %v1215_v22, %v1202_v18 }
 0x6fa   :  { %v1225_v29 = vmul.f32 1.442695, %v1217_v24  ;;  %v1229_v31 = vmul.f32 1.442695, %v1219_v27  ;;  %v1220_v3 = vadd.f32 %v1215_v22, %v1203_v23  ;;  %v1218_v0 = vadd.f32 %v1210_v26, %v1201_v30 }
 0x6fb   :  { %vm1221_vm14 = vcmp.gt.f32.partialorder %v1217_v24, 0.0  ;;  %vm1223_vm15 = vcmp.gt.f32.partialorder %v1219_v27, 0.0 }
 0x6fc   :  { %2904 = vpow2.f32 %v1225_v29  ;;  %v1231_v39 = vmul.f32 1.442695, %v1220_v3  ;;  %v1227_v2 = vmul.f32 1.442695, %v1218_v0  ;;  %vm1224_vm3 = vcmp.gt.f32.partialorder %v1220_v3, 0.0 }
 0x6fd   :  { %2906 = vpow2.f32 %v1229_v31  ;;  %vm1222_vm4 = vcmp.gt.f32.partialorder %v1218_v0, 0.0 }
 0x6fe   :  { %2908 = vpow2.f32 %v1231_v39 }
 0x6ff   :  { %2910 = vpow2.f32 %v1227_v2 }
 0x702   :  { %v2905_v35 = vpop.eup %2904 }
 0x703   :  { %v2907_v36 = vpop.eup %2906  ;;  %v2604_v37 = vadd.f32 -1.0, %v2905_v35 }
 0x704   :  { %v2606_v38 = vadd.f32 -1.0, %v2907_v36  ;;  %v2909_v41 = vpop.eup %2908 }
 0x705   :  { %v1237_v42 = vsel %vm1221_vm14, %v1217_v24, %v2604_v37  ;;  %v2911_v43 = vpop.eup %2910  ;;  %v2607_v45 = vadd.f32 -1.0, %v2909_v41 }
 0x706   :  { %v3454_v32 = vadd.f32 %v1237_v42, %v3261_v25  ;;  %v1239_v44 = vsel %vm1223_vm15, %v1219_v27, %v2606_v38  ;;  %v2605_v48 = vadd.f32 -1.0, %v2911_v43 }
 0x707   :  { %v3457_v46 = vadd.f32 %v1239_v44, %v3264_v28  ;;  %v1240_v47 = vsel %vm1224_vm3, %v1220_v3, %v2607_v45  ;;  %v2610_v28 = vld [vmem:[%s3908_s4 + $0xc0] sm:$0xff] }
 0x708   :  { %1270 = vrot.lane.b32.xlu2 %v3454_v32, %s2982_s8  ;;  %v3462_v49 = vadd.f32 %v1240_v47, %v3271_v34  ;;  %v1238_v25 = vsel %vm1222_vm4, %v1218_v0, %v2605_v48  ;;  %v2611_v34 = vld [vmem:[%s3908_s4 + $0xc8] sm:$0xff] }
 0x709   :  { %1272 = vrot.lane.b32.xlu0 %v3457_v46, %s2982_s8  ;;  %v3466_v33 = vadd.f32 %v1238_v25, %v3276_v1 }
 0x70a   :  { %1276 = vrot.lane.b32.xlu1 %v3462_v49, %s2982_s8 }
 0x710   :  { %1253 = vrot.lane.b32.xlu2 %v3462_v49, %s2983_s9 }
 0x711   :  { %1274 = vrot.lane.b32.xlu0 %v3466_v33, %s2982_s8 }
 0x712   :  { %1249 = vrot.lane.b32.xlu1 %v3457_v46, %s2983_s9 }
 0x718   :  { %1299 = vperm.xlu2 %2829, %v2610_v28  }
 0x719   :  { %1247 = vrot.lane.b32.xlu0 %v3454_v32, %s2983_s9 }
 0x71a   :  { %1251 = vrot.lane.b32.xlu1 %v3466_v33, %s2983_s9 }
 0x721   :  { %1304 = vperm.xlu0 %2830, %v2611_v34  }
 0x762   :  { %v1271_v59 = vpop.permute.xlu2 %1270 }
 0x76a   :  { %v1254_v57 = vpop.permute.xlu2 %1253 }
 0x772   :  { %v1300_v5 = vpop.permute.xlu2 %1299 }
 0x77b   :  { %v1273_v1 = vpop.permute.xlu0 %1272 }
 0x77c   :  { %v1277_v40 = vpop.permute.xlu1 %1276 }
 0x77d   :  { %v1280_v54 = vsel %vm1268_vm7, %v1273_v1, %v1277_v40  ;;  %v1282_v50 = vsel %vm1268_vm7, %v1277_v40, %v1273_v1 }
 0x77e   :  { %2612 = vmatpush.msk.msrb.mxu2 %vm1268_vm7, %v1280_v54  ;;  %2618 = vmatpush.msk.msrb.mxu3 %vm1269_vm8, %v1282_v50 }
 0x783   :  { %v1275_v51 = vpop.permute.xlu0 %1274 }
 0x784   :  { %v1279_v52 = vsel %vm1268_vm7, %v1271_v59, %v1275_v51  ;;  %v1281_v53 = vsel %vm1268_vm7, %v1275_v51, %v1271_v59  ;;  %v1250_v56 = vpop.permute.xlu1 %1249 }
 0x785   :  { %2613 = vmatpush.msk.msrb.mxu2 %vm1268_vm7, %v1279_v52  ;;  %2619 = vmatpush.msk.msrb.mxu3 %vm1269_vm8, %v1281_v53  ;;  %v1257_v58 = vsel %vm1255_vm9, %v1250_v56, %v1254_v57  ;;  %v1259_v9 = vsel %vm1255_vm9, %v1254_v57, %v1250_v56  ;;  %v2624_v52 = vld [vmem:[%s3908_s4 + $0xd0] sm:$0xff]  ;;  %v2625_v53 = vld [vmem:[%s3908_s4 + $0xd8] sm:$0xff]  ;;  %v2626_v56 = vld [vmem:[%s3908_s4 + $0xe0] sm:$0xff] }
 0x786   :  { %v2627_v57 = vld [vmem:[%s3908_s4 + $0xe8] sm:$0xff] }
 0x787   :  { %1325 = vmatpush.msrb.mxu2 %v3457_v46  ;;  %1348 = vmatpush.msrb.mxu3 %v3462_v49 }
 0x789   :  { %1326 = vmatpush.msrb.mxu2 %v3454_v32  ;;  %1349 = vmatpush.msrb.mxu3 %v3466_v33 }
 0x78b   :  { %2614 = vmatpush.msk.msrb.mxu2 %vm1245_vm10, %v1259_v9  ;;  %2620 = vmatpush.msk.msrb.mxu3 %vm1246_vm11, %v1257_v58  ;;  %v1248_v61 = vpop.permute.xlu0 %1247  ;;  %v2634_v58 = vld [vmem:[%s3908_s4 + $0xf0] sm:$0xff]  ;;  %v2635_v9 = vld [vmem:[%s3908_s4 + $0xf8] sm:$0xff] }
 0x78c   :  { %v1252_v12 = vpop.permute.xlu1 %1251 }
 0x78d   :  { %v1256_v13 = vsel %vm1255_vm9, %v1248_v61, %v1252_v12  ;;  %v1258_v62 = vsel %vm1255_vm9, %v1252_v12, %v1248_v61 }
 0x78e   :  { %2615 = vmatpush.msk.msrb.mxu2 %vm1245_vm10, %v1258_v62  ;;  %2621 = vmatpush.msk.msrb.mxu3 %vm1246_vm11, %v1256_v13 }
 0x78f   :  { %2616 = vmatmul.msk.f32.vlgmr.msrb.gmra.mxu2 %vm117_vm5, %v2608_v55  ;;  %2622 = vmatmul.msk.f32.vlgmr.msrb.gmra.mxu3 %vm117_vm5, %v2608_v55 }
 0x793   :  { %v1305_v11 = vpop.permute.xlu0 %1304 }
 0x797   :  { %2617 = vmatmul.msk.f32.gmra.mxu2 %vm117_vm5, %v2609_v60  ;;  %2623 = vmatmul.msk.f32.gmra.mxu3 %vm117_vm5, %v2609_v60 }
 0x812   :  { %v1330_v63 = vpop.f32.mrf.mxu2  ;;  %v1353_v4 = vpop.f32.mrf.mxu3 }
 0x813   :  { %v3506_v7 = vadd.f32 %v1330_v63, %v1300_v5  ;;  %v3508_v10 = vadd.f32 %v1353_v4, %v1300_v5 }
 0x815   :  { %v1373_v19 = vmul.f32 %v3506_v7, %v3506_v7  ;;  %v1374_v18 = vmul.f32 %v3508_v10, %v3508_v10 }
 0x81a   :  { %v1333_v15 = vpop.f32.mrf.mxu2  ;;  %v1356_v16 = vpop.f32.mrf.mxu3 }
 0x81b   :  { %v3510_v17 = vadd.f32 %v1333_v15, %v1305_v11  ;;  %v3512_v14 = vadd.f32 %v1356_v16, %v1305_v11 }
 0x81d   :  { %v1359_v20 = vadd.f32 %v3510_v17, %v3506_v7  ;;  %v1375_v21 = vmul.f32 %v3510_v17, %v3510_v17  ;;  %v1366_v26 = vadd.f32 %v3512_v14, %v3508_v10  ;;  %v1376_v22 = vmul.f32 %v3512_v14, %v3512_v14 }
 0x81f   :  { %v1360_v30 = vrot.slane %v1359_v20, 4  ;;  %v1377_v23 = vadd.f32 %v1375_v21, %v1373_v19  ;;  %v1367_v24 = vrot.slane %v1366_v26, 4  ;;  %v1384_v27 = vadd.f32 %v1376_v22, %v1374_v18 }
 0x821   :  { %v1368_v29 = vadd.f32 %v1367_v24, %v1366_v26  ;;  %v1361_v31 = vadd.f32 %v1360_v30, %v1359_v20  ;;  %v1378_v3 = vrot.slane %v1377_v23, 4  ;;  %v1385_v0 = vrot.slane %v1384_v27, 4 }
 0x823   :  { %v1369_v39 = vrot.slane %v1368_v29, 2  ;;  %v1362_v2 = vrot.slane %v1361_v31, 2  ;;  %v1379_v35 = vadd.f32 %v1378_v3, %v1377_v23  ;;  %v1386_v36 = vadd.f32 %v1385_v0, %v1384_v27 }
 0x825   :  { %v1370_v37 = vadd.f32 %v1369_v39, %v1368_v29  ;;  %v1363_v38 = vadd.f32 %v1362_v2, %v1361_v31  ;;  %v1380_v41 = vrot.slane %v1379_v35, 2  ;;  %v1387_v42 = vrot.slane %v1386_v36, 2 }
 0x827   :  { %v1371_v43 = vrot.slane %v1370_v37, 1  ;;  %v1364_v44 = vrot.slane %v1363_v38, 1  ;;  %v1381_v45 = vadd.f32 %v1380_v41, %v1379_v35  ;;  %v1388_v47 = vadd.f32 %v1387_v42, %v1386_v36 }
 0x829   :  { %v1372_v48 = vadd.f32 %v1371_v43, %v1370_v37  ;;  %v1365_v25 = vadd.f32 %v1364_v44, %v1363_v38  ;;  %v1382_v28 = vrot.slane %v1381_v45, 1  ;;  %v1389_v54 = vrot.slane %v1388_v47, 1 }
 0x82b   :  { %v1410_v34 = vsel %vm202_vm6, %v1372_v48, 0.0  ;;  %v1391_v1 = vsel %vm202_vm6, %v1365_v25, 0.0  ;;  %v1383_v40 = vadd.f32 %v1382_v28, %v1381_v45  ;;  %v1390_v59 = vadd.f32 %v1389_v54, %v1388_v47 }
 0x82c   :  { %1411 = vadd.xlane.f32.xlu2 %v1410_v34  ;;  %1392 = vadd.xlane.f32.xlu1 %v1391_v1 }
 0x82d   :  { %v1429_v50 = vsel %vm202_vm6, %v1383_v40, 0.0  ;;  %v1448_v51 = vsel %vm202_vm6, %v1390_v59, 0.0 }
 0x82e   :  { %1430 = vadd.xlane.f32.xlu0 %v1429_v50 }
 0x834   :  { %1449 = vadd.xlane.f32.xlu2 %v1448_v51 }
 0x842   :  { %1514 = vperm.xlu0 %2830, %v2624_v52  }
 0x845   :  { %1519 = vperm.xlu1 %2831, %v2625_v53  }
 0x84a   :  { %1531 = vperm.xlu0 %2830, %v2626_v56  }
 0x84c   :  { %1536 = vperm.xlu2 %2829, %v2627_v57  }
 0x84d   :  { %1571 = vperm.xlu1 %2831, %v2634_v58  }
 0x854   :  { %1576 = vperm.xlu2 %2829, %v2635_v9  }
 0x89f   :  { %v1412_v61 = vpop.xlane.xlu2 %1411  ;;  %v1393_v12 = vpop.xlane.xlu1 %1392 }
 0x8a0   :  { %v1413_v55 = vrot.slane %v1412_v61, 4  ;;  %v1394_v13 = vrot.slane %v1393_v12, 4 }
 0x8a1   :  { %v1431_v62 = vpop.xlane.xlu0 %1430 }
 0x8a2   :  { %v1414_v60 = vadd.f32 %v1413_v55, %v1412_v61  ;;  %v1395_v63 = vadd.f32 %v1394_v13, %v1393_v12  ;;  %v1432_v4 = vrot.slane %v1431_v62, 4 }
 0x8a4   :  { %v1415_v5 = vrot.slane %v1414_v60, 2  ;;  %v1396_v11 = vrot.slane %v1395_v63, 2  ;;  %v1433_v15 = vadd.f32 %v1432_v4, %v1431_v62 }
 0x8a6   :  { %v1434_v16 = vrot.slane %v1433_v15, 2  ;;  %v1397_v19 = vadd.f32 %v1396_v11, %v1395_v63  ;;  %v1416_v18 = vadd.f32 %v1415_v5, %v1414_v60 }
 0x8a7   :  { %v1450_v20 = vpop.xlane.xlu2 %1449 }
 0x8a8   :  { %v1451_v21 = vrot.slane %v1450_v20, 4  ;;  %v1398_v26 = vrot.slane %v1397_v19, 1  ;;  %v1417_v22 = vrot.slane %v1416_v18, 1  ;;  %v1435_v30 = vadd.f32 %v1434_v16, %v1433_v15 }
 0x8aa   :  { %v1452_v23 = vadd.f32 %v1451_v21, %v1450_v20  ;;  %v1399_v24 = vadd.f32 %v1398_v26, %v1397_v19  ;;  %v1418_v27 = vadd.f32 %v1417_v22, %v1416_v18  ;;  %v1436_v29 = vrot.slane %v1435_v30, 1 }
 0x8ac   :  { %v1453_v31 = vrot.slane %v1452_v23, 2  ;;  %2779 = vpush %v1399_v24  ;;  %v1437_v3 = vadd.f32 %v1436_v29, %v1435_v30 }
 0x8ad   :  { %2781 = vpush %v1418_v27 }
 0x8ae   :  { %2783 = vpush %v1437_v3  ;;  %v1454_v0 = vadd.f32 %v1453_v31, %v1452_v23  ;;  %v2632_v23 = vld [vmem:[%s3906_s2 + $0x20] sm:$0xff] }
 0x8b0   :  { %v1455_v39 = vrot.slane %v1454_v0, 1 }
 0x8b2   :  { %v1456_v2 = vadd.f32 %v1455_v39, %v1454_v0 }
 0x8b4   :  { %2785 = vpush %v1456_v2  ;;  %v1515_v45 = vpop.permute.xlu0 %1514  ;;  %v2633_v2 = vld [vmem:[%s3906_s2 + $0x28] sm:$0xff] }
 0x8b7   :  { %v1520_v57 = vpop.permute.xlu1 %1519 }
 0x8bc   :  { %v1532_v13 = vpop.permute.xlu0 %1531 }
 0x8dd   :  { %s2780_s7 = spop %2779 }
 0x8de   :  { %s3549_s8 = smul.f32 %s2780_s7, %s3176_s28  ;;  %s2782_s9 = spop %2781 }
 0x8df   :  { %s2784_s10 = spop %2783  ;;  %s3554_s11 = smul.f32 %s2782_s9, %s3176_s28 }
 0x8e0   :  { %s1471_s0 = smul.f32 %s3549_s8, %s3549_s8  ;;  %v1467_v25 = vstv %s3549_s8 }
 0x8e1   :  { %s1447_s12 = smul.f32 %s2784_s10, %s3176_s28  ;;  %v1501_v54 = vsub.f32 %v3506_v7, %v1467_v25  ;;  %v1503_v50 = vsub.f32 %v3510_v17, %v1467_v25  ;;  %v1468_v59 = vstv %s3554_s11  ;;  %v1537_v7 = vpop.permute.xlu2 %1536 }
 0x8e2   :  { %s1473_s14 = smul.f32 %s3554_s11, %s3554_s11  ;;  %v1502_v9 = vsub.f32 %v3508_v10, %v1468_v59  ;;  %v1504_v61 = vsub.f32 %v3512_v14, %v1468_v59 }
 0x8e3   :  { %s1472_s13 = ssub.f32 %s1447_s12, %s1471_s0 }
 0x8e5   :  { %s2786_s15 = spop %2785  ;;  %v1475_v35 = vstv %s1472_s13 }
 0x8e6   :  { %s1466_s17 = smul.f32 %s2786_s15, %s3176_s28  ;;  %v1479_v36 = vadd.f32 1e-05, %v1475_v35 }
 0x8e8   :  { %s1474_s1 = ssub.f32 %s1466_s17, %s1473_s14  ;;  %2912 = vrsqrt.f32 %v1479_v36  ;;  %vm1487_vm12 = vweird.f32 %v1479_v36 }
 0x8ea   :  { %v1476_v37 = vstv %s1474_s1 }
 0x8eb   :  { %v1480_v38 = vadd.f32 1e-05, %v1476_v37  ;;  %v1572_v37 = vpop.permute.xlu1 %1571 }
 0x8ed   :  { %2914 = vrsqrt.f32 %v1480_v38  ;;  %vm1497_vm15 = vweird.f32 %v1480_v38 }
 0x8ee   :  { %v2913_v41 = vpop.eup %2912 }
 0x8ef   :  { %v1482_v42 = vmul.f32 %v2913_v41, %v1479_v36  ;;  %vm1488_vm5 = vweird.f32 %v2913_v41 }
 0x8f0   :  { %vm1489_vm13 = vmor %vm1487_vm12, %vm1488_vm5 }
 0x8f1   :  { %v1483_v43 = vmul.f32 %v2913_v41, %v1482_v42 }
 0x8f3   :  { %v2915_v44 = vpop.eup %2914  ;;  %v1484_v47 = vmul.f32 0.5, %v1483_v43 }
 0x8f4   :  { %v1492_v48 = vmul.f32 %v2915_v44, %v1480_v38  ;;  %vm1498_vm14 = vweird.f32 %v2915_v44 }
 0x8f5   :  { %v1485_v28 = vsub.f32 1.5, %v1484_v47  ;;  %vm1499_vm3 = vmor %vm1497_vm15, %vm1498_vm14 }
 0x8f6   :  { %v1493_v34 = vmul.f32 %v2915_v44, %v1492_v48 }
 0x8f7   :  { %v1486_v1 = vmul.f32 %v2913_v41, %v1485_v28 }
 0x8f8   :  { %v1494_v40 = vmul.f32 0.5, %v1493_v34 }
 0x8f9   :  { %v1490_v51 = vsel %vm1489_vm13, %v2913_v41, %v1486_v1  ;;  %v1577_v41 = vpop.permute.xlu2 %1576 }
 0x8fa   :  { %v1495_v52 = vsub.f32 1.5, %v1494_v40  ;;  %v1507_v53 = vmul.f32 %v1503_v50, %v1490_v51  ;;  %v1505_v56 = vmul.f32 %v1501_v54, %v1490_v51 }
 0x8fc   :  { %v1496_v58 = vmul.f32 %v2915_v44, %v1495_v52  ;;  %v1524_v12 = vmul.f32 %v1520_v57, %v1507_v53  ;;  %v1522_v55 = vmul.f32 %v1515_v45, %v1505_v56 }
 0x8fe   :  { %v1500_v17 = vsel %vm1499_vm3, %v2915_v44, %v1496_v58  ;;  %v1541_v62 = vadd.f32 %v1537_v7, %v1524_v12  ;;  %v1539_v60 = vadd.f32 %v1532_v13, %v1522_v55 }
 0x8ff   :  { %v1508_v63 = vmul.f32 %v1504_v61, %v1500_v17  ;;  %v1506_v4 = vmul.f32 %v1502_v9, %v1500_v17 }
 0x900   :  { %v1551_v5 = vmul.f32 1.442695, %v1541_v62  ;;  %v1547_v11 = vmul.f32 1.442695, %v1539_v60  ;;  %vm1545_vm4 = vcmp.gt.f32.partialorder %v1541_v62, 0.0  ;;  %vm1543_vm7 = vcmp.gt.f32.partialorder %v1539_v60, 0.0 }
 0x901   :  { %v1525_v15 = vmul.f32 %v1520_v57, %v1508_v63  ;;  %v1523_v16 = vmul.f32 %v1515_v45, %v1506_v4 }
 0x902   :  { %2916 = vpow2.f32 %v1551_v5 }
 0x903   :  { %2918 = vpow2.f32 %v1547_v11  ;;  %v1542_v19 = vadd.f32 %v1537_v7, %v1525_v15  ;;  %v1540_v10 = vadd.f32 %v1532_v13, %v1523_v16 }
 0x905   :  { %v1553_v18 = vmul.f32 1.442695, %v1542_v19  ;;  %v1549_v14 = vmul.f32 1.442695, %v1540_v10  ;;  %vm1546_vm8 = vcmp.gt.f32.partialorder %v1542_v19, 0.0  ;;  %vm1544_vm9 = vcmp.gt.f32.partialorder %v1540_v10, 0.0 }
 0x907   :  { %2920 = vpow2.f32 %v1553_v18 }
 0x908   :  { %v2917_v20 = vpop.eup %2916  ;;  %2922 = vpow2.f32 %v1549_v14 }
 0x909   :  { %v2919_v21 = vpop.eup %2918  ;;  %v2630_v26 = vadd.f32 -1.0, %v2917_v20 }
 0x90a   :  { %v2628_v22 = vadd.f32 -1.0, %v2919_v21 }
 0x90b   :  { %v1561_v30 = vsel %vm1545_vm4, %v1541_v62, %v2630_v26  ;;  %v2640_v26 = vld [vmem:[%s3908_s4 + $0x100] sm:$0xff]  ;;  %vm1859_vm4 = vcmp.lt.s32.totalorder %v3066_v8, 126 }
 0x90c   :  { %1599 = vmatpush.msra.mxu0 %v1561_v30  ;;  %v1559_v27 = vsel %vm1543_vm7, %v1539_v60, %v2628_v22  ;;  %v2643_v22 = vld [vmem:[%s3908_s4 + $0x118] sm:$0xff]  ;;  %v2641_v30 = vld [vmem:[%s3908_s4 + $0x108] sm:$0xff] }
 0x90d   :  { %v2921_v24 = vpop.eup %2920 }
 0x90e   :  { %v2923_v29 = vpop.eup %2922  ;;  %1600 = vmatpush.msra.mxu0 %v1559_v27  ;;  %v2631_v31 = vadd.f32 -1.0, %v2921_v24 }
 0x90f   :  { %2636 = vmatmul.msk.f32.vlgmr.msra.gmra.mxu0 %vm390_vm1, %v2632_v23  ;;  %v2629_v3 = vadd.f32 -1.0, %v2923_v29 }
 0x910   :  { %v1562_v0 = vsel %vm1546_vm8, %v1542_v19, %v2631_v31 }
 0x911   :  { %1622 = vmatpush.msra.mxu1 %v1562_v0  ;;  %v1560_v39 = vsel %vm1544_vm9, %v1540_v10, %v2629_v3 }
 0x913   :  { %1623 = vmatpush.msra.mxu1 %v1560_v39 }
 0x914   :  { %2638 = vmatmul.msk.f32.vlgmr.msra.gmra.mxu1 %vm390_vm1, %v2632_v23  ;;  %v2642_v23 = vld [vmem:[%s3908_s4 + $0x110] sm:$0xff] }
 0x917   :  { %2637 = vmatmul.msk.f32.gmra.mxu0 %vm390_vm1, %v2633_v2 }
 0x91c   :  { %2639 = vmatmul.msk.f32.gmra.mxu1 %vm390_vm1, %v2633_v2 }
 0x98c   :  { %v1602_v35 = vpop.f32.mrf.mxu0 }
 0x98d   :  { %v3576_v38 = vadd.f32 %v1602_v35, %v1572_v37 }
 0x98f   :  { %v1645_v44 = vmul.f32 %v3576_v38, %v3576_v38 }
 0x991   :  { %v1625_v36 = vpop.f32.mrf.mxu1 }
 0x992   :  { %v3586_v48 = vadd.f32 %v1625_v36, %v1572_v37 }
 0x994   :  { %v1605_v42 = vpop.f32.mrf.mxu0  ;;  %v1646_v50 = vmul.f32 %v3586_v48, %v3586_v48 }
 0x995   :  { %v3578_v43 = vadd.f32 %v1605_v42, %v1577_v41 }
 0x997   :  { %v1631_v45 = vadd.f32 %v3578_v43, %v3576_v38  ;;  %v1647_v47 = vmul.f32 %v3578_v43, %v3578_v43 }
 0x999   :  { %v1632_v25 = vrot.slane %v1631_v45, 4  ;;  %v1649_v28 = vadd.f32 %v1647_v47, %v1645_v44  ;;  %v1628_v34 = vpop.f32.mrf.mxu1 }
 0x99a   :  { %v3588_v1 = vadd.f32 %v1628_v34, %v1577_v41 }
 0x99b   :  { %v1633_v40 = vadd.f32 %v1632_v25, %v1631_v45  ;;  %v1650_v54 = vrot.slane %v1649_v28, 4 }
 0x99c   :  { %v1638_v59 = vadd.f32 %v3588_v1, %v3586_v48  ;;  %v1648_v51 = vmul.f32 %v3588_v1, %v3588_v1 }
 0x99d   :  { %v1634_v52 = vrot.slane %v1633_v40, 2  ;;  %v1651_v53 = vadd.f32 %v1650_v54, %v1649_v28 }
 0x99e   :  { %v1639_v56 = vrot.slane %v1638_v59, 4  ;;  %v1656_v57 = vadd.f32 %v1648_v51, %v1646_v50 }
 0x99f   :  { %v1635_v58 = vadd.f32 %v1634_v52, %v1633_v40  ;;  %v1652_v9 = vrot.slane %v1651_v53, 2 }
 0x9a0   :  { %v1640_v61 = vadd.f32 %v1639_v56, %v1638_v59  ;;  %v1657_v12 = vrot.slane %v1656_v57, 4 }
 0x9a1   :  { %v1636_v55 = vrot.slane %v1635_v58, 1  ;;  %v1653_v7 = vadd.f32 %v1652_v9, %v1651_v53 }
 0x9a2   :  { %v1641_v13 = vrot.slane %v1640_v61, 2  ;;  %v1658_v17 = vadd.f32 %v1657_v12, %v1656_v57 }
 0x9a3   :  { %v1637_v62 = vadd.f32 %v1636_v55, %v1635_v58  ;;  %v1654_v60 = vrot.slane %v1653_v7, 1 }
 0x9a4   :  { %v1642_v63 = vadd.f32 %v1641_v13, %v1640_v61  ;;  %v1659_v4 = vrot.slane %v1658_v17, 2 }
 0x9a5   :  { %v1663_v5 = vsel %vm202_vm6, %v1637_v62, 0.0  ;;  %v1655_v11 = vadd.f32 %v1654_v60, %v1653_v7 }
 0x9a6   :  { %1664 = vadd.xlane.f32.xlu0 %v1663_v5  ;;  %v1643_v15 = vrot.slane %v1642_v63, 1  ;;  %v1660_v16 = vadd.f32 %v1659_v4, %v1658_v17 }
 0x9a7   :  { %v1701_v19 = vsel %vm202_vm6, %v1655_v11, 0.0 }
 0x9a8   :  { %1702 = vadd.xlane.f32.xlu2 %v1701_v19  ;;  %v1644_v10 = vadd.f32 %v1643_v15, %v1642_v63  ;;  %v1661_v18 = vrot.slane %v1660_v16, 1 }
 0x9aa   :  { %v1682_v14 = vsel %vm202_vm6, %v1644_v10, 0.0  ;;  %v1662_v20 = vadd.f32 %v1661_v18, %v1660_v16 }
 0x9ab   :  { %1683 = vadd.xlane.f32.xlu1 %v1682_v14 }
 0x9ac   :  { %v1720_v21 = vsel %vm202_vm6, %v1662_v20, 0.0 }
 0x9ae   :  { %1721 = vadd.xlane.f32.xlu0 %v1720_v21 }
 0x9c0   :  { %1786 = vperm.xlu2 %2829, %v2640_v26  }
 0x9c2   :  { %1808 = vperm.xlu0 %2830, %v2643_v22  }
 0x9c4   :  { %1791 = vperm.xlu1 %2831, %v2641_v30  }
 0x9cc   :  { %1803 = vperm.xlu1 %2831, %v2642_v23  }
 0xa19   :  { %v1665_v24 = vpop.xlane.xlu0 %1664 }
 0xa1a   :  { %v1666_v27 = vrot.slane %v1665_v24, 4 }
 0xa1b   :  { %v1703_v29 = vpop.xlane.xlu2 %1702 }
 0xa1c   :  { %v1667_v31 = vadd.f32 %v1666_v27, %v1665_v24  ;;  %v1704_v3 = vrot.slane %v1703_v29, 4 }
 0xa1e   :  { %v1668_v0 = vrot.slane %v1667_v31, 2  ;;  %v1705_v39 = vadd.f32 %v1704_v3, %v1703_v29  ;;  %v1684_v2 = vpop.xlane.xlu1 %1683 }
 0xa1f   :  { %v1685_v35 = vrot.slane %v1684_v2, 4 }
 0xa20   :  { %v1706_v36 = vrot.slane %v1705_v39, 2  ;;  %v1669_v37 = vadd.f32 %v1668_v0, %v1667_v31 }
 0xa21   :  { %v1686_v41 = vadd.f32 %v1685_v35, %v1684_v2  ;;  %v1722_v42 = vpop.xlane.xlu0 %1721 }
 0xa22   :  { %v1723_v44 = vrot.slane %v1722_v42, 4  ;;  %v1670_v45 = vrot.slane %v1669_v37, 1  ;;  %v1707_v47 = vadd.f32 %v1706_v36, %v1705_v39 }
 0xa23   :  { %v1687_v25 = vrot.slane %v1686_v41, 2  ;;  %v1787_v24 = vpop.permute.xlu2 %1786 }
 0xa24   :  { %v1724_v28 = vadd.f32 %v1723_v44, %v1722_v42  ;;  %v1671_v34 = vadd.f32 %v1670_v45, %v1669_v37  ;;  %v1708_v50 = vrot.slane %v1707_v47, 1 }
 0xa25   :  { %v1688_v40 = vadd.f32 %v1687_v25, %v1686_v41 }
 0xa26   :  { %v1725_v54 = vrot.slane %v1724_v28, 2  ;;  %2787 = vpush %v1671_v34  ;;  %v1709_v53 = vadd.f32 %v1708_v50, %v1707_v47 }
 0xa27   :  { %v1689_v59 = vrot.slane %v1688_v40, 1 }
 0xa28   :  { %v1726_v51 = vadd.f32 %v1725_v54, %v1724_v28 }
 0xa29   :  { %v1690_v52 = vadd.f32 %v1689_v59, %v1688_v40 }
 0xa2a   :  { %v1727_v56 = vrot.slane %v1726_v51, 1 }
 0xa2b   :  { %2789 = vpush %v1690_v52 }
 0xa2c   :  { %2791 = vpush %v1709_v53  ;;  %v1728_v57 = vadd.f32 %v1727_v56, %v1726_v51 }
 0xa2e   :  { %2793 = vpush %v1728_v57 }
 0xa36   :  { %v1792_v60 = vpop.permute.xlu1 %1791 }
 0xa3e   :  { %v1804_v39 = vpop.permute.xlu1 %1803 }
 0xa57   :  { %s2788_s4 = spop %2787 }
 0xa58   :  { %s3613_s7 = smul.f32 %s2788_s4, %s3176_s28 }
 0xa5a   :  { %s1743_s8 = smul.f32 %s3613_s7, %s3613_s7  ;;  %v1739_v5 = vstv %s3613_s7 }
 0xa5b   :  { %v1773_v18 = vsub.f32 %v3576_v38, %v1739_v5  ;;  %v1775_v14 = vsub.f32 %v3578_v43, %v1739_v5  ;;  %v1809_v38 = vpop.permute.xlu0 %1808 }
 0xa5c   :  { %s2790_s9 = spop %2789 }
 0xa5d   :  { %s3618_s10 = smul.f32 %s2790_s9, %s3176_s28  ;;  %s2792_s0 = spop %2791 }
 0xa5e   :  { %s1719_s11 = smul.f32 %s2792_s0, %s3176_s28 }
 0xa5f   :  { %s1745_s12 = smul.f32 %s3618_s10, %s3618_s10  ;;  %s2794_s13 = spop %2793  ;;  %v1740_v16 = vstv %s3618_s10 }
 0xa60   :  { %s1744_s14 = ssub.f32 %s1719_s11, %s1743_s8  ;;  %s1738_s15 = smul.f32 %s2794_s13, %s3176_s28  ;;  %v1774_v26 = vsub.f32 %v3586_v48, %v1740_v16  ;;  %v1776_v22 = vsub.f32 %v3588_v1, %v1740_v16 }
 0xa61   :  { %s2984_s28 = smov 126  }
 0xa62   :  { %v1747_v58 = vstv %s1744_s14  ;;  %s1746_s17 = ssub.f32 %s1738_s15, %s1745_s12 }
 0xa63   :  { %v1751_v9 = vadd.f32 1e-05, %v1747_v58 }
 0xa64   :  { %v1748_v61 = vstv %s1746_s17 }
 0xa65   :  { %2924 = vrsqrt.f32 %v1751_v9  ;;  %v1752_v12 = vadd.f32 1e-05, %v1748_v61  ;;  %vm1759_vm1 = vweird.f32 %v1751_v9 }
 0xa67   :  { %2926 = vrsqrt.f32 %v1752_v12  ;;  %vm1769_vm5 = vweird.f32 %v1752_v12 }
 0xa6b   :  { %v2925_v55 = vpop.eup %2924 }
 0xa6c   :  { %v1754_v7 = vmul.f32 %v2925_v55, %v1751_v9  ;;  %vm1760_vm6 = vweird.f32 %v2925_v55 }
 0xa6d   :  { %v2927_v13 = vpop.eup %2926  ;;  %vm1761_vm11 = vmor %vm1759_vm1, %vm1760_vm6 }
 0xa6e   :  { %v1755_v17 = vmul.f32 %v2925_v55, %v1754_v7  ;;  %v1764_v62 = vmul.f32 %v2927_v13, %v1752_v12  ;;  %vm1770_vm10 = vweird.f32 %v2927_v13 }
 0xa6f   :  { %vm1771_vm12 = vmor %vm1769_vm5, %vm1770_vm10 }
 0xa70   :  { %v1756_v63 = vmul.f32 0.5, %v1755_v17  ;;  %v1765_v4 = vmul.f32 %v2927_v13, %v1764_v62 }
 0xa72   :  { %v1757_v11 = vsub.f32 1.5, %v1756_v63  ;;  %v1766_v15 = vmul.f32 0.5, %v1765_v4 }
 0xa74   :  { %v1758_v19 = vmul.f32 %v2925_v55, %v1757_v11  ;;  %v1767_v10 = vsub.f32 1.5, %v1766_v15 }
 0xa76   :  { %v1762_v20 = vsel %vm1761_vm11, %v2925_v55, %v1758_v19  ;;  %v1768_v21 = vmul.f32 %v2927_v13, %v1767_v10 }
 0xa77   :  { %v1777_v30 = vmul.f32 %v1773_v18, %v1762_v20  ;;  %v1779_v23 = vmul.f32 %v1775_v14, %v1762_v20 }
 0xa78   :  { %v1772_v27 = vsel %vm1771_vm12, %v2927_v13, %v1768_v21 }
 0xa79   :  { %v1794_v29 = vmul.f32 %v1787_v24, %v1777_v30  ;;  %v1796_v31 = vmul.f32 %v1792_v60, %v1779_v23  ;;  %v1778_v3 = vmul.f32 %v1774_v26, %v1772_v27  ;;  %v1780_v0 = vmul.f32 %v1776_v22, %v1772_v27 }
 0xa7a   :  { %v3676_v30 = vshrl.u32 %v28_v6, 7 }
 0xa7b   :  { %v1811_v43 = vadd.f32 %v1804_v39, %v1794_v29  ;;  %v1813_v2 = vadd.f32 %v1809_v38, %v1796_v31  ;;  %v1795_v35 = vmul.f32 %v1787_v24, %v1778_v3  ;;  %v1797_v36 = vmul.f32 %v1792_v60, %v1780_v0 }
 0xa7c   :  { %v3679_v31 = vmul.u32 2, %v3066_v8 }
 0xa7d   :  { %v1812_v37 = vadd.f32 %v1804_v39, %v1795_v35  ;;  %v1814_v41 = vadd.f32 %v1809_v38, %v1797_v36  ;;  %v1819_v48 = vmul.f32 1.442695, %v1811_v43  ;;  %v1823_v42 = vmul.f32 1.442695, %v1813_v2 }
 0xa7e   :  { %vm1815_vm13 = vcmp.gt.f32.partialorder %v1811_v43, 0.0  ;;  %vm1817_vm14 = vcmp.gt.f32.partialorder %v1813_v2, 0.0  ;;  %v1967_v39 = vadd.s32 120, %v3676_v30 }
 0xa7f   :  { %2928 = vpow2.f32 %v1819_v48  ;;  %v1821_v1 = vmul.f32 1.442695, %v1812_v37  ;;  %v1825_v44 = vmul.f32 1.442695, %v1814_v41  ;;  %vm1816_vm15 = vcmp.gt.f32.partialorder %v1812_v37, 0.0 }
 0xa80   :  { %2930 = vpow2.f32 %v1823_v42  ;;  %vm1818_vm3 = vcmp.gt.f32.partialorder %v1814_v41, 0.0  ;;  %v1981_v48 = vadd.s32 232, %v3676_v30  ;;  %v2985_v42 = vmov 1.0  }
 0xa81   :  { %2932 = vpow2.f32 %v1821_v1  ;;  %v1964_v1 = vadd.s32 96, %v3676_v30 }
 0xa82   :  { %2934 = vpow2.f32 %v1825_v44  ;;  %v1980_v44 = vadd.s32 224, %v3676_v30  ;;  %vm2014_vm1 = vcmp.eq.s32.totalorder %v1981_v48, %v3679_v31 }
 0xa83   :  { %vm1997_vm10 = vcmp.eq.s32.totalorder %v1964_v1, %v3679_v31 }
 0xa84   :  { %vm2013_vm11 = vcmp.eq.s32.totalorder %v1980_v44, %v3679_v31 }
 0xa85   :  { %v2929_v45 = vpop.eup %2928 }
 0xa86   :  { %v2931_v47 = vpop.eup %2930  ;;  %v2644_v25 = vadd.f32 -1.0, %v2929_v45  ;;  %v1876_v45 = vld [vmem:[%s3907_s3] sm:$0xff] }
 0xa87   :  { %v2933_v28 = vpop.eup %2932  ;;  %v2646_v34 = vadd.f32 -1.0, %v2931_v47  ;;  %v1963_v47 = vadd.s32 88, %v3676_v30 }
 0xa88   :  { %v2935_v40 = vpop.eup %2934  ;;  %v2645_v54 = vadd.f32 -1.0, %v2933_v28  ;;  %v1831_v50 = vsel %vm1815_vm13, %v1811_v43, %v2644_v25  ;;  %v1966_v43 = vadd.s32 112, %v3676_v30  ;;  %v1979_v25 = vadd.s32 216, %v3676_v30 }
 0xa89   :  { %v2647_v59 = vadd.f32 -1.0, %v2935_v40  ;;  %v1833_v51 = vsel %vm1817_vm14, %v1813_v2, %v2646_v34  ;;  %v3631_v53 = vadd.f32 %v1831_v50, %v3454_v32  ;;  %v2082_v32 = vld [vmem:[%s3909_s5 + $0x8] sm:$0xff]  ;;  %v1983_v2 = vadd.s32 248, %v3676_v30 }
 0xa8a   :  { %v1832_v52 = vsel %vm1816_vm15, %v1812_v37, %v2645_v54  ;;  %v3637_v58 = vadd.f32 %v1833_v51, %v3457_v46  ;;  %v2083_v46 = vld [vmem:[%s3909_s5 + $0x10] sm:$0xff]  ;;  %v1982_v37 = vadd.s32 240, %v3676_v30  ;;  %vm1999_vm8 = vcmp.eq.s32.totalorder %v1966_v43, %v3679_v31  ;;  %v1877_v51 = vld [vmem:[%s3907_s3 + $0x8] sm:$0xff] }
 0xa8b   :  { %v3634_v56 = vadd.f32 %v1832_v52, %v3466_v33  ;;  %v1834_v57 = vsel %vm1818_vm3, %v1814_v41, %v2647_v59  ;;  %v2084_v33 = vld [vmem:[%s3909_s5 + $0x18] sm:$0xff]  ;;  %vm2016_vm7 = vcmp.eq.s32.totalorder %v1983_v2, %v3679_v31  ;;  %v1965_v41 = vadd.s32 104, %v3676_v30 }
 0xa8c   :  { %v3640_v9 = vadd.f32 %v1834_v57, %v3462_v49  ;;  %v2081_v49 = vld [vmem:[%s3909_s5] sm:$0xff]  ;;  %vm2015_vm9 = vcmp.eq.s32.totalorder %v1982_v37, %v3679_v31  ;;  %2704 = vmatpush.msk.msrb.mxu1 %vm2016_vm7, %v2985_v42  ;;  %v1962_v28 = vadd.s32 80, %v3676_v30  ;;  %v1978_v34 = vadd.s32 208, %v3676_v30 }
 0xa8d   :  { %v2837_v61 = vpack.i.bf16 %v3634_v56, %v3631_v53  ;;  %vm1998_vm6 = vcmp.eq.s32.totalorder %v1965_v41, %v3679_v31  ;;  %vm1996_vm5 = vcmp.eq.s32.totalorder %v1963_v47, %v3679_v31  ;;  %vm2012_vm12 = vcmp.eq.s32.totalorder %v1979_v25, %v3679_v31 }
 0xa8e   :  { %v2842_v12 = vpack.i.bf16 %v3640_v9, %v3637_v58  ;;  %2705 = vmatpush.msk.msrb.mxu1 %vm2015_vm9, %v2985_v42  ;;  %v1961_v40 = vadd.s32 72, %v3676_v30  ;;  %v1977_v54 = vadd.s32 200, %v3676_v30  ;;  %vm1995_vm13 = vcmp.eq.s32.totalorder %v1962_v28, %v3679_v31 }
 0xa8f   :  { %2838 = vrot.lane.b32.xlu2 %v2837_v61, %s2980_s16  ;;  %vm2011_vm14 = vcmp.eq.s32.totalorder %v1978_v34, %v3679_v31  ;;  %v1960_v50 = vadd.s32 64, %v3676_v30  ;;  %v1976_v59 = vadd.s32 192, %v3676_v30  ;;  %v1959_v52 = vadd.s32 56, %v3676_v30 }
 0xa90   :  { %2843 = vrot.lane.b32.xlu1 %v2842_v12, %s2984_s28  ;;  %2833 = vrot.lane.b32.xlu0 %v2842_v12, %s2980_s16  ;;  %vm1994_vm15 = vcmp.eq.s32.totalorder %v1961_v40, %v3679_v31  ;;  %vm2010_vm3 = vcmp.eq.s32.totalorder %v1977_v54, %v3679_v31  ;;  %v1974_v57 = vadd.s32 176, %v3676_v30 }
 0xa91   :  { %2706 = vmatpush.msk.msrb.mxu1 %vm2014_vm1, %v2985_v42  ;;  %vm1992_vm7 = vcmp.eq.s32.totalorder %v1959_v52, %v3679_v31 }
 0xa93   :  { %2707 = vmatpush.msk.msrb.mxu1 %vm2013_vm11, %v2985_v42 }
 0xa95   :  { %2708 = vmatpush.msk.msrb.mxu1 %vm2012_vm12, %v2985_v42 }
 0xa97   :  { %2853 = vrot.lane.b32.xlu2 %v2842_v12, %s2976_s25  ;;  %2709 = vmatpush.msk.msrb.mxu1 %vm2011_vm14, %v2985_v42  ;;  %v1972_v12 = vadd.s32 160, %v3676_v30 }
 0xa98   :  { %2858 = vrot.lane.b32.xlu1 %v2837_v61, %s2976_s25  ;;  %2848 = vrot.lane.b32.xlu0 %v2837_v61, %s2984_s28  ;;  %v1956_v61 = vadd.s32 32, %v3676_v30  ;;  %s2989_s28 = smov [#allocation2]  }
 0xa99   :  { %2710 = vmatpush.msk.msrb.mxu1 %vm2010_vm3, %v2985_v42  ;;  %s2520_s1 = sshll.u32 %s2989_s28, 4  ;;  %s2521_s1 = int_to_ptr.vmem [resolvable:$true] %s2520_s1 }
 0xa9a   :  { %vm1989_vm11 = vcmp.eq.s32.totalorder %v1956_v61, %v3679_v31 }
 0xa9f   :  { %2092 = vperm.xlu2 %2829, %v2082_v32   ;;  %v1878_v32 = vld [vmem:[%s3907_s3 + $0x10] sm:$0xff] }
 0xaa0   :  { %2097 = vperm.xlu1 %2831, %v2083_v46   ;;  %2087 = vperm.xlu0 %2830, %v2081_v49   ;;  %v1955_v46 = vadd.s32 24, %v3676_v30  ;;  %v1971_v49 = vadd.s32 152, %v3676_v30 }
 0xaa2   :  { %vm1988_vm12 = vcmp.eq.s32.totalorder %v1955_v46, %v3679_v31 }
 0xaa8   :  { %2102 = vperm.xlu0 %2830, %v2084_v33   ;;  %v1954_v33 = vadd.s32 16, %v3676_v30 }
 0xaaa   :  { %vm1987_vm14 = vcmp.eq.s32.totalorder %v1954_v33, %v3679_v31 }
 0xae9   :  { %v2839_v55 = vpop.permute.xlu2 %2838 }
 0xaea   :  { %v2841_v17 = vunpack.i.h.bf16 %v2839_v55  ;;  %v2840_v62 = vunpack.i.l.bf16 %v2839_v55  ;;  %v1970_v55 = vadd.s32 144, %v3676_v30 }
 0xaec   :  { %v1872_v19 = vsel %vm674_vm2, %v2840_v62, %v2841_v17  ;;  %v1874_v10 = vsel %vm674_vm2, %v2841_v17, %v2840_v62  ;;  %v1969_v17 = vadd.s32 136, %v3676_v30  ;;  %v1968_v62 = vadd.s32 128, %v3676_v30 }
 0xaf1   :  { %v2854_v16 = vpop.permute.xlu2 %2853 }
 0xaf2   :  { %v2856_v20 = vunpack.i.h.bf16 %v2854_v16  ;;  %v2855_v21 = vunpack.i.l.bf16 %v2854_v16 }
 0xaf4   :  { %v1848_v38 = vsel %vm80_vm0, %v2855_v21, %v2856_v20  ;;  %v1850_v6 = vsel %vm80_vm0, %v2856_v20, %v2855_v21 }
 0xb02   :  { %v2844_v7 = vpop.permute.xlu1 %2843  ;;  %v2834_v13 = vpop.permute.xlu0 %2833 }
 0xb03   :  { %v2836_v60 = vunpack.i.h.bf16 %v2834_v13  ;;  %v2835_v63 = vunpack.i.l.bf16 %v2834_v13  ;;  %v2846_v4 = vunpack.i.h.bf16 %v2844_v7  ;;  %v2845_v5 = vunpack.i.l.bf16 %v2844_v7  ;;  %v1879_v13 = vld [vmem:[%s3907_s3 + $0x18] sm:$0xff]  ;;  %s2987_s3 = smov 64  }
 0xb04   :  { %v1953_v7 = vadd.s32 8, %v3676_v30 }
 0xb05   :  { %v1873_v11 = vsel %vm674_vm2, %v2835_v63, %v2836_v60  ;;  %v1875_v15 = vsel %vm674_vm2, %v2836_v60, %v2835_v63  ;;  %v1861_v18 = vsel %vm1859_vm4, %v2845_v5, %v2846_v4  ;;  %v1863_v14 = vsel %vm1859_vm4, %v2846_v4, %v2845_v5 }
 0xb06   :  { %1901 = vmatpush.msra.mxu2 %v1873_v11  ;;  %1930 = vmatpush.msra.mxu3 %v1875_v15  ;;  %vm2000_vm2 = vcmp.eq.s32.totalorder %v1967_v39, %v3679_v31  ;;  %vm1986_vm3 = vcmp.eq.s32.totalorder %v1953_v7, %v3679_v31 }
 0xb07   :  { %2688 = vmatpush.msk.msrb.mxu0 %vm2000_vm2, %v2985_v42  ;;  %vm2009_vm2 = vcmp.eq.s32.totalorder %v1976_v59, %v3679_v31 }
 0xb08   :  { %1902 = vmatpush.msra.mxu2 %v1872_v19  ;;  %1931 = vmatpush.msra.mxu3 %v1874_v10 }
 0xb09   :  { %2689 = vmatpush.msk.msrb.mxu0 %vm1999_vm8, %v2985_v42  ;;  %2711 = vmatpush.msk.msrb.mxu1 %vm2009_vm2, %v2985_v42  ;;  %vm2002_vm2 = vcmp.eq.s32.totalorder %v1969_v17, %v3679_v31 }
 0xb0a   :  { %v2859_v26 = vpop.permute.xlu1 %2858  ;;  %v2849_v22 = vpop.permute.xlu0 %2848  ;;  %1903 = vmatpush.msra.mxu2 %v1861_v18  ;;  %1932 = vmatpush.msra.mxu3 %v1863_v14  ;;  %v2167_v14 = vand.u32 63, %v3066_v8 }
 0xb0b   :  { %v2851_v23 = vunpack.i.h.bf16 %v2849_v22  ;;  %v2850_v24 = vunpack.i.l.bf16 %v2849_v22  ;;  %v2861_v27 = vunpack.i.h.bf16 %v2859_v26  ;;  %v2860_v29 = vunpack.i.l.bf16 %v2859_v26  ;;  %2690 = vmatpush.msk.msrb.mxu0 %vm1998_vm6, %v2985_v42  ;;  %v2093_v26 = vpop.permute.xlu2 %2092 }
 0xb0c   :  { %vm2007_vm6 = vcmp.eq.s32.totalorder %v1974_v57, %v3679_v31 }
 0xb0d   :  { %v1860_v3 = vsel %vm1859_vm4, %v2850_v24, %v2851_v23  ;;  %v1862_v0 = vsel %vm1859_vm4, %v2851_v23, %v2850_v24  ;;  %v1847_v35 = vsel %vm80_vm0, %v2860_v29, %v2861_v27  ;;  %v1849_v36 = vsel %vm80_vm0, %v2861_v27, %v2860_v29  ;;  %2691 = vmatpush.msk.msrb.mxu0 %vm1997_vm10, %v2985_v42 }
 0xb0e   :  { %1904 = vmatpush.msra.mxu2 %v1860_v3  ;;  %1933 = vmatpush.msra.mxu3 %v1862_v0  ;;  %vm1880_vm0 = vcmask 523264   ;;  %vm1993_vm4 = vcmp.eq.s32.totalorder %v1960_v50, %v3679_v31 }
 0xb0f   :  { %2692 = vmatpush.msk.msrb.mxu0 %vm1996_vm5, %v2985_v42  ;;  %vm2005_vm5 = vcmp.eq.s32.totalorder %v1972_v12, %v3679_v31 }
 0xb10   :  { %1905 = vmatpush.msra.mxu2 %v1848_v38  ;;  %1934 = vmatpush.msra.mxu3 %v1850_v6 }
 0xb11   :  { %2693 = vmatpush.msk.msrb.mxu0 %vm1995_vm13, %v2985_v42  ;;  %vm2004_vm13 = vcmp.eq.s32.totalorder %v1971_v49, %v3679_v31 }
 0xb12   :  { %1906 = vmatpush.msra.mxu2 %v1847_v35  ;;  %1935 = vmatpush.msra.mxu3 %v1849_v36  ;;  %v2088_v20 = vpop.permute.xlu0 %2087  ;;  %v2098_v37 = vpop.permute.xlu1 %2097 }
 0xb13   :  { %2694 = vmatpush.msk.msrb.mxu0 %vm1994_vm15, %v2985_v42  ;;  %vm2003_vm15 = vcmp.eq.s32.totalorder %v1970_v55, %v3679_v31 }
 0xb14   :  { %1907 = vmatpush.msra.mxu2 %v3637_v58  ;;  %1936 = vmatpush.msra.mxu3 %v3640_v9  ;;  %v1957_v58 = vadd.s32 40, %v3676_v30  ;;  %v1973_v9 = vadd.s32 168, %v3676_v30 }
 0xb15   :  { %2695 = vmatpush.msk.msrb.mxu0 %vm1993_vm4, %v2985_v42  ;;  %vm1985_vm4 = vcmp.eq.s32.totalorder %v3676_v30, %v3679_v31 }
 0xb16   :  { %1908 = vmatpush.msra.mxu2 %v3631_v53  ;;  %1937 = vmatpush.msra.mxu3 %v3634_v56  ;;  %v1975_v53 = vadd.s32 184, %v3676_v30  ;;  %v1958_v56 = vadd.s32 48, %v3676_v30  ;;  %vm1990_vm1 = vcmp.eq.s32.totalorder %v1957_v58, %v3679_v31  ;;  %vm2006_vm10 = vcmp.eq.s32.totalorder %v1973_v9, %v3679_v31 }
 0xb17   :  { %2648 = vmatmul.msk.f32.vlgmr.msra.gmra.mxu2 %vm1880_vm0, %v1876_v45  ;;  %2652 = vmatmul.msk.f32.vlgmr.msra.gmra.mxu3 %vm1880_vm0, %v1876_v45  ;;  %v2986_v30 = vmov 0.0  }
 0xb18   :  { %vm2008_vm8 = vcmp.eq.s32.totalorder %v1975_v53, %v3679_v31  ;;  %vm1991_vm9 = vcmp.eq.s32.totalorder %v1958_v56, %v3679_v31  ;;  %2696 = vmatpush.msk.msrb.mxu0 %vm1992_vm7, %v2985_v42  ;;  %vm2001_vm7 = vcmp.eq.s32.totalorder %v1968_v62, %v3679_v31 }
 0xb19   :  { %2712 = vmatpush.msk.msrb.mxu1 %vm2008_vm8, %v2985_v42  ;;  %vm2207_vm8 = vcmask 516096  }
 0xb1a   :  { %2697 = vmatpush.msk.msrb.mxu0 %vm1991_vm9, %v2985_v42  ;;  %v2103_v45 = vpop.permute.xlu0 %2102 }
 0xb1b   :  { %2713 = vmatpush.msk.msrb.mxu1 %vm2007_vm6, %v2985_v42  ;;  %vm2178_vm6 = vcmp.lt.s32.totalorder %v3066_v8, 64 }
 0xb1c   :  { %2698 = vmatpush.msk.msrb.mxu0 %vm1990_vm1, %v2985_v42 }
 0xb1d   :  { %2714 = vmatpush.msk.msrb.mxu1 %vm2006_vm10, %v2985_v42 }
 0xb1e   :  { %2699 = vmatpush.msk.msrb.mxu0 %vm1989_vm11, %v2985_v42 }
 0xb1f   :  { %2649 = vmatmul.msk.f32.gmra.mxu2 %vm1880_vm0, %v1877_v51  ;;  %2653 = vmatmul.msk.f32.gmra.mxu3 %vm1880_vm0, %v1877_v51 }
 0xb20   :  { %2715 = vmatpush.msk.msrb.mxu1 %vm2005_vm5, %v2985_v42  ;;  %2700 = vmatpush.msk.msrb.mxu0 %vm1988_vm12, %v2985_v42 }
 0xb22   :  { %2716 = vmatpush.msk.msrb.mxu1 %vm2004_vm13, %v2985_v42  ;;  %2701 = vmatpush.msk.msrb.mxu0 %vm1987_vm14, %v2985_v42 }
 0xb24   :  { %2717 = vmatpush.msk.msrb.mxu1 %vm2003_vm15, %v2985_v42  ;;  %2702 = vmatpush.msk.msrb.mxu0 %vm1986_vm3, %v2985_v42 }
 0xb26   :  { %2703 = vmatpush.msk.msrb.mxu0 %vm1985_vm4, %v2985_v42  ;;  %2718 = vmatpush.msk.msrb.mxu1 %vm2002_vm2, %v2985_v42 }
 0xb27   :  { %2650 = vmatmul.msk.f32.gmra.mxu2 %vm1880_vm0, %v1878_v32  ;;  %2654 = vmatmul.msk.f32.gmra.mxu3 %vm1880_vm0, %v1878_v32 }
 0xb28   :  { %2719 = vmatpush.msk.msrb.mxu1 %vm2001_vm7, %v2985_v42 }
 0xb2f   :  { %2651 = vmatmul.msk.f32.gmra.mxu2 %vm1880_vm0, %v1879_v13  ;;  %2655 = vmatmul.msk.f32.gmra.mxu3 %vm1880_vm0, %v1879_v13  ;;  %vm2175_vm0 = vcmp.lt.s32.totalorder %v2167_v14, 63 }
 0xb30   :  { %v2720_v23 = vsel %vm2175_vm0, 1.0, %v2986_v30  ;;  %v2725_v30 = vld [vmem:[%s3909_s5 + $0x40] sm:$0xff] }
 0xb9a   :  { %v1910_v60 = vpop.f32.mrf.mxu2  ;;  %v1939_v63 = vpop.f32.mrf.mxu3 }
 0xb9b   :  { %2121 = vmatmul.f32.vlgmr.msrb.gmra.mxu0 %v1910_v60  ;;  %2150 = vmatmul.f32.vlgmr.msrb.gmra.mxu1 %v1939_v63 }
 0xba2   :  { %v1913_v4 = vpop.f32.mrf.mxu2  ;;  %v1942_v5 = vpop.f32.mrf.mxu3 }
 0xba3   :  { %2124 = vmatmul.f32.gmra.mxu0 %v1913_v4  ;;  %2153 = vmatmul.f32.gmra.mxu1 %v1942_v5 }
 0xbaa   :  { %v1916_v11 = vpop.f32.mrf.mxu2  ;;  %v1945_v15 = vpop.f32.mrf.mxu3 }
 0xbab   :  { %2127 = vmatmul.f32.gmra.mxu0 %v1916_v11  ;;  %2156 = vmatmul.f32.gmra.mxu1 %v1945_v15 }
 0xbb2   :  { %v1919_v16 = vpop.f32.mrf.mxu2  ;;  %v1948_v19 = vpop.f32.mrf.mxu3 }
 0xbb3   :  { %2130 = vmatmul.f32.gmra.mxu0 %v1919_v16  ;;  %2159 = vmatmul.f32.gmra.mxu1 %v1948_v19 }
 0xc18   :  { %v2122_v10 = vpop.f32.mrf.mxu0  ;;  %v2151_v18 = vpop.f32.mrf.mxu1 }
 0xc19   :  { %v2123_v21 = vadd.f32 %v2122_v10, %v2088_v20 }
 0xc1b   :  { %v3814_v22 = vadd.f32 %v2151_v18, %v2123_v21 }
 0xc1d   :  { %v2189_v31 = vmul.f32 %v2720_v23, %v3814_v22 }
 0xc1f   :  { %v2198_v38 = vmul.f32 %v2189_v31, %v2189_v31 }
 0xc20   :  { %v2125_v24 = vpop.f32.mrf.mxu0  ;;  %v2154_v27 = vpop.f32.mrf.mxu1 }
 0xc21   :  { %v2126_v29 = vadd.f32 %v2125_v24, %v2093_v26 }
 0xc23   :  { %v3817_v3 = vadd.f32 %v2154_v27, %v2126_v29  ;;  %v2723_v27 = vld [vmem:[%s3909_s5 + $0x30] sm:$0xff]  ;;  %v2728_v29 = vld [vmem:[%s3909_s5 + $0x58] sm:$0xff] }
 0xc25   :  { %v2190_v0 = vmul.f32 %v2720_v23, %v3817_v3 }
 0xc27   :  { %v2191_v6 = vadd.f32 %v2190_v0, %v2189_v31  ;;  %v2199_v39 = vmul.f32 %v2190_v0, %v2190_v0  ;;  %v2988_v31 = vmov 1008.0   ;;  %v2722_v0 = vld [vmem:[%s3909_s5 + $0x28] sm:$0xff] }
 0xc28   :  { %v2128_v43 = vpop.f32.mrf.mxu0  ;;  %v2157_v2 = vpop.f32.mrf.mxu1  ;;  %2936 = vrcp.f32 %v2988_v31 }
 0xc29   :  { %v2192_v35 = vrot.slane %v2191_v6, 4  ;;  %v2200_v36 = vadd.f32 %v2199_v39, %v2198_v38  ;;  %v2129_v42 = vadd.f32 %v2128_v43, %v2098_v37  ;;  %v2724_v43 = vld [vmem:[%s3909_s5 + $0x38] sm:$0xff]  ;;  %v2726_v37 = vld [vmem:[%s3909_s5 + $0x48] sm:$0xff] }
 0xc2b   :  { %v2193_v41 = vadd.f32 %v2192_v35, %v2191_v6  ;;  %v2201_v48 = vrot.slane %v2200_v36, 4  ;;  %v3820_v47 = vadd.f32 %v2157_v2, %v2129_v42  ;;  %v2721_v6 = vld [vmem:[%s3909_s5 + $0x20] sm:$0xff] }
 0xc2d   :  { %v2194_v1 = vrot.slane %v2193_v41, 2  ;;  %v2202_v44 = vadd.f32 %v2201_v48, %v2200_v36  ;;  %v2341_v51 = vmul.f32 %v2720_v23, %v3820_v47 }
 0xc2e   :  { %v2937_v38 = vpop.eup %2936 }
 0xc2f   :  { %v2195_v25 = vadd.f32 %v2194_v1, %v2193_v41  ;;  %v2203_v28 = vrot.slane %v2202_v44, 2  ;;  %v2350_v9 = vmul.f32 %v2341_v51, %v2341_v51  ;;  %v2219_v39 = vmul.f32 1008.0, %v2937_v38 }
 0xc30   :  { %v2131_v34 = vpop.f32.mrf.mxu0  ;;  %v2160_v40 = vpop.f32.mrf.mxu1  ;;  %vm2223_vm9 = vweird.f32 %v2937_v38 }
 0xc31   :  { %v2132_v54 = vadd.f32 %v2131_v34, %v2103_v45  ;;  %v2196_v50 = vrot.slane %v2195_v25, 1  ;;  %v2204_v59 = vadd.f32 %v2203_v28, %v2202_v44  ;;  %v2220_v2 = vsub.f32 1.0, %v2219_v39 }
 0xc33   :  { %v3823_v52 = vadd.f32 %v2160_v40, %v2132_v54  ;;  %v2197_v53 = vadd.f32 %v2196_v50, %v2195_v25  ;;  %v2205_v56 = vrot.slane %v2204_v59, 1  ;;  %v2221_v48 = vmul.f32 %v2937_v38, %v2220_v2  ;;  %v2727_v25 = vld [vmem:[%s3909_s5 + $0x50] sm:$0xff] }
 0xc35   :  { %v2342_v57 = vmul.f32 %v2720_v23, %v3823_v52  ;;  %2228 = vrot.lane.b32.xlu2 %v2197_v53, %s2987_s3  ;;  %v2206_v58 = vadd.f32 %v2205_v56, %v2204_v59  ;;  %v2208_v11 = vsel %vm2207_vm8, %v2197_v53, 0.0  ;;  %v2222_v44 = vadd.f32 %v2937_v38, %v2221_v48 }
 0xc37   :  { %v2343_v61 = vadd.f32 %v2342_v57, %v2341_v51  ;;  %v2351_v12 = vmul.f32 %v2342_v57, %v2342_v57  ;;  %2270 = vrot.lane.b32.xlu1 %v2206_v58, %s2987_s3  ;;  %v2250_v16 = vsel %vm2207_vm8, %v2206_v58, 0.0  ;;  %v2224_v34 = vsel %vm2223_vm9, %v2937_v38, %v2222_v44 }
 0xc39   :  { %v2344_v32 = vrot.slane %v2343_v61, 4  ;;  %v2352_v46 = vadd.f32 %v2351_v12, %v2350_v9 }
 0xc3b   :  { %v2345_v49 = vadd.f32 %v2344_v32, %v2343_v61  ;;  %v2353_v33 = vrot.slane %v2352_v46, 4 }
 0xc3d   :  { %v2346_v55 = vrot.slane %v2345_v49, 2  ;;  %v2354_v7 = vadd.f32 %v2353_v33, %v2352_v46 }
 0xc3f   :  { %v2347_v13 = vadd.f32 %v2346_v55, %v2345_v49  ;;  %v2355_v17 = vrot.slane %v2354_v7, 2 }
 0xc41   :  { %v2348_v62 = vrot.slane %v2347_v13, 1  ;;  %v2356_v60 = vadd.f32 %v2355_v17, %v2354_v7 }
 0xc43   :  { %v2349_v63 = vadd.f32 %v2348_v62, %v2347_v13  ;;  %v2357_v4 = vrot.slane %v2356_v60, 1 }
 0xc45   :  { %2379 = vrot.lane.b32.xlu0 %v2349_v63, %s2987_s3  ;;  %v2358_v5 = vadd.f32 %v2357_v4, %v2356_v60  ;;  %v2359_v15 = vsel %vm2207_vm8, %v2349_v63, 0.0 }
 0xc47   :  { %2421 = vrot.lane.b32.xlu2 %v2358_v5, %s2987_s3  ;;  %v2401_v26 = vsel %vm2207_vm8, %v2358_v5, 0.0 }
 0xc61   :  { %2209 = vadd.xlane.f32.xlu1 %v2208_v11 }
 0xc6f   :  { %2360 = vadd.xlane.f32.xlu0 %v2359_v15 }
 0xc70   :  { %2251 = vadd.xlane.f32.xlu2 %v2250_v16 }
 0xc8f   :  { %v2229_v19 = vpop.permute.xlu2 %2228 }
 0xc90   :  { %v2231_v10 = vsel %vm2207_vm8, %v2229_v19, 0.0 }
 0xc91   :  { %2232 = vadd.xlane.f32.xlu0 %v2231_v10 }
 0xca1   :  { %v2422_v18 = vpop.permute.xlu2 %2421 }
 0xca2   :  { %v2424_v14 = vsel %vm2207_vm8, %v2422_v18, 0.0 }
 0xca3   :  { %2425 = vadd.xlane.f32.xlu0 %v2424_v14 }
 0xca9   :  { %v2271_v20 = vpop.permute.xlu1 %2270 }
 0xcaa   :  { %v2273_v21 = vsel %vm2207_vm8, %v2271_v20, 0.0 }
 0xcab   :  { %2274 = vadd.xlane.f32.xlu1 %v2273_v21 }
 0xcb3   :  { %2402 = vadd.xlane.f32.xlu1 %v2401_v26 }
 0xcb7   :  { %v2380_v23 = vpop.permute.xlu0 %2379  ;;  %2331 = vperm.xlu0 %2830, %v2725_v30  }
 0xcb8   :  { %v2382_v24 = vsel %vm2207_vm8, %v2380_v23, 0.0 }
 0xcb9   :  { %2383 = vadd.xlane.f32.xlu2 %v2382_v24 }
 0xcbf   :  { %2470 = vperm.xlu0 %2830, %v2723_v27  }
 0xcc7   :  { %2487 = vperm.xlu0 %2830, %v2728_v29  }
 0xccc   :  { %2324 = vperm.xlu1 %2831, %v2722_v0  }
 0xcd1   :  { %2319 = vperm.xlu2 %2829, %v2721_v6  }
 0xcd4   :  { %v2210_v35 = vpop.xlane.xlu1 %2209  ;;  %2475 = vperm.xlu1 %2831, %v2724_v43  }
 0xcd5   :  { %v2211_v36 = vrot.slane %v2210_v35, 4 }
 0xcd7   :  { %v2212_v41 = vadd.f32 %v2211_v36, %v2210_v35 }
 0xcd9   :  { %v2213_v42 = vrot.slane %v2212_v41, 2  ;;  %2336 = vperm.xlu2 %2829, %v2726_v37  }
 0xcdb   :  { %v2214_v1 = vadd.f32 %v2213_v42, %v2212_v41 }
 0xcdd   :  { %v2215_v45 = vrot.slane %v2214_v1, 1 }
 0xcdf   :  { %v2216_v28 = vadd.f32 %v2215_v45, %v2214_v1 }
 0xce1   :  { %2795 = vpush %v2216_v28  ;;  %2482 = vperm.xlu2 %2829, %v2727_v25  }
 0xce2   :  { %2797 = vpush %v2224_v34  ;;  %v2361_v54 = vpop.xlane.xlu0 %2360 }
 0xce3   :  { %v2252_v40 = vpop.xlane.xlu2 %2251  ;;  %v2362_v33 = vrot.slane %v2361_v54, 4 }
 0xce4   :  { %v2253_v50 = vrot.slane %v2252_v40, 4 }
 0xce5   :  { %v2363_v55 = vadd.f32 %v2362_v33, %v2361_v54 }
 0xce6   :  { %v2254_v59 = vadd.f32 %v2253_v50, %v2252_v40 }
 0xce7   :  { %v2364_v7 = vrot.slane %v2363_v55, 2 }
 0xce8   :  { %v2255_v51 = vrot.slane %v2254_v59, 2 }
 0xce9   :  { %v2365_v63 = vadd.f32 %v2364_v7, %v2363_v55 }
 0xcea   :  { %v2256_v58 = vadd.f32 %v2255_v51, %v2254_v59 }
 0xceb   :  { %v2366_v16 = vrot.slane %v2365_v63, 1 }
 0xcec   :  { %v2257_v12 = vrot.slane %v2256_v58, 1 }
 0xced   :  { %v2367_v21 = vadd.f32 %v2366_v16, %v2365_v63 }
 0xcee   :  { %v2258_v49 = vadd.f32 %v2257_v12, %v2256_v58 }
 0xd04   :  { %v2233_v53 = vpop.xlane.xlu0 %2232 }
 0xd05   :  { %v2234_v56 = vrot.slane %v2233_v53, 4 }
 0xd07   :  { %v2235_v57 = vadd.f32 %v2234_v56, %v2233_v53 }
 0xd09   :  { %v2236_v9 = vrot.slane %v2235_v57, 2 }
 0xd0b   :  { %v2237_v61 = vadd.f32 %v2236_v9, %v2235_v57 }
 0xd0d   :  { %v2238_v32 = vrot.slane %v2237_v61, 1 }
 0xd0f   :  { %v2239_v46 = vadd.f32 %v2238_v32, %v2237_v61 }
 0xd11   :  { %2799 = vpush %v2239_v46 }
 0xd12   :  { %2801 = vpush %v2258_v49  ;;  %s2796_s5 = spop %2795 }
 0xd13   :  { %s3858_s21 = spop %2797 }
 0xd14   :  { %s3861_s22 = smul.f32 %s3858_s21, %s2796_s5  ;;  %s2990_s5 = smov 128  }
 0xd16   :  { %v2426_v60 = vpop.xlane.xlu0 %2425  ;;  %s2295_s24 = smul.f32 %s3861_s22, %s3861_s22  ;;  %v2292_v34 = vstv %s3861_s22 }
 0xd17   :  { %v2427_v5 = vrot.slane %v2426_v60, 4 }
 0xd19   :  { %v2428_v18 = vadd.f32 %v2427_v5, %v2426_v60 }
 0xd1b   :  { %v2429_v23 = vrot.slane %v2428_v18, 2 }
 0xd1d   :  { %v2430_v0 = vadd.f32 %v2429_v23, %v2428_v18 }
 0xd1e   :  { %v2275_v13 = vpop.xlane.xlu1 %2274 }
 0xd1f   :  { %v2276_v17 = vrot.slane %v2275_v13, 4  ;;  %v2431_v43 = vrot.slane %v2430_v0, 1 }
 0xd21   :  { %v2277_v62 = vadd.f32 %v2276_v17, %v2275_v13  ;;  %v2432_v36 = vadd.f32 %v2431_v43, %v2430_v0 }
 0xd23   :  { %v2278_v4 = vrot.slane %v2277_v62, 2 }
 0xd25   :  { %v2279_v11 = vadd.f32 %v2278_v4, %v2277_v62 }
 0xd26   :  { %v2403_v15 = vpop.xlane.xlu1 %2402 }
 0xd27   :  { %v2404_v19 = vrot.slane %v2403_v15, 4  ;;  %v2280_v10 = vrot.slane %v2279_v11, 1 }
 0xd29   :  { %v2405_v14 = vadd.f32 %v2404_v19, %v2403_v15  ;;  %v2281_v20 = vadd.f32 %v2280_v10, %v2279_v11  ;;  %v2332_v12 = vpop.permute.xlu0 %2331 }
 0xd2b   :  { %2803 = vpush %v2281_v20  ;;  %v2406_v26 = vrot.slane %v2405_v14, 2 }
 0xd2c   :  { %2805 = vpush %v2367_v21  ;;  %v2384_v30 = vpop.xlane.xlu2 %2383 }
 0xd2d   :  { %v2385_v24 = vrot.slane %v2384_v30, 4  ;;  %v2407_v29 = vadd.f32 %v2406_v26, %v2405_v14 }
 0xd2f   :  { %v2386_v27 = vadd.f32 %v2385_v24, %v2384_v30  ;;  %v2408_v6 = vrot.slane %v2407_v29, 1 }
 0xd31   :  { %v2387_v31 = vrot.slane %v2386_v27, 2  ;;  %v2409_v35 = vadd.f32 %v2408_v6, %v2407_v29  ;;  %v2471_v5 = vpop.permute.xlu0 %2470 }
 0xd33   :  { %v2388_v38 = vadd.f32 %v2387_v31, %v2386_v27 }
 0xd34   :  { %v2320_v28 = vpop.permute.xlu2 %2319 }
 0xd35   :  { %v2389_v39 = vrot.slane %v2388_v38, 1 }
 0xd37   :  { %v2390_v2 = vadd.f32 %v2389_v39, %v2388_v38 }
 0xd39   :  { %2807 = vpush %v2390_v2  ;;  %v2488_v6 = vpop.permute.xlu0 %2487 }
 0xd3a   :  { %2809 = vpush %v2409_v35 }
 0xd3b   :  { %2811 = vpush %v2432_v36 }
 0xd3c   :  { %v2337_v7 = vpop.permute.xlu2 %2336 }
 0xd3e   :  { %v2325_v49 = vpop.permute.xlu1 %2324 }
 0xd42   :  { %s2800_s2 = spop %2799 }
 0xd43   :  { %s2802_s16 = spop %2801  ;;  %s3864_s25 = smul.f32 %s2800_s2, %s3858_s21 }
 0xd44   :  { %s2268_s23 = smul.f32 %s2802_s16, %s3858_s21  ;;  %v2483_v39 = vpop.permute.xlu2 %2482 }
 0xd45   :  { %s2297_s26 = smul.f32 %s3864_s25, %s3864_s25  ;;  %v2293_v45 = vstv %s3864_s25 }
 0xd46   :  { %s2296_s29 = ssub.f32 %s2268_s23, %s2295_s24  ;;  %v2294_v54 = vsel %vm2178_vm6, %v2292_v34, %v2293_v45  ;;  %v2476_v29 = vpop.permute.xlu1 %2475 }
 0xd47   :  { %v2313_v58 = vsub.f32 %v3814_v22, %v2294_v54  ;;  %v2314_v9 = vsub.f32 %v3817_v3, %v2294_v54 }
 0xd48   :  { %v2299_v37 = vstv %s2296_s29 }
 0xd5c   :  { %s2804_s27 = spop %2803 }
 0xd5d   :  { %s2291_s30 = smul.f32 %s2804_s27, %s3858_s21  ;;  %s2806_s3 = spop %2805 }
 0xd5e   :  { %s3876_s7 = smul.f32 %s2806_s3, %s3858_s21 }
 0xd5f   :  { %s2298_s4 = ssub.f32 %s2291_s30, %s2297_s26 }
 0xd60   :  { %s2446_s8 = smul.f32 %s3876_s7, %s3876_s7  ;;  %v2443_v15 = vstv %s3876_s7 }
 0xd61   :  { %v2300_v41 = vstv %s2298_s4 }
 0xd62   :  { %v2301_v48 = vsel %vm2178_vm6, %v2299_v37, %v2300_v41 }
 0xd63   :  { %v2302_v42 = vadd.f32 1e-05, %v2301_v48 }
 0xd65   :  { %2938 = vrsqrt.f32 %v2302_v42  ;;  %vm2309_vm10 = vweird.f32 %v2302_v42 }
 0xd6a   :  { %s2808_s9 = spop %2807 }
 0xd6b   :  { %v2939_v1 = vpop.eup %2938  ;;  %s3881_s10 = smul.f32 %s2808_s9, %s3858_s21  ;;  %s2810_s0 = spop %2809 }
 0xd6c   :  { %v2304_v44 = vmul.f32 %v2939_v1, %v2302_v42  ;;  %s2419_s11 = smul.f32 %s2810_s0, %s3858_s21  ;;  %s2812_s12 = spop %2811  ;;  %vm2310_vm1 = vweird.f32 %v2939_v1 }
 0xd6d   :  { %s2448_s13 = smul.f32 %s3881_s10, %s3881_s10  ;;  %vm2311_vm11 = vmor %vm2309_vm10, %vm2310_vm1  ;;  %v2444_v4 = vstv %s3881_s10 }
 0xd6e   :  { %v2305_v25 = vmul.f32 %v2939_v1, %v2304_v44  ;;  %s2447_s14 = ssub.f32 %s2419_s11, %s2446_s8  ;;  %s2442_s15 = smul.f32 %s2812_s12, %s3858_s21  ;;  %v2445_v16 = vsel %vm2178_vm6, %v2443_v15, %v2444_v4 }
 0xd6f   :  { %v2464_v20 = vsub.f32 %v3820_v47, %v2445_v16  ;;  %v2465_v21 = vsub.f32 %v3823_v52, %v2445_v16  ;;  %s2991_s21 = smov 8  }
 0xd70   :  { %v2306_v40 = vmul.f32 0.5, %v2305_v25  ;;  %s2449_s17 = ssub.f32 %s2442_s15, %s2448_s13  ;;  %v2450_v59 = vstv %s2447_s14 }
 0xd72   :  { %v2307_v50 = vsub.f32 1.5, %v2306_v40  ;;  %v2451_v51 = vstv %s2449_s17 }
 0xd73   :  { %v2452_v53 = vsel %vm2178_vm6, %v2450_v59, %v2451_v51 }
 0xd74   :  { %v2308_v56 = vmul.f32 %v2939_v1, %v2307_v50  ;;  %v2453_v57 = vadd.f32 1e-05, %v2452_v53 }
 0xd76   :  { %v2312_v61 = vsel %vm2311_vm11, %v2939_v1, %v2308_v56  ;;  %2940 = vrsqrt.f32 %v2453_v57  ;;  %vm2460_vm12 = vweird.f32 %v2453_v57 }
 0xd77   :  { %v2315_v32 = vmul.f32 %v2313_v58, %v2312_v61  ;;  %v2316_v46 = vmul.f32 %v2314_v9, %v2312_v61 }
 0xd79   :  { %v2327_v33 = vmul.f32 %v2320_v28, %v2315_v32  ;;  %v2328_v55 = vmul.f32 %v2325_v49, %v2316_v46 }
 0xd7b   :  { %v2339_v13 = vadd.f32 %v2332_v12, %v2327_v33  ;;  %v2340_v17 = vadd.f32 %v2337_v7, %v2328_v55 }
 0xd7c   :  { %v2941_v62 = vpop.eup %2940 }
 0xd7d   :  { %v2496_v60 = vmul.f32 1.442695, %v2339_v13  ;;  %v2498_v63 = vmul.f32 1.442695, %v2340_v17  ;;  %v2455_v22 = vmul.f32 %v2941_v62, %v2453_v57  ;;  %vm2461_vm5 = vweird.f32 %v2941_v62 }
 0xd7e   :  { %vm2462_vm13 = vmor %vm2460_vm12, %vm2461_vm5  ;;  %vm2492_vm14 = vcmp.gt.f32.partialorder %v2339_v13, 0.0  ;;  %vm2493_vm15 = vcmp.gt.f32.partialorder %v2340_v17, 0.0 }
 0xd7f   :  { %2942 = vpow2.f32 %v2496_v60  ;;  %v2456_v3 = vmul.f32 %v2941_v62, %v2455_v22 }
 0xd80   :  { %2944 = vpow2.f32 %v2498_v63 }
 0xd81   :  { %v2457_v11 = vmul.f32 0.5, %v2456_v3 }
 0xd83   :  { %v2458_v19 = vsub.f32 1.5, %v2457_v11 }
 0xd85   :  { %v2943_v10 = vpop.eup %2942  ;;  %v2459_v18 = vmul.f32 %v2941_v62, %v2458_v19 }
 0xd86   :  { %v2945_v14 = vpop.eup %2944  ;;  %v2729_v26 = vadd.f32 -1.0, %v2943_v10 }
 0xd87   :  { %v2463_v30 = vsel %vm2462_vm13, %v2941_v62, %v2459_v18  ;;  %v2730_v23 = vadd.f32 -1.0, %v2945_v14 }
 0xd88   :  { %v2466_v24 = vmul.f32 %v2464_v20, %v2463_v30  ;;  %v2467_v27 = vmul.f32 %v2465_v21, %v2463_v30  ;;  %v2508_v8 = vsel %vm2492_vm14, %v2339_v13, %v2729_v26 }
 0xd89   :  { %v2509_v31 = vsel %vm2493_vm15, %v2340_v17, %v2730_v23  ;;  %2512 = vst [vmem:[#allocation2] sm:$0xff] %v2508_v8 }
 0xd8a   :  { %v2478_v0 = vmul.f32 %v2471_v5, %v2466_v24  ;;  %v2479_v38 = vmul.f32 %v2476_v29, %v2467_v27  ;;  %2513 = vst [vmem:[#allocation2 + $0x8] sm:$0xff] %v2509_v31 }
 0xd8c   :  { %v2490_v47 = vadd.f32 %v2483_v39, %v2478_v0  ;;  %v2491_v43 = vadd.f32 %v2488_v6, %v2479_v38 }
 0xd8e   :  { %v2500_v52 = vmul.f32 1.442695, %v2490_v47  ;;  %v2502_v2 = vmul.f32 1.442695, %v2491_v43  ;;  %vm2494_vm3 = vcmp.gt.f32.partialorder %v2490_v47, 0.0  ;;  %vm2495_vm4 = vcmp.gt.f32.partialorder %v2491_v43, 0.0 }
 0xd90   :  { %2946 = vpow2.f32 %v2500_v52 }
 0xd91   :  { %2948 = vpow2.f32 %v2502_v2 }
 0xd96   :  { %v2947_v35 = vpop.eup %2946 }
 0xd97   :  { %v2949_v36 = vpop.eup %2948  ;;  %v2731_v37 = vadd.f32 -1.0, %v2947_v35 }
 0xd98   :  { %v2732_v41 = vadd.f32 -1.0, %v2949_v36 }
 0xd99   :  { %v2510_v48 = vsel %vm2494_vm3, %v2490_v47, %v2731_v37 }
 0xd9a   :  { %v2511_v42 = vsel %vm2495_vm4, %v2491_v43, %v2732_v41  ;;  %2514 = vst [vmem:[#allocation2 + $0x10] sm:$0xff] %v2510_v48 }
 0xd9b   :  { %2515 = vst [vmem:[#allocation2 + $0x18] sm:$0xff] %v2511_v42 }
 0xd9c   :  { %2528 = dma.vmem_to_hbm [thread:$0]  %s2521_s1, 512, %s2523_s20, [#allocation3], %s2990_s5, %s2990_s5, %s2991_s21  }
 0xd9d   :  { %2974 = dma.done.wait [#allocation3], 512  }
 0xd9e   :  { %2975 = vsyncadd [#allocation3], 4294966784 }
 0xd9f   :  { %2533 = vsyncpa [#allocation3], 1 }

</bundles_post_ra>
